<compile_context>
chip_gen: v7x
topology: tpu7x:2x2x1
jax: 0.10.0
libtpu: 0.0.40
codegen_flags: <defaults>
</compile_context>

<pallas_src>
import functools

import jax
import jax.numpy as jnp
import numpy as np
from jax import lax
from jax.experimental import pallas as pl
from jax.experimental.pallas import tpu as pltpu

LANE = 128
SUBLANE = 8


def _round_up(x, m):
    return (x + m - 1) // m * m


# ----------------------------- Pallas kernel --------------------------------

def make_fused_lstm_kernel(num_layers, T, Bp, Fp, Hp, Op):
    """Fused kernel: all LSTM layers + FC head in one invocation.

    Ref layout (in order):
      x_ref                     : (T, Bp, Fp)   time-major padded input
      per layer l               : wih (Fin_p, 4Hp), whh (Hp, 4Hp), b (1, 4Hp)
      fc_w_ref                  : (Hp, Op)
      fc_b_ref                  : (1, Op)
      out_ref                   : (Bp, Op)
      seq_ref   (scratch, VMEM) : (T, Bp, Hp)   inter-layer hidden sequence
      xproj_ref (scratch, VMEM) : (T, Bp, 4Hp)  hoisted input projection
    """
    H4 = 4 * Hp

    def kernel(*refs):
        x_ref = refs[0]
        layer_refs = refs[1:1 + 3 * num_layers]
        fc_w_ref = refs[1 + 3 * num_layers]
        fc_b_ref = refs[2 + 3 * num_layers]
        out_ref = refs[3 + 3 * num_layers]
        seq_ref = refs[4 + 3 * num_layers]
        xproj_ref = refs[5 + 3 * num_layers]

        h_last = jnp.zeros((Bp, Hp), jnp.float32)

        for l in range(num_layers):
            wih_ref = layer_refs[3 * l]
            whh_ref = layer_refs[3 * l + 1]
            b_ref = layer_refs[3 * l + 2]

            # ---- hoisted input projection: one big (T*Bp, Fin) x (Fin, 4Hp)
            #      MXU matmul, bias folded in (nothing broadcast in the loop).
            if l == 0:
                x_in = x_ref[...].reshape(T * Bp, Fp)
            else:
                x_in = seq_ref[...].reshape(T * Bp, Hp)
            xp = (jnp.dot(x_in, wih_ref[...],
                          preferred_element_type=jnp.float32)
                  + b_ref[...])
            xproj_ref[...] = xp.reshape(T, Bp, H4)

            whh = whh_ref[...]                 # hoist recurrent weight load
            is_last = (l == num_layers - 1)

            def step(t, carry, _whh=whh, _is_last=is_last):
                h, c = carry
                z = xproj_ref[t] + jnp.dot(h, _whh,
                                           preferred_element_type=jnp.float32)
                # gate slices are 128-lane aligned (Hp is a multiple of 128)
                i_g = jax.nn.sigmoid(z[:, 0 * Hp:1 * Hp])
                f_g = jax.nn.sigmoid(z[:, 1 * Hp:2 * Hp])
                g_g = jnp.tanh(z[:, 2 * Hp:3 * Hp])
                o_g = jax.nn.sigmoid(z[:, 3 * Hp:4 * Hp])
                c = f_g * c + i_g * g_g
                h = o_g * jnp.tanh(c)
                if not _is_last:
                    seq_ref[t] = h             # next layer's input sequence
                return (h, c)

            h0 = jnp.zeros((Bp, Hp), jnp.float32)
            c0 = jnp.zeros((Bp, Hp), jnp.float32)
            h_last, _ = lax.fori_loop(0, T, step, (h0, c0), unroll=True)
            # TODO(synk): inter-layer Dropout is identity in eval mode;
            # stochastic training-mode dropout intentionally not modeled.

        # ---- fused FC epilogue on the final hidden state only (B, O) output
        out_ref[...] = (jnp.dot(h_last, fc_w_ref[...],
                                preferred_element_type=jnp.float32)
                        + fc_b_ref[...])

    return kernel


# ------------------------------ JAX wrappers ---------------------------------

def prepare_params(params, input_size, hidden_size, output_size):
    """One-time weight prep: pre-transpose, pre-sum biases, zero-pad to
    TPU-friendly shapes.  Per-gate padding keeps the padded hidden units at
    exactly zero through the recurrence, so results are unchanged."""
    H = hidden_size
    Fp = _round_up(input_size, LANE)
    Hp = _round_up(hidden_size, LANE)
    Op = _round_up(output_size, LANE)

    def pad_gate_weight(w, in_dim, in_dim_p):
        # w: (4H, in_dim), gate order [i; f; g; o] -> (4Hp, in_dim_p)
        w4 = w.reshape(4, H, in_dim)
        w4 = jnp.pad(w4, ((0, 0), (0, Hp - H), (0, in_dim_p - in_dim)))
        return w4.reshape(4 * Hp, in_dim_p)

    layers = []
    for li, layer in enumerate(params["lstm"]):
        in_f = input_size if li == 0 else hidden_size
        in_fp = Fp if li == 0 else Hp
        wih_p = pad_gate_weight(layer["w_ih"], in_f, in_fp)
        whh_p = pad_gate_weight(layer["w_hh"], hidden_size, Hp)
        b = (layer["b_ih"] + layer["b_hh"]).reshape(4, H)
        b_p = jnp.pad(b, ((0, 0), (0, Hp - H))).reshape(1, 4 * Hp)
        layers.append((jnp.transpose(wih_p),       # (Fin_p, 4Hp)
                       jnp.transpose(whh_p),       # (Hp, 4Hp)
                       b_p))                       # (1, 4Hp)

    fc_w_p = jnp.pad(params["fc_w"],
                     ((0, Op - output_size), (0, Hp - hidden_size)))
    fc_b_p = jnp.pad(params["fc_b"], ((0, Op - output_size),)).reshape(1, Op)
    return {"layers": layers,
            "fc_w": jnp.transpose(fc_w_p),         # (Hp, Op)
            "fc_b": fc_b_p}


def lstm_model_forward(x, prepared, *, num_layers, output_size):
    """Forward pass of LSTMModel (eval mode).  x: (B, T, input_size)."""
    B, T, F = x.shape
    Fp = prepared["layers"][0][0].shape[0]
    Hp = prepared["layers"][0][1].shape[0]
    Op = prepared["fc_w"].shape[1]
    Bp = _round_up(B, SUBLANE)

    # one transpose+pad to time-major (T, Bp, Fp) at the JAX level
    x_tm = jnp.transpose(x, (1, 0, 2))
    x_tm = jnp.pad(x_tm, ((0, 0), (0, Bp - B), (0, Fp - F)))

    args = [x_tm]
    for (wih, whh, b) in prepared["layers"]:
        args += [wih, whh, b]
    args += [prepared["fc_w"], prepared["fc_b"]]

    vmem = pl.BlockSpec(memory_space=pltpu.MemorySpace.VMEM)
    kernel = make_fused_lstm_kernel(num_layers, T, Bp, Fp, Hp, Op)
    out = pl.pallas_call(
        kernel,
        out_shape=jax.ShapeDtypeStruct((Bp, Op), jnp.float32),
        in_specs=[vmem] * len(args),
        out_specs=vmem,
        scratch_shapes=[
            pltpu.VMEM((T, Bp, Hp), jnp.float32),       # inter-layer sequence
            pltpu.VMEM((T, Bp, 4 * Hp), jnp.float32),   # hoisted input proj
        ],
        compiler_params=pltpu.CompilerParams(
            vmem_limit_bytes=64 * 1024 * 1024),
    )(*args)
    return out[:B, :output_size]


# --------------------------- deterministic params ----------------------------

def init_params(key, input_size, hidden_size, num_layers, output_size):
    """Mimics PyTorch default init: U(-1/sqrt(H), 1/sqrt(H))."""
    params = {"lstm": []}
    k = 1.0 / np.sqrt(hidden_size)
    for layer in range(num_layers):
        in_f = input_size if layer == 0 else hidden_size
        key, k1, k2, k3, k4 = jax.random.split(key, 5)
        params["lstm"].append({
            "w_ih": jax.random.uniform(k1, (4 * hidden_size, in_f),
                                       jnp.float32, -k, k),
            "w_hh": jax.random.uniform(k2, (4 * hidden_size, hidden_size),
                                       jnp.float32, -k, k),
            "b_ih": jax.random.uniform(k3, (4 * hidden_size,),
                                       jnp.float32, -k, k),
            "b_hh": jax.random.uniform(k4, (4 * hidden_size,),
                                       jnp.float32, -k, k),
        })
    key, k5, k6 = jax.random.split(key, 3)
    params["fc_w"] = jax.random.uniform(k5, (output_size, hidden_size),
                                        jnp.float32, -k, k)
    params["fc_b"] = jax.random.uniform(k6, (output_size,),
                                        jnp.float32, -k, k)
    return params


# --------------------------- pure-JAX reference -------------------------------

def reference_forward(x, params):
    h_seq = jnp.transpose(x, (1, 0, 2))
    for layer in params["lstm"]:
        H = layer["w_hh"].shape[1]
        T, B, _ = h_seq.shape
        h = jnp.zeros((B, H), jnp.float32)
        c = jnp.zeros((B, H), jnp.float32)
        outs = []
        for t in range(T):
            z = (h_seq[t] @ layer["w_ih"].T + h @ layer["w_hh"].T
                 + layer["b_ih"] + layer["b_hh"])
            i = jax.nn.sigmoid(z[:, :H])
            f = jax.nn.sigmoid(z[:, H:2 * H])
            g = jnp.tanh(z[:, 2 * H:3 * H])
            o = jax.nn.sigmoid(z[:, 3 * H:])
            c = f * c + i * g
            h = o * jnp.tanh(c)
            outs.append(h)
        h_seq = jnp.stack(outs, axis=0)
    return h_seq[-1] @ params["fc_w"].T + params["fc_b"]


# ------------------------------------ main ------------------------------------

if __name__ == "__main__":
    B, T = 2, 8               # batch, sequence length (batch_first input)
    input_size = 16
    hidden_size = 32
    num_layers = 2
    output_size = 4

    key = jax.random.PRNGKey(0)
    key, kx = jax.random.split(key)
    x = jax.random.normal(kx, (B, T, input_size), jnp.float32)

    params = init_params(key, input_size, hidden_size, num_layers, output_size)
    prepared = prepare_params(params, input_size, hidden_size, output_size)

    fwd = jax.jit(functools.partial(lstm_model_forward,
                                    num_layers=num_layers,
                                    output_size=output_size))
    out = fwd(x, prepared)
    out = jax.block_until_ready(out)

    ref = reference_forward(x, params)
    assert out.shape == (B, output_size)
    np.testing.assert_allclose(np.asarray(out), np.asarray(ref),
                               rtol=1e-4, atol=1e-5)
    print("KERNEL_OK")
</pallas_src>

<mosaic_0001>
module attributes {stable_mosaic.version = 11 : i64} {
  func.func @kernel(%arg0: memref<8x8x128xf32, #tpu.memory_space<vmem>>, %arg1: memref<128x512xf32, #tpu.memory_space<vmem>>, %arg2: memref<128x512xf32, #tpu.memory_space<vmem>>, %arg3: memref<1x512xf32, #tpu.memory_space<vmem>>, %arg4: memref<128x512xf32, #tpu.memory_space<vmem>>, %arg5: memref<128x512xf32, #tpu.memory_space<vmem>>, %arg6: memref<1x512xf32, #tpu.memory_space<vmem>>, %arg7: memref<128x128xf32, #tpu.memory_space<vmem>>, %arg8: memref<1x128xf32, #tpu.memory_space<vmem>>, %arg9: memref<8x128xf32, #tpu.memory_space<vmem>>, %arg10: memref<8x8x128xf32, #tpu.memory_space<vmem>>, %arg11: memref<8x8x512xf32, #tpu.memory_space<vmem>>) attributes {dimension_semantics = [], scalar_prefetch = 0 : i64, scratch_operands = 2 : i64, tpu.core_type = #tpu.core_type<tc>} {
    %c0 = arith.constant 0 : index
    %c0_0 = arith.constant 0 : index
    %c0_1 = arith.constant 0 : index
    %0 = vector.load %arg0[%c0, %c0_0, %c0_1] : memref<8x8x128xf32, #tpu.memory_space<vmem>>, vector<8x8x128xf32>
    %1 = vector.shape_cast %0 : vector<8x8x128xf32> to vector<64x128xf32>
    %c0_2 = arith.constant 0 : index
    %c0_3 = arith.constant 0 : index
    %2 = vector.load %arg1[%c0_2, %c0_3] : memref<128x512xf32, #tpu.memory_space<vmem>>, vector<128x512xf32>
    %cst = arith.constant dense<0.000000e+00> : vector<64x512xf32>
    %3 = tpu.matmul %1, %2, %cst {dimension_numbers = #tpu.dot_dimension_numbers<[1], [0], [0], [1], [0, 0, 1, 1], [], []>} : vector<64x128xf32>, vector<128x512xf32>, vector<64x512xf32> -> vector<64x512xf32>
    %c0_4 = arith.constant 0 : index
    %c0_5 = arith.constant 0 : index
    %4 = vector.load %arg3[%c0_4, %c0_5] : memref<1x512xf32, #tpu.memory_space<vmem>>, vector<1x512xf32>
    %5 = vector.broadcast %4 : vector<1x512xf32> to vector<64x512xf32>
    %6 = arith.addf %3, %5 : vector<64x512xf32>
    %7 = vector.shape_cast %6 : vector<64x512xf32> to vector<8x8x512xf32>
    %c0_6 = arith.constant 0 : index
    %c0_7 = arith.constant 0 : index
    %c0_8 = arith.constant 0 : index
    %8 = vector.load %arg11[%c0_6, %c0_7, %c0_8] : memref<8x8x512xf32, #tpu.memory_space<vmem>>, vector<8x8x512xf32>
    tpu.vector_store %arg11[%c0_6, %c0_7, %c0_8], %7 {strides = array<i32>} : memref<8x8x512xf32, #tpu.memory_space<vmem>>, vector<8x8x512xf32>,
    %c0_9 = arith.constant 0 : index
    %c0_10 = arith.constant 0 : index
    %9 = vector.load %arg2[%c0_9, %c0_10] : memref<128x512xf32, #tpu.memory_space<vmem>>, vector<128x512xf32>
    %cst_11 = arith.constant 0.000000e+00 : f32
    %10 = vector.broadcast %cst_11 : f32 to vector<8x128xf32>
    %cst_12 = arith.constant 0.000000e+00 : f32
    %11 = vector.broadcast %cst_12 : f32 to vector<8x128xf32>
    %c0_i32 = arith.constant 0 : i32
    %12 = arith.index_cast %c0_i32 : i32 to index
    %c0_13 = arith.constant 0 : index
    %c0_14 = arith.constant 0 : index
    %13 = vector.load %arg11[%12, %c0_13, %c0_14] : memref<8x8x512xf32, #tpu.memory_space<vmem>>, vector<1x8x512xf32>
    %14 = vector.shape_cast %13 : vector<1x8x512xf32> to vector<8x512xf32>
    %cst_15 = arith.constant dense<0.000000e+00> : vector<8x512xf32>
    %15 = tpu.matmul %10, %9, %cst_15 {dimension_numbers = #tpu.dot_dimension_numbers<[1], [0], [0], [1], [0, 0, 1, 1], [], []>} : vector<8x128xf32>, vector<128x512xf32>, vector<8x512xf32> -> vector<8x512xf32>
    %16 = arith.addf %14, %15 : vector<8x512xf32>
    %17 = vector.extract_strided_slice %16 {offsets = [0, 0], sizes = [8, 128], strides = [1, 1]} : vector<8x512xf32> to vector<8x128xf32>
    %18 = arith.negf %17 : vector<8x128xf32>
    %19 = math.exp %18 : vector<8x128xf32>
    %cst_16 = arith.constant 1.000000e+00 : f32
    %20 = vector.broadcast %cst_16 : f32 to vector<8x128xf32>
    %21 = arith.addf %20, %19 : vector<8x128xf32>
    %22 = arith.divf %20, %21 : vector<8x128xf32>
    %23 = vector.extract_strided_slice %16 {offsets = [0, 128], sizes = [8, 128], strides = [1, 1]} : vector<8x512xf32> to vector<8x128xf32>
    %24 = arith.negf %23 : vector<8x128xf32>
    %25 = math.exp %24 : vector<8x128xf32>
    %cst_17 = arith.constant 1.000000e+00 : f32
    %26 = vector.broadcast %cst_17 : f32 to vector<8x128xf32>
    %27 = arith.addf %26, %25 : vector<8x128xf32>
    %28 = arith.divf %26, %27 : vector<8x128xf32>
    %29 = vector.extract_strided_slice %16 {offsets = [0, 256], sizes = [8, 128], strides = [1, 1]} : vector<8x512xf32> to vector<8x128xf32>
    %30 = math.tanh %29 : vector<8x128xf32>
    %31 = vector.extract_strided_slice %16 {offsets = [0, 384], sizes = [8, 128], strides = [1, 1]} : vector<8x512xf32> to vector<8x128xf32>
    %32 = arith.negf %31 : vector<8x128xf32>
    %33 = math.exp %32 : vector<8x128xf32>
    %cst_18 = arith.constant 1.000000e+00 : f32
    %34 = vector.broadcast %cst_18 : f32 to vector<8x128xf32>
    %35 = arith.addf %34, %33 : vector<8x128xf32>
    %36 = arith.divf %34, %35 : vector<8x128xf32>
    %37 = arith.mulf %28, %11 : vector<8x128xf32>
    %38 = arith.mulf %22, %30 : vector<8x128xf32>
    %39 = arith.addf %37, %38 : vector<8x128xf32>
    %40 = math.tanh %39 : vector<8x128xf32>
    %41 = arith.mulf %36, %40 : vector<8x128xf32>
    %42 = arith.index_cast %c0_i32 : i32 to index
    %c0_19 = arith.constant 0 : index
    %c0_20 = arith.constant 0 : index
    %43 = vector.load %arg10[%42, %c0_19, %c0_20] : memref<8x8x128xf32, #tpu.memory_space<vmem>>, vector<1x8x128xf32>
    %44 = vector.shape_cast %43 : vector<1x8x128xf32> to vector<8x128xf32>
    %45 = vector.shape_cast %41 : vector<8x128xf32> to vector<1x8x128xf32>
    tpu.vector_store %arg10[%42, %c0_19, %c0_20], %45 {strides = array<i32>} : memref<8x8x128xf32, #tpu.memory_space<vmem>>, vector<1x8x128xf32>,
    %c1_i32 = arith.constant 1 : i32
    %46 = arith.index_cast %c1_i32 : i32 to index
    %c0_21 = arith.constant 0 : index
    %c0_22 = arith.constant 0 : index
    %47 = vector.load %arg11[%46, %c0_21, %c0_22] : memref<8x8x512xf32, #tpu.memory_space<vmem>>, vector<1x8x512xf32>
    %48 = vector.shape_cast %47 : vector<1x8x512xf32> to vector<8x512xf32>
    %cst_23 = arith.constant dense<0.000000e+00> : vector<8x512xf32>
    %49 = tpu.matmul %41, %9, %cst_23 {dimension_numbers = #tpu.dot_dimension_numbers<[1], [0], [0], [1], [0, 0, 1, 1], [], []>} : vector<8x128xf32>, vector<128x512xf32>, vector<8x512xf32> -> vector<8x512xf32>
    %50 = arith.addf %48, %49 : vector<8x512xf32>
    %51 = vector.extract_strided_slice %50 {offsets = [0, 0], sizes = [8, 128], strides = [1, 1]} : vector<8x512xf32> to vector<8x128xf32>
    %52 = arith.negf %51 : vector<8x128xf32>
    %53 = math.exp %52 : vector<8x128xf32>
    %cst_24 = arith.constant 1.000000e+00 : f32
    %54 = vector.broadcast %cst_24 : f32 to vector<8x128xf32>
    %55 = arith.addf %54, %53 : vector<8x128xf32>
    %56 = arith.divf %54, %55 : vector<8x128xf32>
    %57 = vector.extract_strided_slice %50 {offsets = [0, 128], sizes = [8, 128], strides = [1, 1]} : vector<8x512xf32> to vector<8x128xf32>
    %58 = arith.negf %57 : vector<8x128xf32>
    %59 = math.exp %58 : vector<8x128xf32>
    %cst_25 = arith.constant 1.000000e+00 : f32
    %60 = vector.broadcast %cst_25 : f32 to vector<8x128xf32>
    %61 = arith.addf %60, %59 : vector<8x128xf32>
    %62 = arith.divf %60, %61 : vector<8x128xf32>
    %63 = vector.extract_strided_slice %50 {offsets = [0, 256], sizes = [8, 128], strides = [1, 1]} : vector<8x512xf32> to vector<8x128xf32>
    %64 = math.tanh %63 : vector<8x128xf32>
    %65 = vector.extract_strided_slice %50 {offsets = [0, 384], sizes = [8, 128], strides = [1, 1]} : vector<8x512xf32> to vector<8x128xf32>
    %66 = arith.negf %65 : vector<8x128xf32>
    %67 = math.exp %66 : vector<8x128xf32>
    %cst_26 = arith.constant 1.000000e+00 : f32
    %68 = vector.broadcast %cst_26 : f32 to vector<8x128xf32>
    %69 = arith.addf %68, %67 : vector<8x128xf32>
    %70 = arith.divf %68, %69 : vector<8x128xf32>
    %71 = arith.mulf %62, %39 : vector<8x128xf32>
    %72 = arith.mulf %56, %64 : vector<8x128xf32>
    %73 = arith.addf %71, %72 : vector<8x128xf32>
    %74 = math.tanh %73 : vector<8x128xf32>
    %75 = arith.mulf %70, %74 : vector<8x128xf32>
    %76 = arith.index_cast %c1_i32 : i32 to index
    %c0_27 = arith.constant 0 : index
    %c0_28 = arith.constant 0 : index
    %77 = vector.load %arg10[%76, %c0_27, %c0_28] : memref<8x8x128xf32, #tpu.memory_space<vmem>>, vector<1x8x128xf32>
    %78 = vector.shape_cast %77 : vector<1x8x128xf32> to vector<8x128xf32>
    %79 = vector.shape_cast %75 : vector<8x128xf32> to vector<1x8x128xf32>
    tpu.vector_store %arg10[%76, %c0_27, %c0_28], %79 {strides = array<i32>} : memref<8x8x128xf32, #tpu.memory_space<vmem>>, vector<1x8x128xf32>,
    %c2_i32 = arith.constant 2 : i32
    %80 = arith.index_cast %c2_i32 : i32 to index
    %c0_29 = arith.constant 0 : index
    %c0_30 = arith.constant 0 : index
    %81 = vector.load %arg11[%80, %c0_29, %c0_30] : memref<8x8x512xf32, #tpu.memory_space<vmem>>, vector<1x8x512xf32>
    %82 = vector.shape_cast %81 : vector<1x8x512xf32> to vector<8x512xf32>
    %cst_31 = arith.constant dense<0.000000e+00> : vector<8x512xf32>
    %83 = tpu.matmul %75, %9, %cst_31 {dimension_numbers = #tpu.dot_dimension_numbers<[1], [0], [0], [1], [0, 0, 1, 1], [], []>} : vector<8x128xf32>, vector<128x512xf32>, vector<8x512xf32> -> vector<8x512xf32>
    %84 = arith.addf %82, %83 : vector<8x512xf32>
    %85 = vector.extract_strided_slice %84 {offsets = [0, 0], sizes = [8, 128], strides = [1, 1]} : vector<8x512xf32> to vector<8x128xf32>
    %86 = arith.negf %85 : vector<8x128xf32>
    %87 = math.exp %86 : vector<8x128xf32>
    %cst_32 = arith.constant 1.000000e+00 : f32
    %88 = vector.broadcast %cst_32 : f32 to vector<8x128xf32>
    %89 = arith.addf %88, %87 : vector<8x128xf32>
    %90 = arith.divf %88, %89 : vector<8x128xf32>
    %91 = vector.extract_strided_slice %84 {offsets = [0, 128], sizes = [8, 128], strides = [1, 1]} : vector<8x512xf32> to vector<8x128xf32>
    %92 = arith.negf %91 : vector<8x128xf32>
    %93 = math.exp %92 : vector<8x128xf32>
    %cst_33 = arith.constant 1.000000e+00 : f32
    %94 = vector.broadcast %cst_33 : f32 to vector<8x128xf32>
    %95 = arith.addf %94, %93 : vector<8x128xf32>
    %96 = arith.divf %94, %95 : vector<8x128xf32>
    %97 = vector.extract_strided_slice %84 {offsets = [0, 256], sizes = [8, 128], strides = [1, 1]} : vector<8x512xf32> to vector<8x128xf32>
    %98 = math.tanh %97 : vector<8x128xf32>
    %99 = vector.extract_strided_slice %84 {offsets = [0, 384], sizes = [8, 128], strides = [1, 1]} : vector<8x512xf32> to vector<8x128xf32>
    %100 = arith.negf %99 : vector<8x128xf32>
    %101 = math.exp %100 : vector<8x128xf32>
    %cst_34 = arith.constant 1.000000e+00 : f32
    %102 = vector.broadcast %cst_34 : f32 to vector<8x128xf32>
    %103 = arith.addf %102, %101 : vector<8x128xf32>
    %104 = arith.divf %102, %103 : vector<8x128xf32>
    %105 = arith.mulf %96, %73 : vector<8x128xf32>
    %106 = arith.mulf %90, %98 : vector<8x128xf32>
    %107 = arith.addf %105, %106 : vector<8x128xf32>
    %108 = math.tanh %107 : vector<8x128xf32>
    %109 = arith.mulf %104, %108 : vector<8x128xf32>
    %110 = arith.index_cast %c2_i32 : i32 to index
    %c0_35 = arith.constant 0 : index
    %c0_36 = arith.constant 0 : index
    %111 = vector.load %arg10[%110, %c0_35, %c0_36] : memref<8x8x128xf32, #tpu.memory_space<vmem>>, vector<1x8x128xf32>
    %112 = vector.shape_cast %111 : vector<1x8x128xf32> to vector<8x128xf32>
    %113 = vector.shape_cast %109 : vector<8x128xf32> to vector<1x8x128xf32>
    tpu.vector_store %arg10[%110, %c0_35, %c0_36], %113 {strides = array<i32>} : memref<8x8x128xf32, #tpu.memory_space<vmem>>, vector<1x8x128xf32>,
    %c3_i32 = arith.constant 3 : i32
    %114 = arith.index_cast %c3_i32 : i32 to index
    %c0_37 = arith.constant 0 : index
    %c0_38 = arith.constant 0 : index
    %115 = vector.load %arg11[%114, %c0_37, %c0_38] : memref<8x8x512xf32, #tpu.memory_space<vmem>>, vector<1x8x512xf32>
    %116 = vector.shape_cast %115 : vector<1x8x512xf32> to vector<8x512xf32>
    %cst_39 = arith.constant dense<0.000000e+00> : vector<8x512xf32>
    %117 = tpu.matmul %109, %9, %cst_39 {dimension_numbers = #tpu.dot_dimension_numbers<[1], [0], [0], [1], [0, 0, 1, 1], [], []>} : vector<8x128xf32>, vector<128x512xf32>, vector<8x512xf32> -> vector<8x512xf32>
    %118 = arith.addf %116, %117 : vector<8x512xf32>
    %119 = vector.extract_strided_slice %118 {offsets = [0, 0], sizes = [8, 128], strides = [1, 1]} : vector<8x512xf32> to vector<8x128xf32>
    %120 = arith.negf %119 : vector<8x128xf32>
    %121 = math.exp %120 : vector<8x128xf32>
    %cst_40 = arith.constant 1.000000e+00 : f32
    %122 = vector.broadcast %cst_40 : f32 to vector<8x128xf32>
    %123 = arith.addf %122, %121 : vector<8x128xf32>
    %124 = arith.divf %122, %123 : vector<8x128xf32>
    %125 = vector.extract_strided_slice %118 {offsets = [0, 128], sizes = [8, 128], strides = [1, 1]} : vector<8x512xf32> to vector<8x128xf32>
    %126 = arith.negf %125 : vector<8x128xf32>
    %127 = math.exp %126 : vector<8x128xf32>
    %cst_41 = arith.constant 1.000000e+00 : f32
    %128 = vector.broadcast %cst_41 : f32 to vector<8x128xf32>
    %129 = arith.addf %128, %127 : vector<8x128xf32>
    %130 = arith.divf %128, %129 : vector<8x128xf32>
    %131 = vector.extract_strided_slice %118 {offsets = [0, 256], sizes = [8, 128], strides = [1, 1]} : vector<8x512xf32> to vector<8x128xf32>
    %132 = math.tanh %131 : vector<8x128xf32>
    %133 = vector.extract_strided_slice %118 {offsets = [0, 384], sizes = [8, 128], strides = [1, 1]} : vector<8x512xf32> to vector<8x128xf32>
    %134 = arith.negf %133 : vector<8x128xf32>
    %135 = math.exp %134 : vector<8x128xf32>
    %cst_42 = arith.constant 1.000000e+00 : f32
    %136 = vector.broadcast %cst_42 : f32 to vector<8x128xf32>
    %137 = arith.addf %136, %135 : vector<8x128xf32>
    %138 = arith.divf %136, %137 : vector<8x128xf32>
    %139 = arith.mulf %130, %107 : vector<8x128xf32>
    %140 = arith.mulf %124, %132 : vector<8x128xf32>
    %141 = arith.addf %139, %140 : vector<8x128xf32>
    %142 = math.tanh %141 : vector<8x128xf32>
    %143 = arith.mulf %138, %142 : vector<8x128xf32>
    %144 = arith.index_cast %c3_i32 : i32 to index
    %c0_43 = arith.constant 0 : index
    %c0_44 = arith.constant 0 : index
    %145 = vector.load %arg10[%144, %c0_43, %c0_44] : memref<8x8x128xf32, #tpu.memory_space<vmem>>, vector<1x8x128xf32>
    %146 = vector.shape_cast %145 : vector<1x8x128xf32> to vector<8x128xf32>
    %147 = vector.shape_cast %143 : vector<8x128xf32> to vector<1x8x128xf32>
    tpu.vector_store %arg10[%144, %c0_43, %c0_44], %147 {strides = array<i32>} : memref<8x8x128xf32, #tpu.memory_space<vmem>>, vector<1x8x128xf32>,
    %c4_i32 = arith.constant 4 : i32
    %148 = arith.index_cast %c4_i32 : i32 to index
    %c0_45 = arith.constant 0 : index
    %c0_46 = arith.constant 0 : index
    %149 = vector.load %arg11[%148, %c0_45, %c0_46] : memref<8x8x512xf32, #tpu.memory_space<vmem>>, vector<1x8x512xf32>
    %150 = vector.shape_cast %149 : vector<1x8x512xf32> to vector<8x512xf32>
    %cst_47 = arith.constant dense<0.000000e+00> : vector<8x512xf32>
    %151 = tpu.matmul %143, %9, %cst_47 {dimension_numbers = #tpu.dot_dimension_numbers<[1], [0], [0], [1], [0, 0, 1, 1], [], []>} : vector<8x128xf32>, vector<128x512xf32>, vector<8x512xf32> -> vector<8x512xf32>
    %152 = arith.addf %150, %151 : vector<8x512xf32>
    %153 = vector.extract_strided_slice %152 {offsets = [0, 0], sizes = [8, 128], strides = [1, 1]} : vector<8x512xf32> to vector<8x128xf32>
    %154 = arith.negf %153 : vector<8x128xf32>
    %155 = math.exp %154 : vector<8x128xf32>
    %cst_48 = arith.constant 1.000000e+00 : f32
    %156 = vector.broadcast %cst_48 : f32 to vector<8x128xf32>
    %157 = arith.addf %156, %155 : vector<8x128xf32>
    %158 = arith.divf %156, %157 : vector<8x128xf32>
    %159 = vector.extract_strided_slice %152 {offsets = [0, 128], sizes = [8, 128], strides = [1, 1]} : vector<8x512xf32> to vector<8x128xf32>
    %160 = arith.negf %159 : vector<8x128xf32>
    %161 = math.exp %160 : vector<8x128xf32>
    %cst_49 = arith.constant 1.000000e+00 : f32
    %162 = vector.broadcast %cst_49 : f32 to vector<8x128xf32>
    %163 = arith.addf %162, %161 : vector<8x128xf32>
    %164 = arith.divf %162, %163 : vector<8x128xf32>
    %165 = vector.extract_strided_slice %152 {offsets = [0, 256], sizes = [8, 128], strides = [1, 1]} : vector<8x512xf32> to vector<8x128xf32>
    %166 = math.tanh %165 : vector<8x128xf32>
    %167 = vector.extract_strided_slice %152 {offsets = [0, 384], sizes = [8, 128], strides = [1, 1]} : vector<8x512xf32> to vector<8x128xf32>
    %168 = arith.negf %167 : vector<8x128xf32>
    %169 = math.exp %168 : vector<8x128xf32>
    %cst_50 = arith.constant 1.000000e+00 : f32
    %170 = vector.broadcast %cst_50 : f32 to vector<8x128xf32>
    %171 = arith.addf %170, %169 : vector<8x128xf32>
    %172 = arith.divf %170, %171 : vector<8x128xf32>
    %173 = arith.mulf %164, %141 : vector<8x128xf32>
    %174 = arith.mulf %158, %166 : vector<8x128xf32>
    %175 = arith.addf %173, %174 : vector<8x128xf32>
    %176 = math.tanh %175 : vector<8x128xf32>
    %177 = arith.mulf %172, %176 : vector<8x128xf32>
    %178 = arith.index_cast %c4_i32 : i32 to index
    %c0_51 = arith.constant 0 : index
    %c0_52 = arith.constant 0 : index
    %179 = vector.load %arg10[%178, %c0_51, %c0_52] : memref<8x8x128xf32, #tpu.memory_space<vmem>>, vector<1x8x128xf32>
    %180 = vector.shape_cast %179 : vector<1x8x128xf32> to vector<8x128xf32>
    %181 = vector.shape_cast %177 : vector<8x128xf32> to vector<1x8x128xf32>
    tpu.vector_store %arg10[%178, %c0_51, %c0_52], %181 {strides = array<i32>} : memref<8x8x128xf32, #tpu.memory_space<vmem>>, vector<1x8x128xf32>,
    %c5_i32 = arith.constant 5 : i32
    %182 = arith.index_cast %c5_i32 : i32 to index
    %c0_53 = arith.constant 0 : index
    %c0_54 = arith.constant 0 : index
    %183 = vector.load %arg11[%182, %c0_53, %c0_54] : memref<8x8x512xf32, #tpu.memory_space<vmem>>, vector<1x8x512xf32>
    %184 = vector.shape_cast %183 : vector<1x8x512xf32> to vector<8x512xf32>
    %cst_55 = arith.constant dense<0.000000e+00> : vector<8x512xf32>
    %185 = tpu.matmul %177, %9, %cst_55 {dimension_numbers = #tpu.dot_dimension_numbers<[1], [0], [0], [1], [0, 0, 1, 1], [], []>} : vector<8x128xf32>, vector<128x512xf32>, vector<8x512xf32> -> vector<8x512xf32>
    %186 = arith.addf %184, %185 : vector<8x512xf32>
    %187 = vector.extract_strided_slice %186 {offsets = [0, 0], sizes = [8, 128], strides = [1, 1]} : vector<8x512xf32> to vector<8x128xf32>
    %188 = arith.negf %187 : vector<8x128xf32>
    %189 = math.exp %188 : vector<8x128xf32>
    %cst_56 = arith.constant 1.000000e+00 : f32
    %190 = vector.broadcast %cst_56 : f32 to vector<8x128xf32>
    %191 = arith.addf %190, %189 : vector<8x128xf32>
    %192 = arith.divf %190, %191 : vector<8x128xf32>
    %193 = vector.extract_strided_slice %186 {offsets = [0, 128], sizes = [8, 128], strides = [1, 1]} : vector<8x512xf32> to vector<8x128xf32>
    %194 = arith.negf %193 : vector<8x128xf32>
    %195 = math.exp %194 : vector<8x128xf32>
    %cst_57 = arith.constant 1.000000e+00 : f32
    %196 = vector.broadcast %cst_57 : f32 to vector<8x128xf32>
    %197 = arith.addf %196, %195 : vector<8x128xf32>
    %198 = arith.divf %196, %197 : vector<8x128xf32>
    %199 = vector.extract_strided_slice %186 {offsets = [0, 256], sizes = [8, 128], strides = [1, 1]} : vector<8x512xf32> to vector<8x128xf32>
    %200 = math.tanh %199 : vector<8x128xf32>
    %201 = vector.extract_strided_slice %186 {offsets = [0, 384], sizes = [8, 128], strides = [1, 1]} : vector<8x512xf32> to vector<8x128xf32>
    %202 = arith.negf %201 : vector<8x128xf32>
    %203 = math.exp %202 : vector<8x128xf32>
    %cst_58 = arith.constant 1.000000e+00 : f32
    %204 = vector.broadcast %cst_58 : f32 to vector<8x128xf32>
    %205 = arith.addf %204, %203 : vector<8x128xf32>
    %206 = arith.divf %204, %205 : vector<8x128xf32>
    %207 = arith.mulf %198, %175 : vector<8x128xf32>
    %208 = arith.mulf %192, %200 : vector<8x128xf32>
    %209 = arith.addf %207, %208 : vector<8x128xf32>
    %210 = math.tanh %209 : vector<8x128xf32>
    %211 = arith.mulf %206, %210 : vector<8x128xf32>
    %212 = arith.index_cast %c5_i32 : i32 to index
    %c0_59 = arith.constant 0 : index
    %c0_60 = arith.constant 0 : index
    %213 = vector.load %arg10[%212, %c0_59, %c0_60] : memref<8x8x128xf32, #tpu.memory_space<vmem>>, vector<1x8x128xf32>
    %214 = vector.shape_cast %213 : vector<1x8x128xf32> to vector<8x128xf32>
    %215 = vector.shape_cast %211 : vector<8x128xf32> to vector<1x8x128xf32>
    tpu.vector_store %arg10[%212, %c0_59, %c0_60], %215 {strides = array<i32>} : memref<8x8x128xf32, #tpu.memory_space<vmem>>, vector<1x8x128xf32>,
    %c6_i32 = arith.constant 6 : i32
    %216 = arith.index_cast %c6_i32 : i32 to index
    %c0_61 = arith.constant 0 : index
    %c0_62 = arith.constant 0 : index
    %217 = vector.load %arg11[%216, %c0_61, %c0_62] : memref<8x8x512xf32, #tpu.memory_space<vmem>>, vector<1x8x512xf32>
    %218 = vector.shape_cast %217 : vector<1x8x512xf32> to vector<8x512xf32>
    %cst_63 = arith.constant dense<0.000000e+00> : vector<8x512xf32>
    %219 = tpu.matmul %211, %9, %cst_63 {dimension_numbers = #tpu.dot_dimension_numbers<[1], [0], [0], [1], [0, 0, 1, 1], [], []>} : vector<8x128xf32>, vector<128x512xf32>, vector<8x512xf32> -> vector<8x512xf32>
    %220 = arith.addf %218, %219 : vector<8x512xf32>
    %221 = vector.extract_strided_slice %220 {offsets = [0, 0], sizes = [8, 128], strides = [1, 1]} : vector<8x512xf32> to vector<8x128xf32>
    %222 = arith.negf %221 : vector<8x128xf32>
    %223 = math.exp %222 : vector<8x128xf32>
    %cst_64 = arith.constant 1.000000e+00 : f32
    %224 = vector.broadcast %cst_64 : f32 to vector<8x128xf32>
    %225 = arith.addf %224, %223 : vector<8x128xf32>
    %226 = arith.divf %224, %225 : vector<8x128xf32>
    %227 = vector.extract_strided_slice %220 {offsets = [0, 128], sizes = [8, 128], strides = [1, 1]} : vector<8x512xf32> to vector<8x128xf32>
    %228 = arith.negf %227 : vector<8x128xf32>
    %229 = math.exp %228 : vector<8x128xf32>
    %cst_65 = arith.constant 1.000000e+00 : f32
    %230 = vector.broadcast %cst_65 : f32 to vector<8x128xf32>
    %231 = arith.addf %230, %229 : vector<8x128xf32>
    %232 = arith.divf %230, %231 : vector<8x128xf32>
    %233 = vector.extract_strided_slice %220 {offsets = [0, 256], sizes = [8, 128], strides = [1, 1]} : vector<8x512xf32> to vector<8x128xf32>
    %234 = math.tanh %233 : vector<8x128xf32>
    %235 = vector.extract_strided_slice %220 {offsets = [0, 384], sizes = [8, 128], strides = [1, 1]} : vector<8x512xf32> to vector<8x128xf32>
    %236 = arith.negf %235 : vector<8x128xf32>
    %237 = math.exp %236 : vector<8x128xf32>
    %cst_66 = arith.constant 1.000000e+00 : f32
    %238 = vector.broadcast %cst_66 : f32 to vector<8x128xf32>
    %239 = arith.addf %238, %237 : vector<8x128xf32>
    %240 = arith.divf %238, %239 : vector<8x128xf32>
    %241 = arith.mulf %232, %209 : vector<8x128xf32>
    %242 = arith.mulf %226, %234 : vector<8x128xf32>
    %243 = arith.addf %241, %242 : vector<8x128xf32>
    %244 = math.tanh %243 : vector<8x128xf32>
    %245 = arith.mulf %240, %244 : vector<8x128xf32>
    %246 = arith.index_cast %c6_i32 : i32 to index
    %c0_67 = arith.constant 0 : index
    %c0_68 = arith.constant 0 : index
    %247 = vector.load %arg10[%246, %c0_67, %c0_68] : memref<8x8x128xf32, #tpu.memory_space<vmem>>, vector<1x8x128xf32>
    %248 = vector.shape_cast %247 : vector<1x8x128xf32> to vector<8x128xf32>
    %249 = vector.shape_cast %245 : vector<8x128xf32> to vector<1x8x128xf32>
    tpu.vector_store %arg10[%246, %c0_67, %c0_68], %249 {strides = array<i32>} : memref<8x8x128xf32, #tpu.memory_space<vmem>>, vector<1x8x128xf32>,
    %c7_i32 = arith.constant 7 : i32
    %250 = arith.index_cast %c7_i32 : i32 to index
    %c0_69 = arith.constant 0 : index
    %c0_70 = arith.constant 0 : index
    %251 = vector.load %arg11[%250, %c0_69, %c0_70] : memref<8x8x512xf32, #tpu.memory_space<vmem>>, vector<1x8x512xf32>
    %252 = vector.shape_cast %251 : vector<1x8x512xf32> to vector<8x512xf32>
    %cst_71 = arith.constant dense<0.000000e+00> : vector<8x512xf32>
    %253 = tpu.matmul %245, %9, %cst_71 {dimension_numbers = #tpu.dot_dimension_numbers<[1], [0], [0], [1], [0, 0, 1, 1], [], []>} : vector<8x128xf32>, vector<128x512xf32>, vector<8x512xf32> -> vector<8x512xf32>
    %254 = arith.addf %252, %253 : vector<8x512xf32>
    %255 = vector.extract_strided_slice %254 {offsets = [0, 0], sizes = [8, 128], strides = [1, 1]} : vector<8x512xf32> to vector<8x128xf32>
    %256 = arith.negf %255 : vector<8x128xf32>
    %257 = math.exp %256 : vector<8x128xf32>
    %cst_72 = arith.constant 1.000000e+00 : f32
    %258 = vector.broadcast %cst_72 : f32 to vector<8x128xf32>
    %259 = arith.addf %258, %257 : vector<8x128xf32>
    %260 = arith.divf %258, %259 : vector<8x128xf32>
    %261 = vector.extract_strided_slice %254 {offsets = [0, 128], sizes = [8, 128], strides = [1, 1]} : vector<8x512xf32> to vector<8x128xf32>
    %262 = arith.negf %261 : vector<8x128xf32>
    %263 = math.exp %262 : vector<8x128xf32>
    %cst_73 = arith.constant 1.000000e+00 : f32
    %264 = vector.broadcast %cst_73 : f32 to vector<8x128xf32>
    %265 = arith.addf %264, %263 : vector<8x128xf32>
    %266 = arith.divf %264, %265 : vector<8x128xf32>
    %267 = vector.extract_strided_slice %254 {offsets = [0, 256], sizes = [8, 128], strides = [1, 1]} : vector<8x512xf32> to vector<8x128xf32>
    %268 = math.tanh %267 : vector<8x128xf32>
    %269 = vector.extract_strided_slice %254 {offsets = [0, 384], sizes = [8, 128], strides = [1, 1]} : vector<8x512xf32> to vector<8x128xf32>
    %270 = arith.negf %269 : vector<8x128xf32>
    %271 = math.exp %270 : vector<8x128xf32>
    %cst_74 = arith.constant 1.000000e+00 : f32
    %272 = vector.broadcast %cst_74 : f32 to vector<8x128xf32>
    %273 = arith.addf %272, %271 : vector<8x128xf32>
    %274 = arith.divf %272, %273 : vector<8x128xf32>
    %275 = arith.mulf %266, %243 : vector<8x128xf32>
    %276 = arith.mulf %260, %268 : vector<8x128xf32>
    %277 = arith.addf %275, %276 : vector<8x128xf32>
    %278 = math.tanh %277 : vector<8x128xf32>
    %279 = arith.mulf %274, %278 : vector<8x128xf32>
    %280 = arith.index_cast %c7_i32 : i32 to index
    %c0_75 = arith.constant 0 : index
    %c0_76 = arith.constant 0 : index
    %281 = vector.load %arg10[%280, %c0_75, %c0_76] : memref<8x8x128xf32, #tpu.memory_space<vmem>>, vector<1x8x128xf32>
    %282 = vector.shape_cast %281 : vector<1x8x128xf32> to vector<8x128xf32>
    %283 = vector.shape_cast %279 : vector<8x128xf32> to vector<1x8x128xf32>
    tpu.vector_store %arg10[%280, %c0_75, %c0_76], %283 {strides = array<i32>} : memref<8x8x128xf32, #tpu.memory_space<vmem>>, vector<1x8x128xf32>,
    %c8_i32 = arith.constant 8 : i32
    %c0_77 = arith.constant 0 : index
    %c0_78 = arith.constant 0 : index
    %c0_79 = arith.constant 0 : index
    %284 = vector.load %arg10[%c0_77, %c0_78, %c0_79] : memref<8x8x128xf32, #tpu.memory_space<vmem>>, vector<8x8x128xf32>
    %285 = vector.shape_cast %284 : vector<8x8x128xf32> to vector<64x128xf32>
    %c0_80 = arith.constant 0 : index
    %c0_81 = arith.constant 0 : index
    %286 = vector.load %arg4[%c0_80, %c0_81] : memref<128x512xf32, #tpu.memory_space<vmem>>, vector<128x512xf32>
    %cst_82 = arith.constant dense<0.000000e+00> : vector<64x512xf32>
    %287 = tpu.matmul %285, %286, %cst_82 {dimension_numbers = #tpu.dot_dimension_numbers<[1], [0], [0], [1], [0, 0, 1, 1], [], []>} : vector<64x128xf32>, vector<128x512xf32>, vector<64x512xf32> -> vector<64x512xf32>
    %c0_83 = arith.constant 0 : index
    %c0_84 = arith.constant 0 : index
    %288 = vector.load %arg6[%c0_83, %c0_84] : memref<1x512xf32, #tpu.memory_space<vmem>>, vector<1x512xf32>
    %289 = vector.broadcast %288 : vector<1x512xf32> to vector<64x512xf32>
    %290 = arith.addf %287, %289 : vector<64x512xf32>
    %291 = vector.shape_cast %290 : vector<64x512xf32> to vector<8x8x512xf32>
    %c0_85 = arith.constant 0 : index
    %c0_86 = arith.constant 0 : index
    %c0_87 = arith.constant 0 : index
    %292 = vector.load %arg11[%c0_85, %c0_86, %c0_87] : memref<8x8x512xf32, #tpu.memory_space<vmem>>, vector<8x8x512xf32>
    tpu.vector_store %arg11[%c0_85, %c0_86, %c0_87], %291 {strides = array<i32>} : memref<8x8x512xf32, #tpu.memory_space<vmem>>, vector<8x8x512xf32>,
    %c0_88 = arith.constant 0 : index
    %c0_89 = arith.constant 0 : index
    %293 = vector.load %arg5[%c0_88, %c0_89] : memref<128x512xf32, #tpu.memory_space<vmem>>, vector<128x512xf32>
    %cst_90 = arith.constant 0.000000e+00 : f32
    %294 = vector.broadcast %cst_90 : f32 to vector<8x128xf32>
    %cst_91 = arith.constant 0.000000e+00 : f32
    %295 = vector.broadcast %cst_91 : f32 to vector<8x128xf32>
    %c0_i32_92 = arith.constant 0 : i32
    %296 = arith.index_cast %c0_i32_92 : i32 to index
    %c0_93 = arith.constant 0 : index
    %c0_94 = arith.constant 0 : index
    %297 = vector.load %arg11[%296, %c0_93, %c0_94] : memref<8x8x512xf32, #tpu.memory_space<vmem>>, vector<1x8x512xf32>
    %298 = vector.shape_cast %297 : vector<1x8x512xf32> to vector<8x512xf32>
    %cst_95 = arith.constant dense<0.000000e+00> : vector<8x512xf32>
    %299 = tpu.matmul %294, %293, %cst_95 {dimension_numbers = #tpu.dot_dimension_numbers<[1], [0], [0], [1], [0, 0, 1, 1], [], []>} : vector<8x128xf32>, vector<128x512xf32>, vector<8x512xf32> -> vector<8x512xf32>
    %300 = arith.addf %298, %299 : vector<8x512xf32>
    %301 = vector.extract_strided_slice %300 {offsets = [0, 0], sizes = [8, 128], strides = [1, 1]} : vector<8x512xf32> to vector<8x128xf32>
    %302 = arith.negf %301 : vector<8x128xf32>
    %303 = math.exp %302 : vector<8x128xf32>
    %cst_96 = arith.constant 1.000000e+00 : f32
    %304 = vector.broadcast %cst_96 : f32 to vector<8x128xf32>
    %305 = arith.addf %304, %303 : vector<8x128xf32>
    %306 = arith.divf %304, %305 : vector<8x128xf32>
    %307 = vector.extract_strided_slice %300 {offsets = [0, 128], sizes = [8, 128], strides = [1, 1]} : vector<8x512xf32> to vector<8x128xf32>
    %308 = arith.negf %307 : vector<8x128xf32>
    %309 = math.exp %308 : vector<8x128xf32>
    %cst_97 = arith.constant 1.000000e+00 : f32
    %310 = vector.broadcast %cst_97 : f32 to vector<8x128xf32>
    %311 = arith.addf %310, %309 : vector<8x128xf32>
    %312 = arith.divf %310, %311 : vector<8x128xf32>
    %313 = vector.extract_strided_slice %300 {offsets = [0, 256], sizes = [8, 128], strides = [1, 1]} : vector<8x512xf32> to vector<8x128xf32>
    %314 = math.tanh %313 : vector<8x128xf32>
    %315 = vector.extract_strided_slice %300 {offsets = [0, 384], sizes = [8, 128], strides = [1, 1]} : vector<8x512xf32> to vector<8x128xf32>
    %316 = arith.negf %315 : vector<8x128xf32>
    %317 = math.exp %316 : vector<8x128xf32>
    %cst_98 = arith.constant 1.000000e+00 : f32
    %318 = vector.broadcast %cst_98 : f32 to vector<8x128xf32>
    %319 = arith.addf %318, %317 : vector<8x128xf32>
    %320 = arith.divf %318, %319 : vector<8x128xf32>
    %321 = arith.mulf %312, %295 : vector<8x128xf32>
    %322 = arith.mulf %306, %314 : vector<8x128xf32>
    %323 = arith.addf %321, %322 : vector<8x128xf32>
    %324 = math.tanh %323 : vector<8x128xf32>
    %325 = arith.mulf %320, %324 : vector<8x128xf32>
    %c1_i32_99 = arith.constant 1 : i32
    %326 = arith.index_cast %c1_i32_99 : i32 to index
    %c0_100 = arith.constant 0 : index
    %c0_101 = arith.constant 0 : index
    %327 = vector.load %arg11[%326, %c0_100, %c0_101] : memref<8x8x512xf32, #tpu.memory_space<vmem>>, vector<1x8x512xf32>
    %328 = vector.shape_cast %327 : vector<1x8x512xf32> to vector<8x512xf32>
    %cst_102 = arith.constant dense<0.000000e+00> : vector<8x512xf32>
    %329 = tpu.matmul %325, %293, %cst_102 {dimension_numbers = #tpu.dot_dimension_numbers<[1], [0], [0], [1], [0, 0, 1, 1], [], []>} : vector<8x128xf32>, vector<128x512xf32>, vector<8x512xf32> -> vector<8x512xf32>
    %330 = arith.addf %328, %329 : vector<8x512xf32>
    %331 = vector.extract_strided_slice %330 {offsets = [0, 0], sizes = [8, 128], strides = [1, 1]} : vector<8x512xf32> to vector<8x128xf32>
    %332 = arith.negf %331 : vector<8x128xf32>
    %333 = math.exp %332 : vector<8x128xf32>
    %cst_103 = arith.constant 1.000000e+00 : f32
    %334 = vector.broadcast %cst_103 : f32 to vector<8x128xf32>
    %335 = arith.addf %334, %333 : vector<8x128xf32>
    %336 = arith.divf %334, %335 : vector<8x128xf32>
    %337 = vector.extract_strided_slice %330 {offsets = [0, 128], sizes = [8, 128], strides = [1, 1]} : vector<8x512xf32> to vector<8x128xf32>
    %338 = arith.negf %337 : vector<8x128xf32>
    %339 = math.exp %338 : vector<8x128xf32>
    %cst_104 = arith.constant 1.000000e+00 : f32
    %340 = vector.broadcast %cst_104 : f32 to vector<8x128xf32>
    %341 = arith.addf %340, %339 : vector<8x128xf32>
    %342 = arith.divf %340, %341 : vector<8x128xf32>
    %343 = vector.extract_strided_slice %330 {offsets = [0, 256], sizes = [8, 128], strides = [1, 1]} : vector<8x512xf32> to vector<8x128xf32>
    %344 = math.tanh %343 : vector<8x128xf32>
    %345 = vector.extract_strided_slice %330 {offsets = [0, 384], sizes = [8, 128], strides = [1, 1]} : vector<8x512xf32> to vector<8x128xf32>
    %346 = arith.negf %345 : vector<8x128xf32>
    %347 = math.exp %346 : vector<8x128xf32>
    %cst_105 = arith.constant 1.000000e+00 : f32
    %348 = vector.broadcast %cst_105 : f32 to vector<8x128xf32>
    %349 = arith.addf %348, %347 : vector<8x128xf32>
    %350 = arith.divf %348, %349 : vector<8x128xf32>
    %351 = arith.mulf %342, %323 : vector<8x128xf32>
    %352 = arith.mulf %336, %344 : vector<8x128xf32>
    %353 = arith.addf %351, %352 : vector<8x128xf32>
    %354 = math.tanh %353 : vector<8x128xf32>
    %355 = arith.mulf %350, %354 : vector<8x128xf32>
    %c2_i32_106 = arith.constant 2 : i32
    %356 = arith.index_cast %c2_i32_106 : i32 to index
    %c0_107 = arith.constant 0 : index
    %c0_108 = arith.constant 0 : index
    %357 = vector.load %arg11[%356, %c0_107, %c0_108] : memref<8x8x512xf32, #tpu.memory_space<vmem>>, vector<1x8x512xf32>
    %358 = vector.shape_cast %357 : vector<1x8x512xf32> to vector<8x512xf32>
    %cst_109 = arith.constant dense<0.000000e+00> : vector<8x512xf32>
    %359 = tpu.matmul %355, %293, %cst_109 {dimension_numbers = #tpu.dot_dimension_numbers<[1], [0], [0], [1], [0, 0, 1, 1], [], []>} : vector<8x128xf32>, vector<128x512xf32>, vector<8x512xf32> -> vector<8x512xf32>
    %360 = arith.addf %358, %359 : vector<8x512xf32>
    %361 = vector.extract_strided_slice %360 {offsets = [0, 0], sizes = [8, 128], strides = [1, 1]} : vector<8x512xf32> to vector<8x128xf32>
    %362 = arith.negf %361 : vector<8x128xf32>
    %363 = math.exp %362 : vector<8x128xf32>
    %cst_110 = arith.constant 1.000000e+00 : f32
    %364 = vector.broadcast %cst_110 : f32 to vector<8x128xf32>
    %365 = arith.addf %364, %363 : vector<8x128xf32>
    %366 = arith.divf %364, %365 : vector<8x128xf32>
    %367 = vector.extract_strided_slice %360 {offsets = [0, 128], sizes = [8, 128], strides = [1, 1]} : vector<8x512xf32> to vector<8x128xf32>
    %368 = arith.negf %367 : vector<8x128xf32>
    %369 = math.exp %368 : vector<8x128xf32>
    %cst_111 = arith.constant 1.000000e+00 : f32
    %370 = vector.broadcast %cst_111 : f32 to vector<8x128xf32>
    %371 = arith.addf %370, %369 : vector<8x128xf32>
    %372 = arith.divf %370, %371 : vector<8x128xf32>
    %373 = vector.extract_strided_slice %360 {offsets = [0, 256], sizes = [8, 128], strides = [1, 1]} : vector<8x512xf32> to vector<8x128xf32>
    %374 = math.tanh %373 : vector<8x128xf32>
    %375 = vector.extract_strided_slice %360 {offsets = [0, 384], sizes = [8, 128], strides = [1, 1]} : vector<8x512xf32> to vector<8x128xf32>
    %376 = arith.negf %375 : vector<8x128xf32>
    %377 = math.exp %376 : vector<8x128xf32>
    %cst_112 = arith.constant 1.000000e+00 : f32
    %378 = vector.broadcast %cst_112 : f32 to vector<8x128xf32>
    %379 = arith.addf %378, %377 : vector<8x128xf32>
    %380 = arith.divf %378, %379 : vector<8x128xf32>
    %381 = arith.mulf %372, %353 : vector<8x128xf32>
    %382 = arith.mulf %366, %374 : vector<8x128xf32>
    %383 = arith.addf %381, %382 : vector<8x128xf32>
    %384 = math.tanh %383 : vector<8x128xf32>
    %385 = arith.mulf %380, %384 : vector<8x128xf32>
    %c3_i32_113 = arith.constant 3 : i32
    %386 = arith.index_cast %c3_i32_113 : i32 to index
    %c0_114 = arith.constant 0 : index
    %c0_115 = arith.constant 0 : index
    %387 = vector.load %arg11[%386, %c0_114, %c0_115] : memref<8x8x512xf32, #tpu.memory_space<vmem>>, vector<1x8x512xf32>
    %388 = vector.shape_cast %387 : vector<1x8x512xf32> to vector<8x512xf32>
    %cst_116 = arith.constant dense<0.000000e+00> : vector<8x512xf32>
    %389 = tpu.matmul %385, %293, %cst_116 {dimension_numbers = #tpu.dot_dimension_numbers<[1], [0], [0], [1], [0, 0, 1, 1], [], []>} : vector<8x128xf32>, vector<128x512xf32>, vector<8x512xf32> -> vector<8x512xf32>
    %390 = arith.addf %388, %389 : vector<8x512xf32>
    %391 = vector.extract_strided_slice %390 {offsets = [0, 0], sizes = [8, 128], strides = [1, 1]} : vector<8x512xf32> to vector<8x128xf32>
    %392 = arith.negf %391 : vector<8x128xf32>
    %393 = math.exp %392 : vector<8x128xf32>
    %cst_117 = arith.constant 1.000000e+00 : f32
    %394 = vector.broadcast %cst_117 : f32 to vector<8x128xf32>
    %395 = arith.addf %394, %393 : vector<8x128xf32>
    %396 = arith.divf %394, %395 : vector<8x128xf32>
    %397 = vector.extract_strided_slice %390 {offsets = [0, 128], sizes = [8, 128], strides = [1, 1]} : vector<8x512xf32> to vector<8x128xf32>
    %398 = arith.negf %397 : vector<8x128xf32>
    %399 = math.exp %398 : vector<8x128xf32>
    %cst_118 = arith.constant 1.000000e+00 : f32
    %400 = vector.broadcast %cst_118 : f32 to vector<8x128xf32>
    %401 = arith.addf %400, %399 : vector<8x128xf32>
    %402 = arith.divf %400, %401 : vector<8x128xf32>
    %403 = vector.extract_strided_slice %390 {offsets = [0, 256], sizes = [8, 128], strides = [1, 1]} : vector<8x512xf32> to vector<8x128xf32>
    %404 = math.tanh %403 : vector<8x128xf32>
    %405 = vector.extract_strided_slice %390 {offsets = [0, 384], sizes = [8, 128], strides = [1, 1]} : vector<8x512xf32> to vector<8x128xf32>
    %406 = arith.negf %405 : vector<8x128xf32>
    %407 = math.exp %406 : vector<8x128xf32>
    %cst_119 = arith.constant 1.000000e+00 : f32
    %408 = vector.broadcast %cst_119 : f32 to vector<8x128xf32>
    %409 = arith.addf %408, %407 : vector<8x128xf32>
    %410 = arith.divf %408, %409 : vector<8x128xf32>
    %411 = arith.mulf %402, %383 : vector<8x128xf32>
    %412 = arith.mulf %396, %404 : vector<8x128xf32>
    %413 = arith.addf %411, %412 : vector<8x128xf32>
    %414 = math.tanh %413 : vector<8x128xf32>
    %415 = arith.mulf %410, %414 : vector<8x128xf32>
    %c4_i32_120 = arith.constant 4 : i32
    %416 = arith.index_cast %c4_i32_120 : i32 to index
    %c0_121 = arith.constant 0 : index
    %c0_122 = arith.constant 0 : index
    %417 = vector.load %arg11[%416, %c0_121, %c0_122] : memref<8x8x512xf32, #tpu.memory_space<vmem>>, vector<1x8x512xf32>
    %418 = vector.shape_cast %417 : vector<1x8x512xf32> to vector<8x512xf32>
    %cst_123 = arith.constant dense<0.000000e+00> : vector<8x512xf32>
    %419 = tpu.matmul %415, %293, %cst_123 {dimension_numbers = #tpu.dot_dimension_numbers<[1], [0], [0], [1], [0, 0, 1, 1], [], []>} : vector<8x128xf32>, vector<128x512xf32>, vector<8x512xf32> -> vector<8x512xf32>
    %420 = arith.addf %418, %419 : vector<8x512xf32>
    %421 = vector.extract_strided_slice %420 {offsets = [0, 0], sizes = [8, 128], strides = [1, 1]} : vector<8x512xf32> to vector<8x128xf32>
    %422 = arith.negf %421 : vector<8x128xf32>
    %423 = math.exp %422 : vector<8x128xf32>
    %cst_124 = arith.constant 1.000000e+00 : f32
    %424 = vector.broadcast %cst_124 : f32 to vector<8x128xf32>
    %425 = arith.addf %424, %423 : vector<8x128xf32>
    %426 = arith.divf %424, %425 : vector<8x128xf32>
    %427 = vector.extract_strided_slice %420 {offsets = [0, 128], sizes = [8, 128], strides = [1, 1]} : vector<8x512xf32> to vector<8x128xf32>
    %428 = arith.negf %427 : vector<8x128xf32>
    %429 = math.exp %428 : vector<8x128xf32>
    %cst_125 = arith.constant 1.000000e+00 : f32
    %430 = vector.broadcast %cst_125 : f32 to vector<8x128xf32>
    %431 = arith.addf %430, %429 : vector<8x128xf32>
    %432 = arith.divf %430, %431 : vector<8x128xf32>
    %433 = vector.extract_strided_slice %420 {offsets = [0, 256], sizes = [8, 128], strides = [1, 1]} : vector<8x512xf32> to vector<8x128xf32>
    %434 = math.tanh %433 : vector<8x128xf32>
    %435 = vector.extract_strided_slice %420 {offsets = [0, 384], sizes = [8, 128], strides = [1, 1]} : vector<8x512xf32> to vector<8x128xf32>
    %436 = arith.negf %435 : vector<8x128xf32>
    %437 = math.exp %436 : vector<8x128xf32>
    %cst_126 = arith.constant 1.000000e+00 : f32
    %438 = vector.broadcast %cst_126 : f32 to vector<8x128xf32>
    %439 = arith.addf %438, %437 : vector<8x128xf32>
    %440 = arith.divf %438, %439 : vector<8x128xf32>
    %441 = arith.mulf %432, %413 : vector<8x128xf32>
    %442 = arith.mulf %426, %434 : vector<8x128xf32>
    %443 = arith.addf %441, %442 : vector<8x128xf32>
    %444 = math.tanh %443 : vector<8x128xf32>
    %445 = arith.mulf %440, %444 : vector<8x128xf32>
    %c5_i32_127 = arith.constant 5 : i32
    %446 = arith.index_cast %c5_i32_127 : i32 to index
    %c0_128 = arith.constant 0 : index
    %c0_129 = arith.constant 0 : index
    %447 = vector.load %arg11[%446, %c0_128, %c0_129] : memref<8x8x512xf32, #tpu.memory_space<vmem>>, vector<1x8x512xf32>
    %448 = vector.shape_cast %447 : vector<1x8x512xf32> to vector<8x512xf32>
    %cst_130 = arith.constant dense<0.000000e+00> : vector<8x512xf32>
    %449 = tpu.matmul %445, %293, %cst_130 {dimension_numbers = #tpu.dot_dimension_numbers<[1], [0], [0], [1], [0, 0, 1, 1], [], []>} : vector<8x128xf32>, vector<128x512xf32>, vector<8x512xf32> -> vector<8x512xf32>
    %450 = arith.addf %448, %449 : vector<8x512xf32>
    %451 = vector.extract_strided_slice %450 {offsets = [0, 0], sizes = [8, 128], strides = [1, 1]} : vector<8x512xf32> to vector<8x128xf32>
    %452 = arith.negf %451 : vector<8x128xf32>
    %453 = math.exp %452 : vector<8x128xf32>
    %cst_131 = arith.constant 1.000000e+00 : f32
    %454 = vector.broadcast %cst_131 : f32 to vector<8x128xf32>
    %455 = arith.addf %454, %453 : vector<8x128xf32>
    %456 = arith.divf %454, %455 : vector<8x128xf32>
    %457 = vector.extract_strided_slice %450 {offsets = [0, 128], sizes = [8, 128], strides = [1, 1]} : vector<8x512xf32> to vector<8x128xf32>
    %458 = arith.negf %457 : vector<8x128xf32>
    %459 = math.exp %458 : vector<8x128xf32>
    %cst_132 = arith.constant 1.000000e+00 : f32
    %460 = vector.broadcast %cst_132 : f32 to vector<8x128xf32>
    %461 = arith.addf %460, %459 : vector<8x128xf32>
    %462 = arith.divf %460, %461 : vector<8x128xf32>
    %463 = vector.extract_strided_slice %450 {offsets = [0, 256], sizes = [8, 128], strides = [1, 1]} : vector<8x512xf32> to vector<8x128xf32>
    %464 = math.tanh %463 : vector<8x128xf32>
    %465 = vector.extract_strided_slice %450 {offsets = [0, 384], sizes = [8, 128], strides = [1, 1]} : vector<8x512xf32> to vector<8x128xf32>
    %466 = arith.negf %465 : vector<8x128xf32>
    %467 = math.exp %466 : vector<8x128xf32>
    %cst_133 = arith.constant 1.000000e+00 : f32
    %468 = vector.broadcast %cst_133 : f32 to vector<8x128xf32>
    %469 = arith.addf %468, %467 : vector<8x128xf32>
    %470 = arith.divf %468, %469 : vector<8x128xf32>
    %471 = arith.mulf %462, %443 : vector<8x128xf32>
    %472 = arith.mulf %456, %464 : vector<8x128xf32>
    %473 = arith.addf %471, %472 : vector<8x128xf32>
    %474 = math.tanh %473 : vector<8x128xf32>
    %475 = arith.mulf %470, %474 : vector<8x128xf32>
    %c6_i32_134 = arith.constant 6 : i32
    %476 = arith.index_cast %c6_i32_134 : i32 to index
    %c0_135 = arith.constant 0 : index
    %c0_136 = arith.constant 0 : index
    %477 = vector.load %arg11[%476, %c0_135, %c0_136] : memref<8x8x512xf32, #tpu.memory_space<vmem>>, vector<1x8x512xf32>
    %478 = vector.shape_cast %477 : vector<1x8x512xf32> to vector<8x512xf32>
    %cst_137 = arith.constant dense<0.000000e+00> : vector<8x512xf32>
    %479 = tpu.matmul %475, %293, %cst_137 {dimension_numbers = #tpu.dot_dimension_numbers<[1], [0], [0], [1], [0, 0, 1, 1], [], []>} : vector<8x128xf32>, vector<128x512xf32>, vector<8x512xf32> -> vector<8x512xf32>
    %480 = arith.addf %478, %479 : vector<8x512xf32>
    %481 = vector.extract_strided_slice %480 {offsets = [0, 0], sizes = [8, 128], strides = [1, 1]} : vector<8x512xf32> to vector<8x128xf32>
    %482 = arith.negf %481 : vector<8x128xf32>
    %483 = math.exp %482 : vector<8x128xf32>
    %cst_138 = arith.constant 1.000000e+00 : f32
    %484 = vector.broadcast %cst_138 : f32 to vector<8x128xf32>
    %485 = arith.addf %484, %483 : vector<8x128xf32>
    %486 = arith.divf %484, %485 : vector<8x128xf32>
    %487 = vector.extract_strided_slice %480 {offsets = [0, 128], sizes = [8, 128], strides = [1, 1]} : vector<8x512xf32> to vector<8x128xf32>
    %488 = arith.negf %487 : vector<8x128xf32>
    %489 = math.exp %488 : vector<8x128xf32>
    %cst_139 = arith.constant 1.000000e+00 : f32
    %490 = vector.broadcast %cst_139 : f32 to vector<8x128xf32>
    %491 = arith.addf %490, %489 : vector<8x128xf32>
    %492 = arith.divf %490, %491 : vector<8x128xf32>
    %493 = vector.extract_strided_slice %480 {offsets = [0, 256], sizes = [8, 128], strides = [1, 1]} : vector<8x512xf32> to vector<8x128xf32>
    %494 = math.tanh %493 : vector<8x128xf32>
    %495 = vector.extract_strided_slice %480 {offsets = [0, 384], sizes = [8, 128], strides = [1, 1]} : vector<8x512xf32> to vector<8x128xf32>
    %496 = arith.negf %495 : vector<8x128xf32>
    %497 = math.exp %496 : vector<8x128xf32>
    %cst_140 = arith.constant 1.000000e+00 : f32
    %498 = vector.broadcast %cst_140 : f32 to vector<8x128xf32>
    %499 = arith.addf %498, %497 : vector<8x128xf32>
    %500 = arith.divf %498, %499 : vector<8x128xf32>
    %501 = arith.mulf %492, %473 : vector<8x128xf32>
    %502 = arith.mulf %486, %494 : vector<8x128xf32>
    %503 = arith.addf %501, %502 : vector<8x128xf32>
    %504 = math.tanh %503 : vector<8x128xf32>
    %505 = arith.mulf %500, %504 : vector<8x128xf32>
    %c7_i32_141 = arith.constant 7 : i32
    %506 = arith.index_cast %c7_i32_141 : i32 to index
    %c0_142 = arith.constant 0 : index
    %c0_143 = arith.constant 0 : index
    %507 = vector.load %arg11[%506, %c0_142, %c0_143] : memref<8x8x512xf32, #tpu.memory_space<vmem>>, vector<1x8x512xf32>
    %508 = vector.shape_cast %507 : vector<1x8x512xf32> to vector<8x512xf32>
    %cst_144 = arith.constant dense<0.000000e+00> : vector<8x512xf32>
    %509 = tpu.matmul %505, %293, %cst_144 {dimension_numbers = #tpu.dot_dimension_numbers<[1], [0], [0], [1], [0, 0, 1, 1], [], []>} : vector<8x128xf32>, vector<128x512xf32>, vector<8x512xf32> -> vector<8x512xf32>
    %510 = arith.addf %508, %509 : vector<8x512xf32>
    %511 = vector.extract_strided_slice %510 {offsets = [0, 0], sizes = [8, 128], strides = [1, 1]} : vector<8x512xf32> to vector<8x128xf32>
    %512 = arith.negf %511 : vector<8x128xf32>
    %513 = math.exp %512 : vector<8x128xf32>
    %cst_145 = arith.constant 1.000000e+00 : f32
    %514 = vector.broadcast %cst_145 : f32 to vector<8x128xf32>
    %515 = arith.addf %514, %513 : vector<8x128xf32>
    %516 = arith.divf %514, %515 : vector<8x128xf32>
    %517 = vector.extract_strided_slice %510 {offsets = [0, 128], sizes = [8, 128], strides = [1, 1]} : vector<8x512xf32> to vector<8x128xf32>
    %518 = arith.negf %517 : vector<8x128xf32>
    %519 = math.exp %518 : vector<8x128xf32>
    %cst_146 = arith.constant 1.000000e+00 : f32
    %520 = vector.broadcast %cst_146 : f32 to vector<8x128xf32>
    %521 = arith.addf %520, %519 : vector<8x128xf32>
    %522 = arith.divf %520, %521 : vector<8x128xf32>
    %523 = vector.extract_strided_slice %510 {offsets = [0, 256], sizes = [8, 128], strides = [1, 1]} : vector<8x512xf32> to vector<8x128xf32>
    %524 = math.tanh %523 : vector<8x128xf32>
    %525 = vector.extract_strided_slice %510 {offsets = [0, 384], sizes = [8, 128], strides = [1, 1]} : vector<8x512xf32> to vector<8x128xf32>
    %526 = arith.negf %525 : vector<8x128xf32>
    %527 = math.exp %526 : vector<8x128xf32>
    %cst_147 = arith.constant 1.000000e+00 : f32
    %528 = vector.broadcast %cst_147 : f32 to vector<8x128xf32>
    %529 = arith.addf %528, %527 : vector<8x128xf32>
    %530 = arith.divf %528, %529 : vector<8x128xf32>
    %531 = arith.mulf %522, %503 : vector<8x128xf32>
    %532 = arith.mulf %516, %524 : vector<8x128xf32>
    %533 = arith.addf %531, %532 : vector<8x128xf32>
    %534 = math.tanh %533 : vector<8x128xf32>
    %535 = arith.mulf %530, %534 : vector<8x128xf32>
    %c8_i32_148 = arith.constant 8 : i32
    %c0_149 = arith.constant 0 : index
    %c0_150 = arith.constant 0 : index
    %536 = vector.load %arg7[%c0_149, %c0_150] : memref<128x128xf32, #tpu.memory_space<vmem>>, vector<128x128xf32>
    %cst_151 = arith.constant dense<0.000000e+00> : vector<8x128xf32>
    %537 = tpu.matmul %535, %536, %cst_151 {dimension_numbers = #tpu.dot_dimension_numbers<[1], [0], [0], [1], [0, 0, 1, 1], [], []>} : vector<8x128xf32>, vector<128x128xf32>, vector<8x128xf32> -> vector<8x128xf32>
    %c0_152 = arith.constant 0 : index
    %c0_153 = arith.constant 0 : index
    %538 = vector.load %arg8[%c0_152, %c0_153] : memref<1x128xf32, #tpu.memory_space<vmem>>, vector<1x128xf32>
    %539 = vector.broadcast %538 : vector<1x128xf32> to vector<8x128xf32>
    %540 = arith.addf %537, %539 : vector<8x128xf32>
    %c0_154 = arith.constant 0 : index
    %c0_155 = arith.constant 0 : index
    %541 = vector.load %arg9[%c0_154, %c0_155] : memref<8x128xf32, #tpu.memory_space<vmem>>, vector<8x128xf32>
    tpu.vector_store %arg9[%c0_154, %c0_155], %540 {strides = array<i32>} : memref<8x128xf32, #tpu.memory_space<vmem>>, vector<8x128xf32>,
    return
  }
}

</mosaic_0001>

<bundles_post_ra>
// kernel: lstm_model_forward.1
= control target key start
LH: loop header
LB: loop body
LE: loop exit
PB: predicated region body
PF: predicated region fallthrough
CT: control target
= control target key end

     0   :  { %14 = vsyncpa [#allocation5], 0  ;;  %s6918_s0 = inlined_call_operand.hbm [shape: f32[8,8,128], index: 0, kind: input, shape index: {}]   ;;  %s6919_s1 = inlined_call_operand.hbm [shape: f32[128,512], index: 1, kind: input, shape index: {}]   ;;  %s6920_s2 = inlined_call_operand.hbm [shape: f32[128,512], index: 2, kind: input, shape index: {}]   ;;  %s6921_s3 = inlined_call_operand.hbm [shape: f32[1,512], index: 3, kind: input, shape index: {}]   ;;  %s6922_s4 = inlined_call_operand.hbm [shape: f32[128,512], index: 4, kind: input, shape index: {}]   ;;  %s6923_s5 = inlined_call_operand.hbm [shape: f32[128,512], index: 5, kind: input, shape index: {}]   ;;  %s6924_s6 = inlined_call_operand.hbm [shape: f32[1,512], index: 6, kind: input, shape index: {}]   ;;  %s6925_s7 = inlined_call_operand.hbm [shape: f32[128,128], index: 7, kind: input, shape index: {}]   ;;  %s6926_s8 = inlined_call_operand.hbm [shape: f32[1,128], index: 8, kind: input, shape index: {}]   ;;  %s6927_s9 = inlined_call_operand.hbm [shape: f32[8,128], index: 9, kind: output, shape index: {}]  }
   0x1   :  { %15 = vsyncpa [#allocation8], 0 }
   0x2   :  { %16 = vsyncpa [#allocation11], 0 }
   0x3   :  { %17 = vsyncpa [#allocation14], 0 }
   0x4   :  { %18 = vsyncpa [#allocation17], 0 }
   0x5   :  { %19 = vsyncpa [#allocation6], 0  ;;  %s5810_s30 = smov [#allocation7]   ;;  %s5578_s13 = scalar_lea.hbm %s6919_s1, 8192 }
   0x6   :  { %s37_s10 = sshll.u32 %s5810_s30, 4  ;;  %p5579_p0 = scmp.ne.s32.totalorder %s6919_s1, %s5578_s13  ;;  %s38_s10 = int_to_ptr.vmem [resolvable:$true] %s37_s10 }
   0x7   :  { %p5582_p1 = scmp.lt.u32.totalorder %s5578_s13, %s6919_s1 }
   0x9   :  { %p5584_p2 = pnand %p5582_p1, %p5579_p0 }
   0xb   :  { %5587 = shalt.err (!%p5584_p2)
}
   0xc   :  { %s5588_s18 = scalar_lea.vmem %s38_s10, 8192  ;;  %p5593_p4 = scmp.lt.s32.totalorder %s38_s10, %s38_s10 }
   0xd   :  { %p5589_p3 = scmp.ne.s32.totalorder %s38_s10, %s5588_s18  ;;  %p5594_p5 = scmp.lt.s32.totalorder %s5588_s18, %s5588_s18 }
   0xf   :  { %p5595_p6 = por %p5594_p5, %p5593_p4 }
  0x11   :  { %p5596_p7 = pnand %p5595_p6, %p5589_p3 }
  0x13   :  { %5599 = shalt.err (!%p5596_p7)
}
  0x14   :  { %s5811_s19 = smov 512   ;;  %s5812_s20 = smov 32  }
  0x15   :  { %43 = dma.hbm_to_vmem [thread:$0]  %s6919_s1, 8192, %s38_s10, [#allocation8], %s5811_s19, %s5811_s19, %s5812_s20  }
  0x16   :  { %s5813_s23 = smov [#allocation10]   ;;  %s5814_s25 = smov [#allocation13]  }
  0x17   :  { %s62_s24 = sshll.u32 %s5813_s23, 4  ;;  %s83_s26 = sshll.u32 %s5814_s25, 4  ;;  %s63_s24 = int_to_ptr.vmem [resolvable:$true] %s62_s24  ;;  %s84_s26 = int_to_ptr.vmem [resolvable:$true] %s83_s26 }
  0x18   :  { %s5600_s29 = scalar_lea.hbm %s6921_s3, 64 }
  0x19   :  { %p5601_p8 = scmp.ne.s32.totalorder %s6921_s3, %s5600_s29  ;;  %p5604_p9 = scmp.lt.u32.totalorder %s5600_s29, %s6921_s3 }
  0x1b   :  { %p5606_p10 = pnand %p5604_p9, %p5601_p8 }
  0x1d   :  { %5609 = shalt.err (!%p5606_p10)
}
  0x1e   :  { %s5610_s1 = scalar_lea.vmem %s63_s24, 64  ;;  %p5615_p12 = scmp.lt.s32.totalorder %s63_s24, %s63_s24 }
  0x1f   :  { %p5611_p11 = scmp.ne.s32.totalorder %s63_s24, %s5610_s1  ;;  %p5616_p13 = scmp.lt.s32.totalorder %s5610_s1, %s5610_s1 }
  0x21   :  { %p5617_p0 = por %p5616_p13, %p5615_p12 }
  0x23   :  { %p5618_p1 = pnand %p5617_p0, %p5611_p11 }
  0x25   :  { %5621 = shalt.err (!%p5618_p1)
}
  0x26   :  { %65 = dma.hbm_to_vmem [thread:$0]  %s6921_s3, 64, %s63_s24, [#allocation11]  }
  0x27   :  { %s5622_s17 = scalar_lea.hbm %s6923_s5, 8192 }
  0x28   :  { %p5623_p2 = scmp.ne.s32.totalorder %s6923_s5, %s5622_s17  ;;  %p5626_p3 = scmp.lt.u32.totalorder %s5622_s17, %s6923_s5 }
  0x2a   :  { %p5628_p4 = pnand %p5626_p3, %p5623_p2 }
  0x2c   :  { %5631 = shalt.err (!%p5628_p4)
}
  0x2d   :  { %s5632_s25 = scalar_lea.vmem %s84_s26, 8192  ;;  %p5637_p6 = scmp.lt.s32.totalorder %s84_s26, %s84_s26 }
  0x2e   :  { %p5633_p5 = scmp.ne.s32.totalorder %s84_s26, %s5632_s25  ;;  %p5638_p7 = scmp.lt.s32.totalorder %s5632_s25, %s5632_s25 }
  0x30   :  { %p5639_p8 = por %p5638_p7, %p5637_p6 }
  0x32   :  { %p5640_p9 = pnand %p5639_p8, %p5633_p5 }
  0x34   :  { %5643 = shalt.err (!%p5640_p9)
}
  0x35   :  { %89 = dma.hbm_to_vmem [thread:$0]  %s6923_s5, 8192, %s84_s26, [#allocation14], %s5811_s19, %s5811_s19, %s5812_s20  }
  0x36   :  { %s5815_s27 = smov [#allocation16]   ;;  %s5816_s29 = smov [#allocation4]  }
  0x37   :  { %s105_s28 = sshll.u32 %s5815_s27, 4  ;;  %s25_s30 = sshll.u32 %s5816_s29, 4  ;;  %s106_s28 = int_to_ptr.vmem [resolvable:$true] %s105_s28  ;;  %s26_s30 = int_to_ptr.vmem [resolvable:$true] %s25_s30 }
  0x38   :  { %s5644_s13 = scalar_lea.hbm %s6925_s7, 2048 }
  0x39   :  { %p5645_p10 = scmp.ne.s32.totalorder %s6925_s7, %s5644_s13  ;;  %p5648_p11 = scmp.lt.u32.totalorder %s5644_s13, %s6925_s7 }
  0x3b   :  { %p5650_p12 = pnand %p5648_p11, %p5645_p10 }
  0x3d   :  { %5653 = shalt.err (!%p5650_p12)
}
  0x3e   :  { %s5654_s5 = scalar_lea.vmem %s106_s28, 2048  ;;  %p5659_p0 = scmp.lt.s32.totalorder %s106_s28, %s106_s28 }
  0x3f   :  { %p5655_p13 = scmp.ne.s32.totalorder %s106_s28, %s5654_s5  ;;  %p5660_p1 = scmp.lt.s32.totalorder %s5654_s5, %s5654_s5 }
  0x41   :  { %p5661_p2 = por %p5660_p1, %p5659_p0 }
  0x43   :  { %p5662_p3 = pnand %p5661_p2, %p5655_p13 }
  0x45   :  { %5665 = shalt.err (!%p5662_p3)
}
  0x46   :  { %s5817_s26 = smov 128   ;;  %s5818_s16 = smov 8  }
  0x47   :  { %111 = dma.hbm_to_vmem [thread:$0]  %s6925_s7, 2048, %s106_s28, [#allocation17], %s5817_s26, %s5817_s26, %s5818_s16  }
  0x48   :  { %s5666_s23 = scalar_lea.hbm %s6918_s0, 1024 }
  0x49   :  { %p5667_p4 = scmp.ne.s32.totalorder %s6918_s0, %s5666_s23  ;;  %p5670_p5 = scmp.lt.u32.totalorder %s5666_s23, %s6918_s0 }
  0x4b   :  { %p5672_p6 = pnand %p5670_p5, %p5667_p4 }
  0x4d   :  { %5675 = shalt.err (!%p5672_p6)
}
  0x4e   :  { %s5676_s29 = scalar_lea.vmem %s26_s30, 1024  ;;  %p5681_p8 = scmp.lt.s32.totalorder %s26_s30, %s26_s30 }
  0x4f   :  { %p5677_p7 = scmp.ne.s32.totalorder %s26_s30, %s5676_s29  ;;  %p5682_p9 = scmp.lt.s32.totalorder %s5676_s29, %s5676_s29 }
  0x51   :  { %p5683_p10 = por %p5682_p9, %p5681_p8 }
  0x53   :  { %p5684_p11 = pnand %p5683_p10, %p5677_p7 }
  0x55   :  { %5687 = shalt.err (!%p5684_p11)
}
  0x56   :  { %31 = dma.hbm_to_vmem [thread:$0]  %s6918_s0, 1024, %s26_s30, [#allocation5], %s5817_s26, %s5817_s26, %s5818_s16  }
  0x57   :  { %s5819_s11 = smov [#allocation9]   ;;  %s5820_s13 = smov [#allocation12]  }
  0x58   :  { %s49_s12 = sshll.u32 %s5819_s11, 4  ;;  %s71_s1 = sshll.u32 %s5820_s13, 4  ;;  %s50_s12 = int_to_ptr.vmem [resolvable:$true] %s49_s12  ;;  %s72_s1 = int_to_ptr.vmem [resolvable:$true] %s71_s1 }
  0x59   :  { %s5688_s15 = scalar_lea.hbm %s6920_s2, 8192 }
  0x5a   :  { %p5689_p12 = scmp.ne.s32.totalorder %s6920_s2, %s5688_s15  ;;  %p5692_p13 = scmp.lt.u32.totalorder %s5688_s15, %s6920_s2 }
  0x5c   :  { %p5694_p0 = pnand %p5692_p13, %p5689_p12 }
  0x5e   :  { %5697 = shalt.err (!%p5694_p0)
}
  0x5f   :  { %s5698_s0 = scalar_lea.vmem %s50_s12, 8192  ;;  %p5703_p2 = scmp.lt.s32.totalorder %s50_s12, %s50_s12 }
  0x60   :  { %p5699_p1 = scmp.ne.s32.totalorder %s50_s12, %s5698_s0  ;;  %p5704_p3 = scmp.lt.s32.totalorder %s5698_s0, %s5698_s0 }
  0x62   :  { %p5705_p4 = por %p5704_p3, %p5703_p2 }
  0x64   :  { %p5706_p5 = pnand %p5705_p4, %p5699_p1 }
  0x66   :  { %5709 = shalt.err (!%p5706_p5)
}
  0x67   :  { %55 = dma.hbm_to_vmem [thread:$0]  %s6920_s2, 8192, %s50_s12, [#allocation8], %s5811_s19, %s5811_s19, %s5812_s20  }
  0x68   :  { %s5710_s23 = scalar_lea.hbm %s6922_s4, 8192 }
  0x69   :  { %p5711_p6 = scmp.ne.s32.totalorder %s6922_s4, %s5710_s23  ;;  %p5714_p7 = scmp.lt.u32.totalorder %s5710_s23, %s6922_s4 }
  0x6b   :  { %p5716_p8 = pnand %p5714_p7, %p5711_p6 }
  0x6d   :  { %5719 = shalt.err (!%p5716_p8)
}
  0x6e   :  { %s5720_s29 = scalar_lea.vmem %s72_s1, 8192  ;;  %p5725_p10 = scmp.lt.s32.totalorder %s72_s1, %s72_s1 }
  0x6f   :  { %p5721_p9 = scmp.ne.s32.totalorder %s72_s1, %s5720_s29  ;;  %p5726_p11 = scmp.lt.s32.totalorder %s5720_s29, %s5720_s29 }
  0x71   :  { %p5727_p12 = por %p5726_p11, %p5725_p10 }
  0x73   :  { %p5728_p13 = pnand %p5727_p12, %p5721_p9 }
  0x75   :  { %5731 = shalt.err (!%p5728_p13)
}
  0x76   :  { %77 = dma.hbm_to_vmem [thread:$0]  %s6922_s4, 8192, %s72_s1, [#allocation11], %s5811_s19, %s5811_s19, %s5812_s20  }
  0x77   :  { %s5821_s28 = smov [#allocation15]   ;;  %s5822_s12 = smov [#allocation18]  }
  0x78   :  { %s96_s11 = sshll.u32 %s5821_s28, 4  ;;  %s118_s13 = sshll.u32 %s5822_s12, 4  ;;  %s97_s11 = int_to_ptr.vmem [resolvable:$true] %s96_s11  ;;  %s119_s13 = int_to_ptr.vmem [resolvable:$true] %s118_s13 }
  0x79   :  { %s5732_s15 = scalar_lea.hbm %s6924_s6, 64 }
  0x7a   :  { %p5733_p0 = scmp.ne.s32.totalorder %s6924_s6, %s5732_s15  ;;  %p5736_p1 = scmp.lt.u32.totalorder %s5732_s15, %s6924_s6 }
  0x7c   :  { %p5738_p2 = pnand %p5736_p1, %p5733_p0 }
  0x7e   :  { %5741 = shalt.err (!%p5738_p2)
}
  0x7f   :  { %s5742_s4 = scalar_lea.vmem %s97_s11, 64  ;;  %p5747_p4 = scmp.lt.s32.totalorder %s97_s11, %s97_s11 }
  0x80   :  { %p5743_p3 = scmp.ne.s32.totalorder %s97_s11, %s5742_s4  ;;  %p5748_p5 = scmp.lt.s32.totalorder %s5742_s4, %s5742_s4 }
  0x82   :  { %p5749_p6 = por %p5748_p5, %p5747_p4 }
  0x84   :  { %p5750_p7 = pnand %p5749_p6, %p5743_p3 }
  0x86   :  { %5753 = shalt.err (!%p5750_p7)
}
  0x87   :  { %99 = dma.hbm_to_vmem [thread:$0]  %s6924_s6, 64, %s97_s11, [#allocation14]  }
  0x88   :  { %s5754_s30 = scalar_lea.hbm %s6926_s8, 16 }
  0x89   :  { %p5755_p8 = scmp.ne.s32.totalorder %s6926_s8, %s5754_s30  ;;  %p5758_p9 = scmp.lt.u32.totalorder %s5754_s30, %s6926_s8 }
  0x8b   :  { %p5760_p10 = pnand %p5758_p9, %p5755_p8 }
  0x8d   :  { %5763 = shalt.err (!%p5760_p10)
}
  0x8e   :  { %s5764_s25 = scalar_lea.vmem %s119_s13, 16  ;;  %s5768_s3 = scalar_lea.vmem %s119_s13, 32 }
  0x8f   :  { %p5765_p11 = scmp.ne.s32.totalorder %s119_s13, %s5764_s25  ;;  %p5769_p12 = scmp.lt.s32.totalorder %s119_s13, %s119_s13 }
  0x90   :  { %p5770_p13 = scmp.lt.s32.totalorder %s5768_s3, %s5764_s25 }
  0x92   :  { %p5771_p0 = por %p5770_p13, %p5769_p12 }
  0x94   :  { %p5772_p1 = pnand %p5771_p0, %p5765_p11 }
  0x96   :  { %5775 = shalt.err (!%p5772_p1)
}
  0x97   :  { %121 = dma.hbm_to_vmem [thread:$0]  %s6926_s8, 16, %s119_s13, [#allocation17]  }
  0x98   :  { %5798 = dma.done.wait [#allocation5], 1024  }
  0x99   :  { %5799 = vsyncadd [#allocation5], 4294966272 }
  0x9a   :  { %5800 = dma.done.wait [#allocation8], 16384  }
  0x9b   :  { %5801 = vsyncadd [#allocation8], 4294950912 }
  0x9c   :  { %5802 = dma.done.wait [#allocation11], 8256  }
  0x9d   :  { %5803 = vsyncadd [#allocation11], 4294959040 }
  0x9e   :  { %5804 = dma.done.wait [#allocation14], 8256  }
  0x9f   :  { %5805 = vsyncadd [#allocation14], 4294959040 }
  0xa0   :  { %5806 = dma.done.wait [#allocation17], 2064  }
  0xa1   :  { %5807 = vsyncadd [#allocation17], 4294965232  ;;  %v5823_v0 = vmov 0.0   ;;  %v158_v1 = vld [vmem:[#allocation7 + $0x8] sm:$0xff]  ;;  %v160_v3 = vld [vmem:[#allocation7 + $0x18] sm:$0xff]  ;;  %vm5825_vm0 = vmmov 0  }
  0xa2   :  { %307 = vmatprep.mubr.f32.mxu0 %v5823_v0  ;;  %420 = vmatprep.mubr.f32.mxu1 %v5823_v0  ;;  %v162_v2 = vld [vmem:[#allocation7 + $0x28] sm:$0xff]  ;;  %v164_v5 = vld [vmem:[#allocation7 + $0x38] sm:$0xff]  ;;  %v157_v6 = vld [vmem:[#allocation7] sm:$0xff]  ;;  %s5826_s8 = smov [#allocation19]  }
  0xa3   :  { %v4001_v4 = vpack.c.bf16 %v162_v2, %v158_v1  ;;  %v161_v7 = vld [vmem:[#allocation7 + $0x20] sm:$0xff]  ;;  %v4033_v8 = vpack.c.bf16 %v164_v5, %v160_v3  ;;  %v159_v10 = vld [vmem:[#allocation7 + $0x10] sm:$0xff]  ;;  %v166_v12 = vld [vmem:[#allocation7 + $0x48] sm:$0xff]  ;;  %s3887_s27 = sshll.u32 %s5826_s8, 4  ;;  %s3888_s27 = int_to_ptr.vmem [resolvable:$true] %s3887_s27 }
  0xa4   :  { %v4003_v9 = vpack.c.bf16 %v161_v7, %v157_v6  ;;  %v163_v11 = vld [vmem:[#allocation7 + $0x30] sm:$0xff]  ;;  %v170_v14 = vld [vmem:[#allocation7 + $0x68] sm:$0xff]  ;;  %v168_v15 = vld [vmem:[#allocation7 + $0x58] sm:$0xff]  ;;  %s5776_s29 = scalar_lea.vmem %s3888_s27, 128  ;;  %p5781_p3 = scmp.lt.s32.totalorder %s3888_s27, %s3888_s27 }
  0xa5   :  { %4002 = vmatprep.subr.bf16.mxu0 %v4001_v4  ;;  %v4035_v13 = vpack.c.bf16 %v163_v11, %v159_v10  ;;  %v172_v16 = vld [vmem:[#allocation7 + $0x78] sm:$0xff]  ;;  %4034 = vmatprep.subr.bf16.mxu1 %v4033_v8  ;;  %v4005_v17 = vpack.c.bf16 %v170_v14, %v166_v12  ;;  %v165_v19 = vld [vmem:[#allocation7 + $0x40] sm:$0xff]  ;;  %v167_v21 = vld [vmem:[#allocation7 + $0x50] sm:$0xff]  ;;  %p5777_p2 = scmp.ne.s32.totalorder %s3888_s27, %s5776_s29  ;;  %p5782_p4 = scmp.lt.s32.totalorder %s5776_s29, %s5776_s29 }
  0xa6   :  { %4004 = vmatpush1.bf16.msra.mxu0 %v4003_v9  ;;  %v4037_v18 = vpack.c.bf16 %v172_v16, %v168_v15  ;;  %v169_v20 = vld [vmem:[#allocation7 + $0x60] sm:$0xff]  ;;  %v171_v23 = vld [vmem:[#allocation7 + $0x70] sm:$0xff]  ;;  %v174_v24 = vld [vmem:[#allocation7 + $0x88] sm:$0xff] }
  0xa7   :  { %4036 = vmatpush1.bf16.msra.mxu1 %v4035_v13  ;;  %v4007_v22 = vpack.c.bf16 %v169_v20, %v165_v19  ;;  %v178_v25 = vld [vmem:[#allocation7 + $0xa8] sm:$0xff]  ;;  %4006 = vmatprep.subr.bf16.mxu0 %v4005_v17  ;;  %v4039_v26 = vpack.c.bf16 %v171_v23, %v167_v21  ;;  %v176_v28 = vld [vmem:[#allocation7 + $0x98] sm:$0xff]  ;;  %v173_v30 = vld [vmem:[#allocation7 + $0x80] sm:$0xff]  ;;  %p5783_p5 = por %p5782_p4, %p5781_p3 }
  0xa8   :  { %4038 = vmatprep.subr.bf16.mxu1 %v4037_v18  ;;  %v4009_v27 = vpack.c.bf16 %v178_v25, %v174_v24  ;;  %v180_v29 = vld [vmem:[#allocation7 + $0xb8] sm:$0xff]  ;;  %v177_v32 = vld [vmem:[#allocation7 + $0xa0] sm:$0xff]  ;;  %v175_v33 = vld [vmem:[#allocation7 + $0x90] sm:$0xff] }
  0xa9   :  { %v4041_v31 = vpack.c.bf16 %v180_v29, %v176_v28  ;;  %v179_v34 = vld [vmem:[#allocation7 + $0xb0] sm:$0xff]  ;;  %v4011_v35 = vpack.c.bf16 %v177_v32, %v173_v30  ;;  %v182_v36 = vld [vmem:[#allocation7 + $0xc8] sm:$0xff]  ;;  %v184_v38 = vld [vmem:[#allocation7 + $0xd8] sm:$0xff]  ;;  %p5784_p6 = pnand %p5783_p5, %p5777_p2 }
  0xaa   :  { %4008 = vmatpush1.bf16.msra.mxu0 %v4007_v22  ;;  %v186_v37 = vld [vmem:[#allocation7 + $0xe8] sm:$0xff]  ;;  %v4043_v39 = vpack.c.bf16 %v179_v34, %v175_v33  ;;  %v188_v41 = vld [vmem:[#allocation7 + $0xf8] sm:$0xff]  ;;  %v181_v42 = vld [vmem:[#allocation7 + $0xc0] sm:$0xff] }
  0xab   :  { %4040 = vmatpush1.bf16.msra.mxu1 %v4039_v26  ;;  %4010 = vmatprep.subr.bf16.mxu0 %v4009_v27  ;;  %v4013_v40 = vpack.c.bf16 %v186_v37, %v182_v36  ;;  %v185_v43 = vld [vmem:[#allocation7 + $0xe0] sm:$0xff]  ;;  %v4045_v44 = vpack.c.bf16 %v188_v41, %v184_v38  ;;  %v183_v45 = vld [vmem:[#allocation7 + $0xd0] sm:$0xff]  ;;  %v190_v47 = vld [vmem:[#allocation7 + $0x108] sm:$0xff] }
  0xac   :  { %4042 = vmatprep.subr.bf16.mxu1 %v4041_v31  ;;  %v187_v46 = vld [vmem:[#allocation7 + $0xf0] sm:$0xff]  ;;  %v194_v48 = vld [vmem:[#allocation7 + $0x128] sm:$0xff]  ;;  %v192_v49 = vld [vmem:[#allocation7 + $0x118] sm:$0xff]  ;;  %v4015_v51 = vpack.c.bf16 %v185_v43, %v181_v42 }
  0xad   :  { %v196_v50 = vld [vmem:[#allocation7 + $0x138] sm:$0xff]  ;;  %v4047_v52 = vpack.c.bf16 %v187_v46, %v183_v45  ;;  %v4017_v53 = vpack.c.bf16 %v194_v48, %v190_v47  ;;  %v189_v54 = vld [vmem:[#allocation7 + $0x100] sm:$0xff]  ;;  %v191_v56 = vld [vmem:[#allocation7 + $0x110] sm:$0xff] }
  0xae   :  { %4012 = vmatpush1.bf16.msra.mxu0 %v4011_v35  ;;  %v193_v55 = vld [vmem:[#allocation7 + $0x120] sm:$0xff]  ;;  %v4049_v57 = vpack.c.bf16 %v196_v50, %v192_v49  ;;  %v195_v58 = vld [vmem:[#allocation7 + $0x130] sm:$0xff]  ;;  %v198_v59 = vld [vmem:[#allocation7 + $0x148] sm:$0xff] }
  0xaf   :  { %4044 = vmatpush1.bf16.msra.mxu1 %v4043_v39  ;;  %4014 = vmatprep.subr.bf16.mxu0 %v4013_v40  ;;  %v202_v60 = vld [vmem:[#allocation7 + $0x168] sm:$0xff]  ;;  %v200_v61 = vld [vmem:[#allocation7 + $0x158] sm:$0xff]  ;;  %v4019_v63 = vpack.c.bf16 %v193_v55, %v189_v54  ;;  %v4051_v1 = vpack.c.bf16 %v195_v58, %v191_v56  ;;  %v197_v3 = vld [vmem:[#allocation7 + $0x140] sm:$0xff] }
  0xb0   :  { %4046 = vmatprep.subr.bf16.mxu1 %v4045_v44  ;;  %v204_v62 = vld [vmem:[#allocation7 + $0x178] sm:$0xff]  ;;  %v4021_v2 = vpack.c.bf16 %v202_v60, %v198_v59  ;;  %v201_v4 = vld [vmem:[#allocation7 + $0x160] sm:$0xff]  ;;  %v199_v5 = vld [vmem:[#allocation7 + $0x150] sm:$0xff] }
  0xb1   :  { %v4053_v6 = vpack.c.bf16 %v204_v62, %v200_v61  ;;  %v203_v7 = vld [vmem:[#allocation7 + $0x170] sm:$0xff]  ;;  %v206_v8 = vld [vmem:[#allocation7 + $0x188] sm:$0xff]  ;;  %v208_v10 = vld [vmem:[#allocation7 + $0x198] sm:$0xff]  ;;  %v4023_v12 = vpack.c.bf16 %v201_v4, %v197_v3 }
  0xb2   :  { %4016 = vmatpush1.bf16.msra.mxu0 %v4015_v51  ;;  %v210_v9 = vld [vmem:[#allocation7 + $0x1a8] sm:$0xff]  ;;  %v212_v11 = vld [vmem:[#allocation7 + $0x1b8] sm:$0xff]  ;;  %v4055_v13 = vpack.c.bf16 %v203_v7, %v199_v5  ;;  %v205_v15 = vld [vmem:[#allocation7 + $0x180] sm:$0xff] }
  0xb3   :  { %4048 = vmatpush1.bf16.msra.mxu1 %v4047_v52  ;;  %4018 = vmatprep.subr.bf16.mxu0 %v4017_v53  ;;  %v4025_v14 = vpack.c.bf16 %v210_v9, %v206_v8  ;;  %v209_v16 = vld [vmem:[#allocation7 + $0x1a0] sm:$0xff]  ;;  %v207_v17 = vld [vmem:[#allocation7 + $0x190] sm:$0xff]  ;;  %v4057_v18 = vpack.c.bf16 %v212_v11, %v208_v10  ;;  %v214_v20 = vld [vmem:[#allocation7 + $0x1c8] sm:$0xff] }
  0xb4   :  { %4050 = vmatprep.subr.bf16.mxu1 %v4049_v57  ;;  %v211_v19 = vld [vmem:[#allocation7 + $0x1b0] sm:$0xff]  ;;  %v218_v21 = vld [vmem:[#allocation7 + $0x1e8] sm:$0xff]  ;;  %v216_v22 = vld [vmem:[#allocation7 + $0x1d8] sm:$0xff]  ;;  %v4027_v24 = vpack.c.bf16 %v209_v16, %v205_v15 }
  0xb5   :  { %v220_v23 = vld [vmem:[#allocation7 + $0x1f8] sm:$0xff]  ;;  %v4059_v25 = vpack.c.bf16 %v211_v19, %v207_v17  ;;  %v4029_v26 = vpack.c.bf16 %v218_v21, %v214_v20  ;;  %v213_v27 = vld [vmem:[#allocation7 + $0x1c0] sm:$0xff]  ;;  %v215_v29 = vld [vmem:[#allocation7 + $0x1d0] sm:$0xff] }
  0xb6   :  { %4020 = vmatpush1.bf16.msra.mxu0 %v4019_v63  ;;  %v217_v28 = vld [vmem:[#allocation7 + $0x1e0] sm:$0xff]  ;;  %v4061_v30 = vpack.c.bf16 %v220_v23, %v216_v22  ;;  %v219_v31 = vld [vmem:[#allocation7 + $0x1f0] sm:$0xff]  ;;  %v502_v32 = vld [vmem:[#allocation9 + $0x8] sm:$0xff] }
  0xb7   :  { %4052 = vmatpush1.bf16.msra.mxu1 %v4051_v1  ;;  %4022 = vmatprep.subr.bf16.mxu0 %v4021_v2  ;;  %v506_v33 = vld [vmem:[#allocation9 + $0x28] sm:$0xff]  ;;  %v504_v34 = vld [vmem:[#allocation9 + $0x18] sm:$0xff]  ;;  %v4031_v36 = vpack.c.bf16 %v217_v28, %v213_v27  ;;  %v4063_v37 = vpack.c.bf16 %v219_v31, %v215_v29  ;;  %v501_v39 = vld [vmem:[#allocation9] sm:$0xff] }
  0xb8   :  { %4054 = vmatprep.subr.bf16.mxu1 %v4053_v6  ;;  %v508_v35 = vld [vmem:[#allocation9 + $0x38] sm:$0xff]  ;;  %v5999_v38 = vpack.c.bf16 %v506_v33, %v502_v32  ;;  %v505_v40 = vld [vmem:[#allocation9 + $0x20] sm:$0xff]  ;;  %v503_v42 = vld [vmem:[#allocation9 + $0x10] sm:$0xff] }
  0xb9   :  { %v6001_v41 = vpack.c.bf16 %v508_v35, %v504_v34  ;;  %v507_v43 = vld [vmem:[#allocation9 + $0x30] sm:$0xff]  ;;  %v510_v44 = vld [vmem:[#allocation9 + $0x48] sm:$0xff]  ;;  %v149_v46 = vld [vmem:[#allocation4] sm:$0xff]  ;;  %v6003_v47 = vpack.c.bf16 %v505_v40, %v501_v39 }
  0xba   :  { %4024 = vmatpush1.bf16.msra.mxu0 %v4023_v12  ;;  %v514_v45 = vld [vmem:[#allocation9 + $0x68] sm:$0xff]  ;;  %v512_v48 = vld [vmem:[#allocation9 + $0x58] sm:$0xff]  ;;  %v6006_v50 = vpack.c.bf16 %v507_v43, %v503_v42  ;;  %v509_v51 = vld [vmem:[#allocation9 + $0x40] sm:$0xff] }
  0xbb   :  { %4056 = vmatpush1.bf16.msra.mxu1 %v4055_v13  ;;  %4026 = vmatprep.subr.bf16.mxu0 %v4025_v14  ;;  %v516_v49 = vld [vmem:[#allocation9 + $0x78] sm:$0xff]  ;;  %v513_v52 = vld [vmem:[#allocation9 + $0x60] sm:$0xff]  ;;  %v6009_v53 = vpack.c.bf16 %v514_v45, %v510_v44  ;;  %v511_v54 = vld [vmem:[#allocation9 + $0x50] sm:$0xff] }
  0xbc   :  { %4058 = vmatprep.subr.bf16.mxu1 %v4057_v18  ;;  %v515_v55 = vld [vmem:[#allocation9 + $0x70] sm:$0xff]  ;;  %v6011_v56 = vpack.c.bf16 %v516_v49, %v512_v48  ;;  %v518_v57 = vld [vmem:[#allocation9 + $0x88] sm:$0xff]  ;;  %v6014_v60 = vpack.c.bf16 %v513_v52, %v509_v51  ;;  %v520_v61 = vld [vmem:[#allocation9 + $0x98] sm:$0xff] }
  0xbd   :  { %v522_v58 = vld [vmem:[#allocation9 + $0xa8] sm:$0xff]  ;;  %v524_v62 = vld [vmem:[#allocation9 + $0xb8] sm:$0xff]  ;;  %v6018_v63 = vpack.c.bf16 %v515_v55, %v511_v54  ;;  %v517_v1 = vld [vmem:[#allocation9 + $0x80] sm:$0xff] }
  0xbe   :  { %4028 = vmatpush1.bf16.msra.mxu0 %v4027_v24  ;;  %v150_v59 = vld [vmem:[#allocation4 + $0x8] sm:$0xff]  ;;  %v521_v2 = vld [vmem:[#allocation9 + $0xa0] sm:$0xff]  ;;  %v6022_v3 = vpack.c.bf16 %v522_v58, %v518_v57  ;;  %v519_v4 = vld [vmem:[#allocation9 + $0x90] sm:$0xff]  ;;  %v6025_v6 = vpack.c.bf16 %v524_v62, %v520_v61 }
  0xbf   :  { %4060 = vmatpush1.bf16.msra.mxu1 %v4059_v25  ;;  %4030 = vmatprep.subr.bf16.mxu0 %v4029_v26  ;;  %v523_v5 = vld [vmem:[#allocation9 + $0xb0] sm:$0xff]  ;;  %v526_v7 = vld [vmem:[#allocation9 + $0xc8] sm:$0xff]  ;;  %v6028_v10 = vpack.c.bf16 %v521_v2, %v517_v1  ;;  %v528_v11 = vld [vmem:[#allocation9 + $0xd8] sm:$0xff] }
  0xc0   :  { %4062 = vmatprep.subr.bf16.mxu1 %v4061_v30  ;;  %v530_v8 = vld [vmem:[#allocation9 + $0xe8] sm:$0xff]  ;;  %v151_v9 = vld [vmem:[#allocation4 + $0x10] sm:$0xff]  ;;  %v532_v12 = vld [vmem:[#allocation9 + $0xf8] sm:$0xff]  ;;  %v6032_v13 = vpack.c.bf16 %v523_v5, %v519_v4 }
  0xc1   :  { %v525_v14 = vld [vmem:[#allocation9 + $0xc0] sm:$0xff]  ;;  %v6036_v16 = vpack.c.bf16 %v530_v8, %v526_v7  ;;  %v527_v17 = vld [vmem:[#allocation9 + $0xd0] sm:$0xff]  ;;  %v6039_v19 = vpack.c.bf16 %v532_v12, %v528_v11  ;;  %v534_v20 = vld [vmem:[#allocation9 + $0x108] sm:$0xff] }
  0xc2   :  { %4032 = vmatpush1.bf16.msra.mxu0 %v4031_v36  ;;  %v529_v15 = vld [vmem:[#allocation9 + $0xe0] sm:$0xff]  ;;  %v531_v18 = vld [vmem:[#allocation9 + $0xf0] sm:$0xff]  ;;  %v538_v21 = vld [vmem:[#allocation9 + $0x128] sm:$0xff] }
  0xc3   :  { %4064 = vmatpush1.bf16.msra.mxu1 %v4063_v37  ;;  %4066 = vmatprep.subr.bf16.mxu0 %v5999_v38  ;;  %v152_v22 = vld [vmem:[#allocation4 + $0x18] sm:$0xff]  ;;  %v6042_v23 = vpack.c.bf16 %v529_v15, %v525_v14  ;;  %v6046_v26 = vpack.c.bf16 %v531_v18, %v527_v17  ;;  %v533_v27 = vld [vmem:[#allocation9 + $0x100] sm:$0xff]  ;;  %v6050_v29 = vpack.c.bf16 %v538_v21, %v534_v20  ;;  %v535_v30 = vld [vmem:[#allocation9 + $0x110] sm:$0xff] }
  0xc4   :  { %4098 = vmatprep.subr.bf16.mxu1 %v6001_v41  ;;  %v536_v24 = vld [vmem:[#allocation9 + $0x118] sm:$0xff]  ;;  %v537_v28 = vld [vmem:[#allocation9 + $0x120] sm:$0xff]  ;;  %v539_v31 = vld [vmem:[#allocation9 + $0x130] sm:$0xff] }
  0xc5   :  { %308 = vmatmul.mubr.f32.vlgmr.msra.gmra.mrb[0].mxu0 %v149_v46  ;;  %v540_v25 = vld [vmem:[#allocation9 + $0x138] sm:$0xff]  ;;  %v542_v33 = vld [vmem:[#allocation9 + $0x148] sm:$0xff]  ;;  %v153_v35 = vld [vmem:[#allocation4 + $0x20] sm:$0xff]  ;;  %v6056_v36 = vpack.c.bf16 %v537_v28, %v533_v27  ;;  %v6060_v40 = vpack.c.bf16 %v539_v31, %v535_v30  ;;  %v223_v28 = vlaneseq }
  0xc6   :  { %421 = vmatmul.mubr.f32.vlgmr.msra.gmra.mrb[0].mxu1 %v149_v46  ;;  %4068 = vmatpush1.bf16.msra.mxu0 %v6003_v47  ;;  %v6053_v32 = vpack.c.bf16 %v540_v25, %v536_v24  ;;  %v546_v34 = vld [vmem:[#allocation9 + $0x168] sm:$0xff]  ;;  %v544_v37 = vld [vmem:[#allocation9 + $0x158] sm:$0xff]  ;;  %v541_v42 = vld [vmem:[#allocation9 + $0x140] sm:$0xff] }
  0xc7   :  { %4100 = vmatpush1.bf16.msra.mxu1 %v6006_v50  ;;  %313 = vmatprep.mubr.f32.mxu0 %v5823_v0  ;;  %v548_v39 = vld [vmem:[#allocation9 + $0x178] sm:$0xff]  ;;  %v545_v43 = vld [vmem:[#allocation9 + $0x160] sm:$0xff]  ;;  %v6064_v44 = vpack.c.bf16 %v546_v34, %v542_v33  ;;  %v543_v45 = vld [vmem:[#allocation9 + $0x150] sm:$0xff]  ;;  %v6149_v30 = vshrl.u32 %v223_v28, 7 }
  0xc8   :  { %426 = vmatprep.mubr.f32.mxu1 %v5823_v0  ;;  %4070 = vmatprep.subr.bf16.mxu0 %v6009_v53  ;;  %v547_v46 = vld [vmem:[#allocation9 + $0x170] sm:$0xff]  ;;  %v6067_v48 = vpack.c.bf16 %v548_v39, %v544_v37  ;;  %v550_v49 = vld [vmem:[#allocation9 + $0x188] sm:$0xff]  ;;  %v6070_v54 = vpack.c.bf16 %v545_v43, %v541_v42  ;;  %v552_v55 = vld [vmem:[#allocation9 + $0x198] sm:$0xff] }
  0xc9   :  { %314 = vmatmul.mubr.f32.gmra.mrb[2].mxu0 %v150_v59  ;;  %4102 = vmatprep.subr.bf16.mxu1 %v6011_v56  ;;  %v554_v51 = vld [vmem:[#allocation9 + $0x1a8] sm:$0xff]  ;;  %v556_v57 = vld [vmem:[#allocation9 + $0x1b8] sm:$0xff]  ;;  %v6074_v58 = vpack.c.bf16 %v547_v46, %v543_v45  ;;  %v553_v61 = vld [vmem:[#allocation9 + $0x1a0] sm:$0xff]  ;;  %v225_v31 = vsub.s32 0, %v6149_v30  ;;  %v229_v34 = vsub.s32 1, %v6149_v30  ;;  %v237_v42 = vsub.s32 3, %v6149_v30 }
  0xca   :  { %427 = vmatmul.mubr.f32.gmra.mrb[2].mxu1 %v150_v59  ;;  %4072 = vmatpush1.bf16.msra.mxu0 %v6014_v60  ;;  %v154_v52 = vld [vmem:[#allocation4 + $0x28] sm:$0xff]  ;;  %v549_v59 = vld [vmem:[#allocation9 + $0x180] sm:$0xff]  ;;  %v6078_v62 = vpack.c.bf16 %v554_v51, %v550_v49  ;;  %v551_v1 = vld [vmem:[#allocation9 + $0x190] sm:$0xff]  ;;  %v6081_v4 = vpack.c.bf16 %v556_v57, %v552_v55 }
  0xcb   :  { %4104 = vmatpush1.bf16.msra.mxu1 %v6018_v63  ;;  %319 = vmatprep.mubr.f32.mxu0 %v5823_v0  ;;  %v555_v2 = vld [vmem:[#allocation9 + $0x1b0] sm:$0xff]  ;;  %v558_v5 = vld [vmem:[#allocation9 + $0x1c8] sm:$0xff]  ;;  %v560_v11 = vld [vmem:[#allocation9 + $0x1d8] sm:$0xff] }
  0xcc   :  { %432 = vmatprep.mubr.f32.mxu1 %v5823_v0  ;;  %4074 = vmatprep.subr.bf16.mxu0 %v6022_v3  ;;  %v562_v7 = vld [vmem:[#allocation9 + $0x1e8] sm:$0xff]  ;;  %v155_v8 = vld [vmem:[#allocation4 + $0x30] sm:$0xff]  ;;  %v564_v12 = vld [vmem:[#allocation9 + $0x1f8] sm:$0xff]  ;;  %v6088_v14 = vpack.c.bf16 %v555_v2, %v551_v1 }
  0xcd   :  { %320 = vmatmul.mubr.f32.gmra.mrb[4].mxu0 %v151_v9  ;;  %4106 = vmatprep.subr.bf16.mxu1 %v6025_v6  ;;  %v557_v15 = vld [vmem:[#allocation9 + $0x1c0] sm:$0xff]  ;;  %v6092_v18 = vpack.c.bf16 %v562_v7, %v558_v5  ;;  %v559_v20 = vld [vmem:[#allocation9 + $0x1d0] sm:$0xff]  ;;  %v156_v24 = vld [vmem:[#allocation4 + $0x38] sm:$0xff] }
  0xce   :  { %433 = vmatmul.mubr.f32.gmra.mrb[4].mxu1 %v151_v9  ;;  %4076 = vmatpush1.bf16.msra.mxu0 %v6028_v10  ;;  %v6084_v9 = vpack.c.bf16 %v553_v61, %v549_v59  ;;  %v561_v17 = vld [vmem:[#allocation9 + $0x1e0] sm:$0xff]  ;;  %v563_v21 = vld [vmem:[#allocation9 + $0x1f0] sm:$0xff]  ;;  %v233_v59 = vsub.s32 2, %v6149_v30 }
  0xcf   :  { %4108 = vmatpush1.bf16.msra.mxu1 %v6032_v13  ;;  %325 = vmatprep.mubr.f32.mxu0 %v5823_v0  ;;  %v6098_v25 = vpack.c.bf16 %v561_v17, %v557_v15  ;;  %v6102_v27 = vpack.c.bf16 %v563_v21, %v559_v20  ;;  %v221_v33 = vld [vmem:[#allocation10] sm:$0xf] }
  0xd0   :  { %438 = vmatprep.mubr.f32.mxu1 %v5823_v0  ;;  %4078 = vmatprep.subr.bf16.mxu0 %v6036_v16  ;;  %v6159_v37 = vrot.slane %v221_v33, %v229_v34  ;;  %v6166_v57 = vrot.slane %v221_v33, %v237_v42  ;;  %v6172_v1 = vrot.slane %v221_v33, %v233_v59 }
  0xd1   :  { %326 = vmatmul.mubr.f32.gmra.mrb[6].mxu0 %v152_v22  ;;  %4110 = vmatprep.subr.bf16.mxu1 %v6039_v19 }
  0xd2   :  { %439 = vmatmul.mubr.f32.gmra.mrb[6].mxu1 %v152_v22  ;;  %4080 = vmatpush1.bf16.msra.mxu0 %v6042_v23  ;;  %v6095_v22 = vpack.c.bf16 %v564_v12, %v560_v11 }
  0xd3   :  { %4112 = vmatpush1.bf16.msra.mxu1 %v6046_v26  ;;  %331 = vmatprep.mubr.f32.mxu0 %v5823_v0 }
  0xd4   :  { %444 = vmatprep.mubr.f32.mxu1 %v5823_v0  ;;  %4082 = vmatprep.subr.bf16.mxu0 %v6050_v29 }
  0xd5   :  { %332 = vmatmul.mubr.f32.gmra.mrb[8].mxu0 %v153_v35  ;;  %4114 = vmatprep.subr.bf16.mxu1 %v6053_v32 }
  0xd6   :  { %445 = vmatmul.mubr.f32.gmra.mrb[8].mxu1 %v153_v35  ;;  %4084 = vmatpush1.bf16.msra.mxu0 %v6056_v36  ;;  %v6155_v35 = vrot.slane %v221_v33, %v225_v31 }
  0xd7   :  { %4116 = vmatpush1.bf16.msra.mxu1 %v6060_v40  ;;  %337 = vmatprep.mubr.f32.mxu0 %v5823_v0 }
  0xd8   :  { %450 = vmatprep.mubr.f32.mxu1 %v5823_v0  ;;  %4086 = vmatprep.subr.bf16.mxu0 %v6064_v44 }
  0xd9   :  { %338 = vmatmul.mubr.f32.gmra.mrb[10].mxu0 %v154_v52  ;;  %4118 = vmatprep.subr.bf16.mxu1 %v6067_v48 }
  0xda   :  { %451 = vmatmul.mubr.f32.gmra.mrb[10].mxu1 %v154_v52  ;;  %4088 = vmatpush1.bf16.msra.mxu0 %v6070_v54 }
  0xdb   :  { %4120 = vmatpush1.bf16.msra.mxu1 %v6074_v58  ;;  %343 = vmatprep.mubr.f32.mxu0 %v5823_v0 }
  0xdc   :  { %456 = vmatprep.mubr.f32.mxu1 %v5823_v0  ;;  %4090 = vmatprep.subr.bf16.mxu0 %v6078_v62 }
  0xdd   :  { %344 = vmatmul.mubr.f32.gmra.mrb[12].mxu0 %v155_v8  ;;  %4122 = vmatprep.subr.bf16.mxu1 %v6081_v4 }
  0xde   :  { %457 = vmatmul.mubr.f32.gmra.mrb[12].mxu1 %v155_v8  ;;  %4092 = vmatpush1.bf16.msra.mxu0 %v6084_v9 }
  0xdf   :  { %4124 = vmatpush1.bf16.msra.mxu1 %v6088_v14  ;;  %349 = vmatprep.mubr.f32.mxu0 %v5823_v0 }
  0xe0   :  { %462 = vmatprep.mubr.f32.mxu1 %v5823_v0  ;;  %4094 = vmatprep.subr.bf16.mxu0 %v6092_v18 }
  0xe1   :  { %350 = vmatmul.mubr.f32.gmra.mrb[14].mxu0 %v156_v24  ;;  %4126 = vmatprep.subr.bf16.mxu1 %v6095_v22 }
  0xe2   :  { %463 = vmatmul.mubr.f32.gmra.mrb[14].mxu1 %v156_v24  ;;  %4096 = vmatpush1.bf16.msra.mxu0 %v6098_v25 }
  0xe3   :  { %4128 = vmatpush1.bf16.msra.mxu1 %v6102_v27  ;;  %633 = vmatprep.mubr.f32.mxu0 %v5823_v0 }
  0xe4   :  { %704 = vmatprep.mubr.f32.mxu1 %v5823_v0  ;;  %4130 = vmatprep.subr.bf16.mxu0 %v5999_v38 }
  0xe5   :  { %634 = vmatmul.mubr.f32.vlgmr.msra.gmra.mrb[0].mxu0 %v5823_v0  ;;  %4162 = vmatprep.subr.bf16.mxu1 %v6001_v41 }
  0xe6   :  { %705 = vmatmul.mubr.f32.vlgmr.msra.gmra.mrb[0].mxu1 %v5823_v0  ;;  %4132 = vmatpush1.bf16.msra.mxu0 %v6003_v47 }
  0xe7   :  { %4164 = vmatpush1.bf16.msra.mxu1 %v6006_v50  ;;  %4134 = vmatprep.subr.bf16.mxu0 %v6009_v53 }
  0xe8   :  { %4166 = vmatprep.subr.bf16.mxu1 %v6011_v56  ;;  %809 = vmatprep.mubr.f32.mxu0 %v5823_v0 }
  0xe9   :  { %880 = vmatprep.mubr.f32.mxu1 %v5823_v0 }
  0xea   :  { %4136 = vmatpush1.bf16.msra.mxu0 %v6014_v60 }
  0xeb   :  { %4168 = vmatpush1.bf16.msra.mxu1 %v6018_v63  ;;  %4138 = vmatprep.subr.bf16.mxu0 %v6022_v3 }
  0xec   :  { %4170 = vmatprep.subr.bf16.mxu1 %v6025_v6 }
  0xee   :  { %4140 = vmatpush1.bf16.msra.mxu0 %v6028_v10 }
  0xef   :  { %4172 = vmatpush1.bf16.msra.mxu1 %v6032_v13  ;;  %4142 = vmatprep.subr.bf16.mxu0 %v6036_v16 }
  0xf0   :  { %4174 = vmatprep.subr.bf16.mxu1 %v6039_v19 }
  0xf2   :  { %4144 = vmatpush1.bf16.msra.mxu0 %v6042_v23 }
  0xf3   :  { %4176 = vmatpush1.bf16.msra.mxu1 %v6046_v26  ;;  %4146 = vmatprep.subr.bf16.mxu0 %v6050_v29 }
  0xf4   :  { %4178 = vmatprep.subr.bf16.mxu1 %v6053_v32 }
  0xf6   :  { %4148 = vmatpush1.bf16.msra.mxu0 %v6056_v36 }
  0xf7   :  { %4180 = vmatpush1.bf16.msra.mxu1 %v6060_v40  ;;  %4150 = vmatprep.subr.bf16.mxu0 %v6064_v44 }
  0xf8   :  { %4182 = vmatprep.subr.bf16.mxu1 %v6067_v48 }
  0xfa   :  { %4152 = vmatpush1.bf16.msra.mxu0 %v6070_v54 }
  0xfb   :  { %4184 = vmatpush1.bf16.msra.mxu1 %v6074_v58  ;;  %4154 = vmatprep.subr.bf16.mxu0 %v6078_v62 }
  0xfc   :  { %4186 = vmatprep.subr.bf16.mxu1 %v6081_v4 }
  0xfe   :  { %4156 = vmatpush1.bf16.msra.mxu0 %v6084_v9 }
  0xff   :  { %4188 = vmatpush1.bf16.msra.mxu1 %v6088_v14  ;;  %4158 = vmatprep.subr.bf16.mxu0 %v6092_v18 }
 0x100   :  { %4190 = vmatprep.subr.bf16.mxu1 %v6095_v22 }
 0x102   :  { %4160 = vmatpush1.bf16.msra.mxu0 %v6098_v25 }
 0x103   :  { %4192 = vmatpush1.bf16.msra.mxu1 %v6102_v27  ;;  %4194 = vmatprep.subr.bf16.mxu0 %v5999_v38 }
 0x104   :  { %4226 = vmatprep.subr.bf16.mxu1 %v6001_v41 }
 0x1b8   :  { %v635_v39 = vpop.f32.mrb[0].mxu0 }
 0x1b9   :  { %v5177_v43 = vadd.f32 %v635_v39, %v6155_v35  ;;  %v706_v45 = vpop.f32.mrb[0].mxu1  ;;  %v637_v46 = vpop.f32.mrb[1].mxu0 }
 0x1ba   :  { %v5178_v49 = vadd.f32 %v637_v46, %v6159_v37  ;;  %v708_v51 = vpop.f32.mrb[1].mxu1  ;;  %v5193_v5 = vadd.f32 %v706_v45, %v6172_v1 }
 0x1bb   :  { %v3900_v52 = vmul.f32 -1.442695, %v5177_v43  ;;  %v5194_v61 = vadd.f32 %v708_v51, %v6166_v57 }
 0x1bc   :  { %v3901_v55 = vmul.f32 -1.442695, %v5178_v49 }
 0x1bd   :  { %5322 = vpow2.f32 %v3900_v52  ;;  %v3902_v2 = vmul.f32 -1.442695, %v5194_v61 }
 0x1be   :  { %5324 = vpow2.f32 %v3901_v55 }
 0x1bf   :  { %5326 = vpow2.f32 %v3902_v2 }
 0x1c0   :  { %5328 = vtanh.f32 %v5193_v5 }
 0x1c7   :  { %v5323_v7 = vpop.eup %5322 }
 0x1c8   :  { %v5325_v8 = vpop.eup %5324  ;;  %v718_v11 = vadd.f32 1.0, %v5323_v7 }
 0x1c9   :  { %v724_v12 = vadd.f32 1.0, %v5325_v8  ;;  %v5327_v15 = vpop.eup %5326 }
 0x1ca   :  { %5330 = vrcp.f32 %v718_v11  ;;  %v5329_v17 = vpop.eup %5328  ;;  %v731_v28 = vadd.f32 1.0, %v5327_v15 }
 0x1cb   :  { %5332 = vrcp.f32 %v724_v12 }
 0x1cc   :  { %5334 = vrcp.f32 %v731_v28 }
 0x1d4   :  { %v5331_v20 = vpop.eup %5330 }
 0x1d5   :  { %v5333_v21 = vpop.eup %5332  ;;  %v735_v24 = vmul.f32 %v5331_v20, %v5329_v17 }
 0x1d6   :  { %v734_v39 = vmul.f32 0.0, %v5333_v21  ;;  %v5335_v43 = vpop.eup %5334 }
 0x1d8   :  { %v6175_v33 = vadd.f32 %v735_v24, %v734_v39 }
 0x1da   :  { %5336 = vtanh.f32 %v6175_v33 }
 0x1e4   :  { %v5337_v45 = vpop.eup %5336 }
 0x1e5   :  { %v6178_v46 = vmul.f32 %v5337_v45, %v5335_v43 }
 0x1e7   :  { %810 = vmatmul.mubr.f32.vlgmr.msra.gmra.mrb[2].mxu0 %v6178_v46  ;;  %881 = vmatmul.mubr.f32.vlgmr.msra.gmra.mrb[2].mxu1 %v6178_v46 }
 0x1e8   :  { %4196 = vmatpush1.bf16.msra.mxu0 %v6003_v47  ;;  %4228 = vmatpush1.bf16.msra.mxu1 %v6006_v50 }
 0x1e9   :  { %4198 = vmatprep.subr.bf16.mxu0 %v6009_v53  ;;  %4230 = vmatprep.subr.bf16.mxu1 %v6011_v56 }
 0x1ea   :  { %986 = vmatprep.mubr.f32.mxu0 %v5823_v0  ;;  %1057 = vmatprep.mubr.f32.mxu1 %v5823_v0 }
 0x1ec   :  { %4200 = vmatpush1.bf16.msra.mxu0 %v6014_v60  ;;  %4232 = vmatpush1.bf16.msra.mxu1 %v6018_v63 }
 0x1ed   :  { %4202 = vmatprep.subr.bf16.mxu0 %v6022_v3  ;;  %4234 = vmatprep.subr.bf16.mxu1 %v6025_v6 }
 0x1f0   :  { %4204 = vmatpush1.bf16.msra.mxu0 %v6028_v10  ;;  %4236 = vmatpush1.bf16.msra.mxu1 %v6032_v13 }
 0x1f1   :  { %4206 = vmatprep.subr.bf16.mxu0 %v6036_v16  ;;  %4238 = vmatprep.subr.bf16.mxu1 %v6039_v19 }
 0x1f4   :  { %4208 = vmatpush1.bf16.msra.mxu0 %v6042_v23  ;;  %4240 = vmatpush1.bf16.msra.mxu1 %v6046_v26 }
 0x1f5   :  { %4210 = vmatprep.subr.bf16.mxu0 %v6050_v29  ;;  %4242 = vmatprep.subr.bf16.mxu1 %v6053_v32 }
 0x1f8   :  { %4212 = vmatpush1.bf16.msra.mxu0 %v6056_v36  ;;  %4244 = vmatpush1.bf16.msra.mxu1 %v6060_v40 }
 0x1f9   :  { %4214 = vmatprep.subr.bf16.mxu0 %v6064_v44  ;;  %4246 = vmatprep.subr.bf16.mxu1 %v6067_v48 }
 0x1fc   :  { %4216 = vmatpush1.bf16.msra.mxu0 %v6070_v54  ;;  %4248 = vmatpush1.bf16.msra.mxu1 %v6074_v58 }
 0x1fd   :  { %4218 = vmatprep.subr.bf16.mxu0 %v6078_v62  ;;  %4250 = vmatprep.subr.bf16.mxu1 %v6081_v4 }
 0x200   :  { %4220 = vmatpush1.bf16.msra.mxu0 %v6084_v9  ;;  %4252 = vmatpush1.bf16.msra.mxu1 %v6088_v14 }
 0x201   :  { %4222 = vmatprep.subr.bf16.mxu0 %v6092_v18  ;;  %4254 = vmatprep.subr.bf16.mxu1 %v6095_v22 }
 0x204   :  { %4224 = vmatpush1.bf16.msra.mxu0 %v6098_v25  ;;  %4256 = vmatpush1.bf16.msra.mxu1 %v6102_v27 }
 0x205   :  { %4258 = vmatprep.subr.bf16.mxu0 %v5999_v38  ;;  %4290 = vmatprep.subr.bf16.mxu1 %v6001_v41 }
 0x2ba   :  { %v811_v49 = vpop.f32.mrb[2].mxu0  ;;  %v882_v51 = vpop.f32.mrb[2].mxu1 }
 0x2bb   :  { %v5179_v52 = vadd.f32 %v811_v49, %v6155_v35  ;;  %v813_v55 = vpop.f32.mrb[3].mxu0  ;;  %v884_v61 = vpop.f32.mrb[3].mxu1  ;;  %v5195_v12 = vadd.f32 %v882_v51, %v6172_v1 }
 0x2bc   :  { %v5180_v2 = vadd.f32 %v813_v55, %v6159_v37  ;;  %v5196_v8 = vadd.f32 %v884_v61, %v6166_v57 }
 0x2bd   :  { %v3903_v5 = vmul.f32 -1.442695, %v5179_v52 }
 0x2be   :  { %v3904_v7 = vmul.f32 -1.442695, %v5180_v2  ;;  %v3905_v11 = vmul.f32 -1.442695, %v5196_v8 }
 0x2bf   :  { %5338 = vpow2.f32 %v3903_v5 }
 0x2c0   :  { %5340 = vpow2.f32 %v3904_v7 }
 0x2c1   :  { %5342 = vpow2.f32 %v3905_v11 }
 0x2c2   :  { %5344 = vtanh.f32 %v5195_v12 }
 0x2c9   :  { %v5339_v15 = vpop.eup %5338 }
 0x2ca   :  { %v5341_v17 = vpop.eup %5340  ;;  %v894_v20 = vadd.f32 1.0, %v5339_v15 }
 0x2cb   :  { %v900_v21 = vadd.f32 1.0, %v5341_v17  ;;  %v5343_v24 = vpop.eup %5342 }
 0x2cc   :  { %5346 = vrcp.f32 %v894_v20  ;;  %v5345_v28 = vpop.eup %5344  ;;  %v907_v49 = vadd.f32 1.0, %v5343_v24 }
 0x2cd   :  { %5348 = vrcp.f32 %v900_v21 }
 0x2ce   :  { %5350 = vrcp.f32 %v907_v49 }
 0x2d6   :  { %v5347_v39 = vpop.eup %5346 }
 0x2d7   :  { %v5349_v43 = vpop.eup %5348  ;;  %v911_v45 = vmul.f32 %v5347_v39, %v5345_v28 }
 0x2d8   :  { %v910_v52 = vmul.f32 %v5349_v43, %v6175_v33  ;;  %v5351_v51 = vpop.eup %5350 }
 0x2da   :  { %v6221_v55 = vadd.f32 %v911_v45, %v910_v52 }
 0x2dc   :  { %5352 = vtanh.f32 %v6221_v55 }
 0x2e6   :  { %v5353_v61 = vpop.eup %5352 }
 0x2e7   :  { %v6224_v2 = vmul.f32 %v5353_v61, %v5351_v51 }
 0x2e9   :  { %987 = vmatmul.mubr.f32.vlgmr.msra.gmra.mrb[4].mxu0 %v6224_v2  ;;  %1058 = vmatmul.mubr.f32.vlgmr.msra.gmra.mrb[4].mxu1 %v6224_v2 }
 0x2ea   :  { %4260 = vmatpush1.bf16.msra.mxu0 %v6003_v47  ;;  %4292 = vmatpush1.bf16.msra.mxu1 %v6006_v50 }
 0x2eb   :  { %4262 = vmatprep.subr.bf16.mxu0 %v6009_v53  ;;  %4294 = vmatprep.subr.bf16.mxu1 %v6011_v56 }
 0x2ec   :  { %1163 = vmatprep.mubr.f32.mxu0 %v5823_v0  ;;  %1234 = vmatprep.mubr.f32.mxu1 %v5823_v0 }
 0x2ee   :  { %4264 = vmatpush1.bf16.msra.mxu0 %v6014_v60  ;;  %4296 = vmatpush1.bf16.msra.mxu1 %v6018_v63 }
 0x2ef   :  { %4266 = vmatprep.subr.bf16.mxu0 %v6022_v3  ;;  %4298 = vmatprep.subr.bf16.mxu1 %v6025_v6 }
 0x2f2   :  { %4268 = vmatpush1.bf16.msra.mxu0 %v6028_v10  ;;  %4300 = vmatpush1.bf16.msra.mxu1 %v6032_v13 }
 0x2f3   :  { %4270 = vmatprep.subr.bf16.mxu0 %v6036_v16  ;;  %4302 = vmatprep.subr.bf16.mxu1 %v6039_v19 }
 0x2f6   :  { %4272 = vmatpush1.bf16.msra.mxu0 %v6042_v23  ;;  %4304 = vmatpush1.bf16.msra.mxu1 %v6046_v26 }
 0x2f7   :  { %4274 = vmatprep.subr.bf16.mxu0 %v6050_v29  ;;  %4306 = vmatprep.subr.bf16.mxu1 %v6053_v32 }
 0x2fa   :  { %4276 = vmatpush1.bf16.msra.mxu0 %v6056_v36  ;;  %4308 = vmatpush1.bf16.msra.mxu1 %v6060_v40 }
 0x2fb   :  { %4278 = vmatprep.subr.bf16.mxu0 %v6064_v44  ;;  %4310 = vmatprep.subr.bf16.mxu1 %v6067_v48 }
 0x2fe   :  { %4280 = vmatpush1.bf16.msra.mxu0 %v6070_v54  ;;  %4312 = vmatpush1.bf16.msra.mxu1 %v6074_v58 }
 0x2ff   :  { %4282 = vmatprep.subr.bf16.mxu0 %v6078_v62  ;;  %4314 = vmatprep.subr.bf16.mxu1 %v6081_v4 }
 0x302   :  { %4284 = vmatpush1.bf16.msra.mxu0 %v6084_v9  ;;  %4316 = vmatpush1.bf16.msra.mxu1 %v6088_v14 }
 0x303   :  { %4286 = vmatprep.subr.bf16.mxu0 %v6092_v18  ;;  %4318 = vmatprep.subr.bf16.mxu1 %v6095_v22 }
 0x306   :  { %4288 = vmatpush1.bf16.msra.mxu0 %v6098_v25  ;;  %4320 = vmatpush1.bf16.msra.mxu1 %v6102_v27 }
 0x307   :  { %4322 = vmatprep.subr.bf16.mxu0 %v5999_v38  ;;  %4354 = vmatprep.subr.bf16.mxu1 %v6001_v41 }
 0x3bc   :  { %v988_v33 = vpop.f32.mrb[4].mxu0  ;;  %v1059_v5 = vpop.f32.mrb[4].mxu1 }
 0x3bd   :  { %v5181_v7 = vadd.f32 %v988_v33, %v6155_v35  ;;  %v990_v8 = vpop.f32.mrb[5].mxu0  ;;  %v1061_v11 = vpop.f32.mrb[5].mxu1  ;;  %v5197_v24 = vadd.f32 %v1059_v5, %v6172_v1 }
 0x3be   :  { %v5182_v12 = vadd.f32 %v990_v8, %v6159_v37  ;;  %v5198_v20 = vadd.f32 %v1061_v11, %v6166_v57 }
 0x3bf   :  { %v3906_v15 = vmul.f32 -1.442695, %v5181_v7 }
 0x3c0   :  { %v3907_v17 = vmul.f32 -1.442695, %v5182_v12  ;;  %v3908_v21 = vmul.f32 -1.442695, %v5198_v20 }
 0x3c1   :  { %5354 = vpow2.f32 %v3906_v15 }
 0x3c2   :  { %5356 = vpow2.f32 %v3907_v17 }
 0x3c3   :  { %5358 = vpow2.f32 %v3908_v21 }
 0x3c4   :  { %5360 = vtanh.f32 %v5197_v24 }
 0x3cb   :  { %v5355_v28 = vpop.eup %5354 }
 0x3cc   :  { %v5357_v39 = vpop.eup %5356  ;;  %v1071_v43 = vadd.f32 1.0, %v5355_v28 }
 0x3cd   :  { %v1077_v45 = vadd.f32 1.0, %v5357_v39  ;;  %v5359_v49 = vpop.eup %5358 }
 0x3ce   :  { %5362 = vrcp.f32 %v1071_v43  ;;  %v5361_v52 = vpop.eup %5360  ;;  %v1084_v7 = vadd.f32 1.0, %v5359_v49 }
 0x3cf   :  { %5364 = vrcp.f32 %v1077_v45 }
 0x3d0   :  { %5366 = vrcp.f32 %v1084_v7 }
 0x3d8   :  { %v5363_v51 = vpop.eup %5362 }
 0x3d9   :  { %v5365_v61 = vpop.eup %5364  ;;  %v1088_v33 = vmul.f32 %v5363_v51, %v5361_v52 }
 0x3da   :  { %v1087_v8 = vmul.f32 %v5365_v61, %v6221_v55  ;;  %v5367_v5 = vpop.eup %5366 }
 0x3dc   :  { %v6267_v11 = vadd.f32 %v1088_v33, %v1087_v8 }
 0x3de   :  { %5368 = vtanh.f32 %v6267_v11 }
 0x3e8   :  { %v5369_v12 = vpop.eup %5368 }
 0x3e9   :  { %v6270_v15 = vmul.f32 %v5369_v12, %v5367_v5 }
 0x3eb   :  { %1164 = vmatmul.mubr.f32.vlgmr.msra.gmra.mrb[6].mxu0 %v6270_v15  ;;  %1235 = vmatmul.mubr.f32.vlgmr.msra.gmra.mrb[6].mxu1 %v6270_v15 }
 0x3ec   :  { %4324 = vmatpush1.bf16.msra.mxu0 %v6003_v47  ;;  %4356 = vmatpush1.bf16.msra.mxu1 %v6006_v50 }
 0x3ed   :  { %4326 = vmatprep.subr.bf16.mxu0 %v6009_v53  ;;  %4358 = vmatprep.subr.bf16.mxu1 %v6011_v56 }
 0x3ee   :  { %1340 = vmatprep.mubr.f32.mxu0 %v5823_v0  ;;  %1411 = vmatprep.mubr.f32.mxu1 %v5823_v0 }
 0x3f0   :  { %4328 = vmatpush1.bf16.msra.mxu0 %v6014_v60  ;;  %4360 = vmatpush1.bf16.msra.mxu1 %v6018_v63 }
 0x3f1   :  { %4330 = vmatprep.subr.bf16.mxu0 %v6022_v3  ;;  %4362 = vmatprep.subr.bf16.mxu1 %v6025_v6 }
 0x3f4   :  { %4332 = vmatpush1.bf16.msra.mxu0 %v6028_v10  ;;  %4364 = vmatpush1.bf16.msra.mxu1 %v6032_v13 }
 0x3f5   :  { %4334 = vmatprep.subr.bf16.mxu0 %v6036_v16  ;;  %4366 = vmatprep.subr.bf16.mxu1 %v6039_v19 }
 0x3f8   :  { %4336 = vmatpush1.bf16.msra.mxu0 %v6042_v23  ;;  %4368 = vmatpush1.bf16.msra.mxu1 %v6046_v26 }
 0x3f9   :  { %4338 = vmatprep.subr.bf16.mxu0 %v6050_v29  ;;  %4370 = vmatprep.subr.bf16.mxu1 %v6053_v32 }
 0x3fc   :  { %4340 = vmatpush1.bf16.msra.mxu0 %v6056_v36  ;;  %4372 = vmatpush1.bf16.msra.mxu1 %v6060_v40 }
 0x3fd   :  { %4342 = vmatprep.subr.bf16.mxu0 %v6064_v44  ;;  %4374 = vmatprep.subr.bf16.mxu1 %v6067_v48 }
 0x400   :  { %4344 = vmatpush1.bf16.msra.mxu0 %v6070_v54  ;;  %4376 = vmatpush1.bf16.msra.mxu1 %v6074_v58 }
 0x401   :  { %4346 = vmatprep.subr.bf16.mxu0 %v6078_v62  ;;  %4378 = vmatprep.subr.bf16.mxu1 %v6081_v4 }
 0x404   :  { %4348 = vmatpush1.bf16.msra.mxu0 %v6084_v9  ;;  %4380 = vmatpush1.bf16.msra.mxu1 %v6088_v14 }
 0x405   :  { %4350 = vmatprep.subr.bf16.mxu0 %v6092_v18  ;;  %4382 = vmatprep.subr.bf16.mxu1 %v6095_v22 }
 0x408   :  { %4352 = vmatpush1.bf16.msra.mxu0 %v6098_v25  ;;  %4384 = vmatpush1.bf16.msra.mxu1 %v6102_v27 }
 0x409   :  { %4386 = vmatprep.subr.bf16.mxu0 %v5999_v38  ;;  %4418 = vmatprep.subr.bf16.mxu1 %v6001_v41 }
 0x4be   :  { %v1165_v55 = vpop.f32.mrb[6].mxu0  ;;  %v1236_v17 = vpop.f32.mrb[6].mxu1 }
 0x4bf   :  { %v5183_v20 = vadd.f32 %v1165_v55, %v6155_v35  ;;  %v1167_v21 = vpop.f32.mrb[7].mxu0  ;;  %v1238_v24 = vpop.f32.mrb[7].mxu1  ;;  %v5199_v52 = vadd.f32 %v1236_v17, %v6172_v1 }
 0x4c0   :  { %v5184_v28 = vadd.f32 %v1167_v21, %v6159_v37  ;;  %v5200_v45 = vadd.f32 %v1238_v24, %v6166_v57 }
 0x4c1   :  { %v3909_v39 = vmul.f32 -1.442695, %v5183_v20 }
 0x4c2   :  { %v3910_v43 = vmul.f32 -1.442695, %v5184_v28  ;;  %v3911_v49 = vmul.f32 -1.442695, %v5200_v45 }
 0x4c3   :  { %5370 = vpow2.f32 %v3909_v39 }
 0x4c4   :  { %5372 = vpow2.f32 %v3910_v43 }
 0x4c5   :  { %5374 = vpow2.f32 %v3911_v49 }
 0x4c6   :  { %5376 = vtanh.f32 %v5199_v52 }
 0x4cd   :  { %v5371_v51 = vpop.eup %5370 }
 0x4ce   :  { %v5373_v61 = vpop.eup %5372  ;;  %v1248_v33 = vadd.f32 1.0, %v5371_v51 }
 0x4cf   :  { %v1254_v7 = vadd.f32 1.0, %v5373_v61  ;;  %v5375_v8 = vpop.eup %5374 }
 0x4d0   :  { %5378 = vrcp.f32 %v1248_v33  ;;  %v5377_v5 = vpop.eup %5376  ;;  %v1261_v21 = vadd.f32 1.0, %v5375_v8 }
 0x4d1   :  { %5380 = vrcp.f32 %v1254_v7 }
 0x4d2   :  { %5382 = vrcp.f32 %v1261_v21 }
 0x4da   :  { %v5379_v12 = vpop.eup %5378 }
 0x4db   :  { %v5381_v55 = vpop.eup %5380  ;;  %v1265_v20 = vmul.f32 %v5379_v12, %v5377_v5 }
 0x4dc   :  { %v1264_v28 = vmul.f32 %v5381_v55, %v6267_v11  ;;  %v5383_v17 = vpop.eup %5382 }
 0x4de   :  { %v6313_v24 = vadd.f32 %v1265_v20, %v1264_v28 }
 0x4e0   :  { %5384 = vtanh.f32 %v6313_v24 }
 0x4ea   :  { %v5385_v39 = vpop.eup %5384 }
 0x4eb   :  { %v6316_v43 = vmul.f32 %v5385_v39, %v5383_v17 }
 0x4ed   :  { %1341 = vmatmul.mubr.f32.vlgmr.msra.gmra.mrb[8].mxu0 %v6316_v43  ;;  %1412 = vmatmul.mubr.f32.vlgmr.msra.gmra.mrb[8].mxu1 %v6316_v43 }
 0x4ee   :  { %4388 = vmatpush1.bf16.msra.mxu0 %v6003_v47  ;;  %4420 = vmatpush1.bf16.msra.mxu1 %v6006_v50 }
 0x4ef   :  { %4390 = vmatprep.subr.bf16.mxu0 %v6009_v53  ;;  %4422 = vmatprep.subr.bf16.mxu1 %v6011_v56 }
 0x4f0   :  { %1517 = vmatprep.mubr.f32.mxu0 %v5823_v0  ;;  %1588 = vmatprep.mubr.f32.mxu1 %v5823_v0 }
 0x4f2   :  { %4392 = vmatpush1.bf16.msra.mxu0 %v6014_v60  ;;  %4424 = vmatpush1.bf16.msra.mxu1 %v6018_v63 }
 0x4f3   :  { %4394 = vmatprep.subr.bf16.mxu0 %v6022_v3  ;;  %4426 = vmatprep.subr.bf16.mxu1 %v6025_v6 }
 0x4f6   :  { %4396 = vmatpush1.bf16.msra.mxu0 %v6028_v10  ;;  %4428 = vmatpush1.bf16.msra.mxu1 %v6032_v13 }
 0x4f7   :  { %4398 = vmatprep.subr.bf16.mxu0 %v6036_v16  ;;  %4430 = vmatprep.subr.bf16.mxu1 %v6039_v19 }
 0x4fa   :  { %4400 = vmatpush1.bf16.msra.mxu0 %v6042_v23  ;;  %4432 = vmatpush1.bf16.msra.mxu1 %v6046_v26 }
 0x4fb   :  { %4402 = vmatprep.subr.bf16.mxu0 %v6050_v29  ;;  %4434 = vmatprep.subr.bf16.mxu1 %v6053_v32 }
 0x4fe   :  { %4404 = vmatpush1.bf16.msra.mxu0 %v6056_v36  ;;  %4436 = vmatpush1.bf16.msra.mxu1 %v6060_v40 }
 0x4ff   :  { %4406 = vmatprep.subr.bf16.mxu0 %v6064_v44  ;;  %4438 = vmatprep.subr.bf16.mxu1 %v6067_v48 }
 0x502   :  { %4408 = vmatpush1.bf16.msra.mxu0 %v6070_v54  ;;  %4440 = vmatpush1.bf16.msra.mxu1 %v6074_v58 }
 0x503   :  { %4410 = vmatprep.subr.bf16.mxu0 %v6078_v62  ;;  %4442 = vmatprep.subr.bf16.mxu1 %v6081_v4 }
 0x506   :  { %4412 = vmatpush1.bf16.msra.mxu0 %v6084_v9  ;;  %4444 = vmatpush1.bf16.msra.mxu1 %v6088_v14 }
 0x507   :  { %4414 = vmatprep.subr.bf16.mxu0 %v6092_v18  ;;  %4446 = vmatprep.subr.bf16.mxu1 %v6095_v22 }
 0x50a   :  { %4416 = vmatpush1.bf16.msra.mxu0 %v6098_v25  ;;  %4448 = vmatpush1.bf16.msra.mxu1 %v6102_v27 }
 0x50b   :  { %4450 = vmatprep.subr.bf16.mxu0 %v5999_v38  ;;  %4482 = vmatprep.subr.bf16.mxu1 %v6001_v41 }
 0x5c0   :  { %v1342_v11 = vpop.f32.mrb[8].mxu0  ;;  %v1413_v45 = vpop.f32.mrb[8].mxu1 }
 0x5c1   :  { %v5185_v49 = vadd.f32 %v1342_v11, %v6155_v35  ;;  %v1344_v52 = vpop.f32.mrb[9].mxu0  ;;  %v1415_v51 = vpop.f32.mrb[9].mxu1  ;;  %v5201_v12 = vadd.f32 %v1413_v45, %v6172_v1 }
 0x5c2   :  { %v5186_v61 = vadd.f32 %v1344_v52, %v6159_v37  ;;  %v5202_v8 = vadd.f32 %v1415_v51, %v6166_v57 }
 0x5c3   :  { %v3912_v33 = vmul.f32 -1.442695, %v5185_v49 }
 0x5c4   :  { %v3913_v7 = vmul.f32 -1.442695, %v5186_v61  ;;  %v3914_v5 = vmul.f32 -1.442695, %v5202_v8 }
 0x5c5   :  { %5386 = vpow2.f32 %v3912_v33 }
 0x5c6   :  { %5388 = vpow2.f32 %v3913_v7 }
 0x5c7   :  { %5390 = vpow2.f32 %v3914_v5 }
 0x5c8   :  { %5392 = vtanh.f32 %v5201_v12 }
 0x5cf   :  { %v5387_v55 = vpop.eup %5386 }
 0x5d0   :  { %v5389_v20 = vpop.eup %5388  ;;  %v1425_v21 = vadd.f32 1.0, %v5387_v55 }
 0x5d1   :  { %v1431_v28 = vadd.f32 1.0, %v5389_v20  ;;  %v5391_v17 = vpop.eup %5390 }
 0x5d2   :  { %5394 = vrcp.f32 %v1425_v21  ;;  %v5393_v39 = vpop.eup %5392  ;;  %v1438_v61 = vadd.f32 1.0, %v5391_v17 }
 0x5d3   :  { %5396 = vrcp.f32 %v1431_v28 }
 0x5d4   :  { %5398 = vrcp.f32 %v1438_v61 }
 0x5dc   :  { %v5395_v11 = vpop.eup %5394 }
 0x5dd   :  { %v5397_v49 = vpop.eup %5396  ;;  %v1442_v52 = vmul.f32 %v5395_v11, %v5393_v39 }
 0x5de   :  { %v1441_v33 = vmul.f32 %v5397_v49, %v6313_v24  ;;  %v5399_v45 = vpop.eup %5398 }
 0x5e0   :  { %v6359_v51 = vadd.f32 %v1442_v52, %v1441_v33 }
 0x5e2   :  { %5400 = vtanh.f32 %v6359_v51 }
 0x5ec   :  { %v5401_v7 = vpop.eup %5400 }
 0x5ed   :  { %v6362_v8 = vmul.f32 %v5401_v7, %v5399_v45 }
 0x5ef   :  { %1518 = vmatmul.mubr.f32.vlgmr.msra.gmra.mrb[10].mxu0 %v6362_v8  ;;  %1589 = vmatmul.mubr.f32.vlgmr.msra.gmra.mrb[10].mxu1 %v6362_v8 }
 0x5f0   :  { %4452 = vmatpush1.bf16.msra.mxu0 %v6003_v47  ;;  %4484 = vmatpush1.bf16.msra.mxu1 %v6006_v50 }
 0x5f1   :  { %4454 = vmatprep.subr.bf16.mxu0 %v6009_v53  ;;  %4486 = vmatprep.subr.bf16.mxu1 %v6011_v56 }
 0x5f2   :  { %1694 = vmatprep.mubr.f32.mxu0 %v5823_v0  ;;  %1765 = vmatprep.mubr.f32.mxu1 %v5823_v0 }
 0x5f4   :  { %4456 = vmatpush1.bf16.msra.mxu0 %v6014_v60  ;;  %4488 = vmatpush1.bf16.msra.mxu1 %v6018_v63 }
 0x5f5   :  { %4458 = vmatprep.subr.bf16.mxu0 %v6022_v3  ;;  %4490 = vmatprep.subr.bf16.mxu1 %v6025_v6 }
 0x5f8   :  { %4460 = vmatpush1.bf16.msra.mxu0 %v6028_v10  ;;  %4492 = vmatpush1.bf16.msra.mxu1 %v6032_v13 }
 0x5f9   :  { %4462 = vmatprep.subr.bf16.mxu0 %v6036_v16  ;;  %4494 = vmatprep.subr.bf16.mxu1 %v6039_v19 }
 0x5fc   :  { %4464 = vmatpush1.bf16.msra.mxu0 %v6042_v23  ;;  %4496 = vmatpush1.bf16.msra.mxu1 %v6046_v26 }
 0x5fd   :  { %4466 = vmatprep.subr.bf16.mxu0 %v6050_v29  ;;  %4498 = vmatprep.subr.bf16.mxu1 %v6053_v32 }
 0x600   :  { %4468 = vmatpush1.bf16.msra.mxu0 %v6056_v36  ;;  %4500 = vmatpush1.bf16.msra.mxu1 %v6060_v40 }
 0x601   :  { %4470 = vmatprep.subr.bf16.mxu0 %v6064_v44  ;;  %4502 = vmatprep.subr.bf16.mxu1 %v6067_v48 }
 0x604   :  { %4472 = vmatpush1.bf16.msra.mxu0 %v6070_v54  ;;  %4504 = vmatpush1.bf16.msra.mxu1 %v6074_v58 }
 0x605   :  { %4474 = vmatprep.subr.bf16.mxu0 %v6078_v62  ;;  %4506 = vmatprep.subr.bf16.mxu1 %v6081_v4 }
 0x608   :  { %4476 = vmatpush1.bf16.msra.mxu0 %v6084_v9  ;;  %4508 = vmatpush1.bf16.msra.mxu1 %v6088_v14 }
 0x609   :  { %4478 = vmatprep.subr.bf16.mxu0 %v6092_v18  ;;  %4510 = vmatprep.subr.bf16.mxu1 %v6095_v22 }
 0x60c   :  { %4480 = vmatpush1.bf16.msra.mxu0 %v6098_v25  ;;  %4512 = vmatpush1.bf16.msra.mxu1 %v6102_v27 }
 0x60d   :  { %4514 = vmatprep.subr.bf16.mxu0 %v5999_v38  ;;  %4546 = vmatprep.subr.bf16.mxu1 %v6001_v41 }
 0x6c2   :  { %v1519_v24 = vpop.f32.mrb[10].mxu0  ;;  %v1590_v5 = vpop.f32.mrb[10].mxu1 }
 0x6c3   :  { %v5187_v12 = vadd.f32 %v1519_v24, %v6155_v35  ;;  %v1521_v55 = vpop.f32.mrb[11].mxu0  ;;  %v1592_v20 = vpop.f32.mrb[11].mxu1  ;;  %v5203_v49 = vadd.f32 %v1590_v5, %v6172_v1 }
 0x6c4   :  { %v5188_v21 = vadd.f32 %v1521_v55, %v6159_v37  ;;  %v5204_v39 = vadd.f32 %v1592_v20, %v6166_v57 }
 0x6c5   :  { %v3915_v28 = vmul.f32 -1.442695, %v5187_v12 }
 0x6c6   :  { %v3916_v17 = vmul.f32 -1.442695, %v5188_v21  ;;  %v3917_v11 = vmul.f32 -1.442695, %v5204_v39  ;;  %v1989_v39 = vld [vmem:[#allocation12 + $0x10] sm:$0xff] }
 0x6c7   :  { %5402 = vpow2.f32 %v3915_v28 }
 0x6c8   :  { %5404 = vpow2.f32 %v3916_v17 }
 0x6c9   :  { %5406 = vpow2.f32 %v3917_v11  ;;  %v1993_v11 = vld [vmem:[#allocation12 + $0x30] sm:$0xff] }
 0x6ca   :  { %5408 = vtanh.f32 %v5203_v49  ;;  %v1996_v49 = vld [vmem:[#allocation12 + $0x48] sm:$0xff] }
 0x6d1   :  { %v5403_v38 = vpop.eup %5402 }
 0x6d2   :  { %v5405_v52 = vpop.eup %5404  ;;  %v1602_v41 = vadd.f32 1.0, %v5403_v38  ;;  %v2000_v38 = vld [vmem:[#allocation12 + $0x68] sm:$0xff] }
 0x6d3   :  { %v1608_v61 = vadd.f32 1.0, %v5405_v52  ;;  %v5407_v33 = vpop.eup %5406  ;;  %v1998_v52 = vld [vmem:[#allocation12 + $0x58] sm:$0xff] }
 0x6d4   :  { %5410 = vrcp.f32 %v1602_v41  ;;  %v5409_v45 = vpop.eup %5408  ;;  %v1615_v55 = vadd.f32 1.0, %v5407_v33  ;;  %v2002_v41 = vld [vmem:[#allocation12 + $0x78] sm:$0xff] }
 0x6d5   :  { %5412 = vrcp.f32 %v1608_v61 }
 0x6d6   :  { %5414 = vrcp.f32 %v1615_v55 }
 0x6de   :  { %v5411_v7 = vpop.eup %5410 }
 0x6df   :  { %v5413_v24 = vpop.eup %5412  ;;  %v1619_v12 = vmul.f32 %v5411_v7, %v5409_v45  ;;  %v4611_v7 = vpack.c.bf16 %v1993_v11, %v1989_v39  ;;  %v2019_v39 = vld [vmem:[#allocation12 + $0x100] sm:$0xff] }
 0x6e0   :  { %v1618_v21 = vmul.f32 %v5413_v24, %v6359_v51  ;;  %v5415_v5 = vpop.eup %5414  ;;  %v1991_v51 = vld [vmem:[#allocation12 + $0x20] sm:$0xff] }
 0x6e1   :  { %v1995_v24 = vld [vmem:[#allocation12 + $0x40] sm:$0xff] }
 0x6e2   :  { %v6405_v20 = vadd.f32 %v1619_v12, %v1618_v21  ;;  %v1999_v12 = vld [vmem:[#allocation12 + $0x60] sm:$0xff]  ;;  %v4581_v21 = vpack.c.bf16 %v2000_v38, %v1996_v49 }
 0x6e3   :  { %v2023_v11 = vld [vmem:[#allocation12 + $0x120] sm:$0xff] }
 0x6e4   :  { %5416 = vtanh.f32 %v6405_v20 }
 0x6ee   :  { %v5417_v28 = vpop.eup %5416 }
 0x6ef   :  { %v6408_v17 = vmul.f32 %v5417_v28, %v5415_v5  ;;  %v1997_v5 = vld [vmem:[#allocation12 + $0x50] sm:$0xff] }
 0x6f0   :  { %v2001_v28 = vld [vmem:[#allocation12 + $0x70] sm:$0xff] }
 0x6f1   :  { %1695 = vmatmul.mubr.f32.vlgmr.msra.gmra.mrb[12].mxu0 %v6408_v17  ;;  %1766 = vmatmul.mubr.f32.vlgmr.msra.gmra.mrb[12].mxu1 %v6408_v17 }
 0x6f2   :  { %4516 = vmatpush1.bf16.msra.mxu0 %v6003_v47  ;;  %4548 = vmatpush1.bf16.msra.mxu1 %v6006_v50  ;;  %v1988_v47 = vld [vmem:[#allocation12 + $0x8] sm:$0xff] }
 0x6f3   :  { %4518 = vmatprep.subr.bf16.mxu0 %v6009_v53  ;;  %4550 = vmatprep.subr.bf16.mxu1 %v6011_v56  ;;  %v1992_v50 = vld [vmem:[#allocation12 + $0x28] sm:$0xff]  ;;  %v1990_v53 = vld [vmem:[#allocation12 + $0x18] sm:$0xff] }
 0x6f4   :  { %1871 = vmatprep.mubr.f32.mxu0 %v5823_v0  ;;  %1942 = vmatprep.mubr.f32.mxu1 %v5823_v0  ;;  %v4577_v56 = vpack.c.bf16 %v1992_v50, %v1988_v47  ;;  %v2004_v47 = vld [vmem:[#allocation12 + $0x88] sm:$0xff] }
 0x6f5   :  { %v2008_v50 = vld [vmem:[#allocation12 + $0xa8] sm:$0xff] }
 0x6f6   :  { %4520 = vmatpush1.bf16.msra.mxu0 %v6014_v60  ;;  %4552 = vmatpush1.bf16.msra.mxu1 %v6018_v63  ;;  %v1994_v60 = vld [vmem:[#allocation12 + $0x38] sm:$0xff] }
 0x6f7   :  { %4522 = vmatprep.subr.bf16.mxu0 %v6022_v3  ;;  %4554 = vmatprep.subr.bf16.mxu1 %v6025_v6  ;;  %v4609_v63 = vpack.c.bf16 %v1994_v60, %v1990_v53  ;;  %v2006_v53 = vld [vmem:[#allocation12 + $0x98] sm:$0xff]  ;;  %v4583_v60 = vpack.c.bf16 %v1999_v12, %v1995_v24  ;;  %v4595_v24 = vpack.c.bf16 %v2023_v11, %v2019_v39  ;;  %v2333_v11 = vld [vmem:[#allocation13 + $0x10] sm:$0xff] }
 0x6fa   :  { %4524 = vmatpush1.bf16.msra.mxu0 %v6028_v10  ;;  %4556 = vmatpush1.bf16.msra.mxu1 %v6032_v13 }
 0x6fb   :  { %4526 = vmatprep.subr.bf16.mxu0 %v6036_v16  ;;  %4558 = vmatprep.subr.bf16.mxu1 %v6039_v19 }
 0x6fe   :  { %4528 = vmatpush1.bf16.msra.mxu0 %v6042_v23  ;;  %4560 = vmatpush1.bf16.msra.mxu1 %v6046_v26 }
 0x6ff   :  { %4530 = vmatprep.subr.bf16.mxu0 %v6050_v29  ;;  %4562 = vmatprep.subr.bf16.mxu1 %v6053_v32 }
 0x702   :  { %4532 = vmatpush1.bf16.msra.mxu0 %v6056_v36  ;;  %4564 = vmatpush1.bf16.msra.mxu1 %v6060_v40 }
 0x703   :  { %4534 = vmatprep.subr.bf16.mxu0 %v6064_v44  ;;  %4566 = vmatprep.subr.bf16.mxu1 %v6067_v48 }
 0x706   :  { %4536 = vmatpush1.bf16.msra.mxu0 %v6070_v54  ;;  %4568 = vmatpush1.bf16.msra.mxu1 %v6074_v58 }
 0x707   :  { %4538 = vmatprep.subr.bf16.mxu0 %v6078_v62  ;;  %4570 = vmatprep.subr.bf16.mxu1 %v6081_v4 }
 0x70a   :  { %4540 = vmatpush1.bf16.msra.mxu0 %v6084_v9  ;;  %4572 = vmatpush1.bf16.msra.mxu1 %v6088_v14 }
 0x70b   :  { %4542 = vmatprep.subr.bf16.mxu0 %v6092_v18  ;;  %4574 = vmatprep.subr.bf16.mxu1 %v6095_v22 }
 0x70e   :  { %4544 = vmatpush1.bf16.msra.mxu0 %v6098_v25  ;;  %4576 = vmatpush1.bf16.msra.mxu1 %v6102_v27  ;;  %v1987_v27 = vld [vmem:[#allocation12] sm:$0xff] }
 0x70f   :  { %4578 = vmatprep.subr.bf16.mxu0 %v4577_v56  ;;  %4610 = vmatprep.subr.bf16.mxu1 %v4609_v63  ;;  %v4579_v45 = vpack.c.bf16 %v1991_v51, %v1987_v27  ;;  %v2010_v56 = vld [vmem:[#allocation12 + $0xb8] sm:$0xff]  ;;  %v4615_v63 = vpack.c.bf16 %v2001_v28, %v1997_v5 }
 0x7c4   :  { %v1696_v3 = vpop.f32.mrb[12].mxu0  ;;  %v1767_v6 = vpop.f32.mrb[12].mxu1 }
 0x7c5   :  { %v5189_v10 = vadd.f32 %v1696_v3, %v6155_v35  ;;  %v1698_v13 = vpop.f32.mrb[13].mxu0  ;;  %v1769_v16 = vpop.f32.mrb[13].mxu1  ;;  %v5205_v36 = vadd.f32 %v1767_v6, %v6172_v1  ;;  %v2003_v3 = vld [vmem:[#allocation12 + $0x80] sm:$0xff] }
 0x7c6   :  { %v5190_v19 = vadd.f32 %v1698_v13, %v6159_v37  ;;  %v5206_v29 = vadd.f32 %v1769_v16, %v6166_v57  ;;  %v2007_v6 = vld [vmem:[#allocation12 + $0xa0] sm:$0xff]  ;;  %v4617_v13 = vpack.c.bf16 %v2010_v56, %v2006_v53  ;;  %v2005_v16 = vld [vmem:[#allocation12 + $0x90] sm:$0xff]  ;;  %v2036_v53 = vld [vmem:[#allocation12 + $0x188] sm:$0xff] }
 0x7c7   :  { %v3918_v23 = vmul.f32 -1.442695, %v5189_v10  ;;  %v4585_v10 = vpack.c.bf16 %v2008_v50, %v2004_v47  ;;  %v2029_v47 = vld [vmem:[#allocation12 + $0x150] sm:$0xff]  ;;  %v2040_v56 = vld [vmem:[#allocation12 + $0x1a8] sm:$0xff] }
 0x7c8   :  { %v3919_v26 = vmul.f32 -1.442695, %v5190_v19  ;;  %v3920_v32 = vmul.f32 -1.442695, %v5206_v29  ;;  %v2009_v19 = vld [vmem:[#allocation12 + $0xb0] sm:$0xff]  ;;  %v2014_v29 = vld [vmem:[#allocation12 + $0xd8] sm:$0xff] }
 0x7c9   :  { %5418 = vpow2.f32 %v3918_v23  ;;  %v2012_v23 = vld [vmem:[#allocation12 + $0xc8] sm:$0xff]  ;;  %v2033_v50 = vld [vmem:[#allocation12 + $0x170] sm:$0xff] }
 0x7ca   :  { %5420 = vpow2.f32 %v3919_v26  ;;  %v2016_v26 = vld [vmem:[#allocation12 + $0xe8] sm:$0xff] }
 0x7cb   :  { %5422 = vpow2.f32 %v3920_v32  ;;  %v2018_v32 = vld [vmem:[#allocation12 + $0xf8] sm:$0xff] }
 0x7cc   :  { %5424 = vtanh.f32 %v5205_v36  ;;  %v4587_v36 = vpack.c.bf16 %v2007_v6, %v2003_v3  ;;  %v4631_v6 = vpack.c.bf16 %v2033_v50, %v2029_v47  ;;  %v2352_v47 = vld [vmem:[#allocation13 + $0xa8] sm:$0xff]  ;;  %v2350_v50 = vld [vmem:[#allocation13 + $0x98] sm:$0xff] }
 0x7d3   :  { %v5419_v40 = vpop.eup %5418 }
 0x7d4   :  { %v5421_v44 = vpop.eup %5420  ;;  %v1779_v48 = vadd.f32 1.0, %v5419_v40  ;;  %v4619_v40 = vpack.c.bf16 %v2009_v19, %v2005_v16  ;;  %v4601_v16 = vpack.c.bf16 %v2040_v56, %v2036_v53  ;;  %v2354_v56 = vld [vmem:[#allocation13 + $0xb8] sm:$0xff] }
 0x7d5   :  { %v1785_v54 = vadd.f32 1.0, %v5421_v44  ;;  %v5423_v58 = vpop.eup %5422  ;;  %v2011_v44 = vld [vmem:[#allocation12 + $0xc0] sm:$0xff] }
 0x7d6   :  { %5426 = vrcp.f32 %v1779_v48  ;;  %v5425_v62 = vpop.eup %5424  ;;  %v1792_v18 = vadd.f32 1.0, %v5423_v58  ;;  %v2015_v48 = vld [vmem:[#allocation12 + $0xe0] sm:$0xff]  ;;  %v4621_v58 = vpack.c.bf16 %v2018_v32, %v2014_v29  ;;  %v2044_v29 = vld [vmem:[#allocation12 + $0x1c8] sm:$0xff] }
 0x7d7   :  { %5428 = vrcp.f32 %v1785_v54  ;;  %v4589_v54 = vpack.c.bf16 %v2016_v26, %v2012_v23  ;;  %v4591_v27 = vpack.c.bf16 %v2015_v48, %v2011_v44  ;;  %v2037_v23 = vld [vmem:[#allocation12 + $0x190] sm:$0xff]  ;;  %v2048_v32 = vld [vmem:[#allocation12 + $0x1e8] sm:$0xff] }
 0x7d8   :  { %5430 = vrcp.f32 %v1792_v18  ;;  %v2022_v18 = vld [vmem:[#allocation12 + $0x118] sm:$0xff]  ;;  %v2041_v26 = vld [vmem:[#allocation12 + $0x1b0] sm:$0xff] }
 0x7d9   :  { %v4635_v48 = vpack.c.bf16 %v2041_v26, %v2037_v23  ;;  %v2360_v23 = vld [vmem:[#allocation13 + $0xe8] sm:$0xff]  ;;  %v2358_v26 = vld [vmem:[#allocation13 + $0xd8] sm:$0xff] }
 0x7e0   :  { %v5427_v4 = vpop.eup %5426 }
 0x7e1   :  { %v5429_v9 = vpop.eup %5428  ;;  %v1796_v14 = vmul.f32 %v5427_v4, %v5425_v62  ;;  %v2013_v62 = vld [vmem:[#allocation12 + $0xd0] sm:$0xff] }
 0x7e2   :  { %v1795_v22 = vmul.f32 %v5429_v9, %v6405_v20  ;;  %v5431_v61 = vpop.eup %5430  ;;  %v4613_v20 = vpack.c.bf16 %v2002_v41, %v1998_v52  ;;  %v2017_v4 = vld [vmem:[#allocation12 + $0xf0] sm:$0xff]  ;;  %v2020_v9 = vld [vmem:[#allocation12 + $0x108] sm:$0xff] }
 0x7e3   :  { %v4623_v51 = vpack.c.bf16 %v2017_v4, %v2013_v62  ;;  %v2021_v52 = vld [vmem:[#allocation12 + $0x110] sm:$0xff]  ;;  %v2047_v4 = vld [vmem:[#allocation12 + $0x1e0] sm:$0xff] }
 0x7e4   :  { %v6449_v25 = vadd.f32 %v1796_v14, %v1795_v22  ;;  %v2024_v14 = vld [vmem:[#allocation12 + $0x128] sm:$0xff]  ;;  %v2026_v22 = vld [vmem:[#allocation12 + $0x138] sm:$0xff]  ;;  %v2025_v41 = vld [vmem:[#allocation12 + $0x130] sm:$0xff] }
 0x7e5   :  { %v4593_v49 = vpack.c.bf16 %v2024_v14, %v2020_v9  ;;  %v4625_v38 = vpack.c.bf16 %v2026_v22, %v2022_v18  ;;  %v4627_v12 = vpack.c.bf16 %v2025_v41, %v2021_v52  ;;  %v2045_v9 = vld [vmem:[#allocation12 + $0x1d0] sm:$0xff]  ;;  %v2344_v52 = vld [vmem:[#allocation13 + $0x68] sm:$0xff]  ;;  %v2342_v41 = vld [vmem:[#allocation13 + $0x58] sm:$0xff] }
 0x7e6   :  { %5432 = vtanh.f32 %v6449_v25  ;;  %v2049_v14 = vld [vmem:[#allocation12 + $0x1f0] sm:$0xff] }
 0x7e7   :  { %v4639_v22 = vpack.c.bf16 %v2049_v14, %v2045_v9  ;;  %v2368_v9 = vld [vmem:[#allocation13 + $0x128] sm:$0xff]  ;;  %v2366_v14 = vld [vmem:[#allocation13 + $0x118] sm:$0xff] }
 0x7f0   :  { %v5433_v33 = vpop.eup %5432 }
 0x7f1   :  { %v6452_v55 = vmul.f32 %v5433_v33, %v5431_v61  ;;  %v2028_v61 = vld [vmem:[#allocation12 + $0x148] sm:$0xff] }
 0x7f2   :  { %v2032_v33 = vld [vmem:[#allocation12 + $0x168] sm:$0xff] }
 0x7f3   :  { %1872 = vmatmul.mubr.f32.vlgmr.msra.gmra.mrb[14].mxu0 %v6452_v55  ;;  %1943 = vmatmul.mubr.f32.vlgmr.msra.gmra.mrb[14].mxu1 %v6452_v55  ;;  %v4597_v5 = vpack.c.bf16 %v2032_v33, %v2028_v61  ;;  %v2346_v33 = vld [vmem:[#allocation13 + $0x78] sm:$0xff] }
 0x7f4   :  { %4580 = vmatpush1.bf16.msra.mxu0 %v4579_v45  ;;  %4612 = vmatpush1.bf16.msra.mxu1 %v4611_v7  ;;  %v2030_v45 = vld [vmem:[#allocation12 + $0x158] sm:$0xff] }
 0x7f5   :  { %4582 = vmatprep.subr.bf16.mxu0 %v4581_v21  ;;  %4614 = vmatprep.subr.bf16.mxu1 %v4613_v20  ;;  %v2034_v7 = vld [vmem:[#allocation12 + $0x178] sm:$0xff]  ;;  %v2027_v21 = vld [vmem:[#allocation12 + $0x140] sm:$0xff] }
 0x7f6   :  { %2137 = vmatprep.mubr.f32.mxu0 %v5823_v0  ;;  %2250 = vmatprep.mubr.f32.mxu1 %v5823_v0  ;;  %v2031_v20 = vld [vmem:[#allocation12 + $0x160] sm:$0xff]  ;;  %v4629_v28 = vpack.c.bf16 %v2034_v7, %v2030_v45 }
 0x7f7   :  { %v4599_v3 = vpack.c.bf16 %v2031_v20, %v2027_v21  ;;  %v2339_v45 = vld [vmem:[#allocation13 + $0x40] sm:$0xff]  ;;  %v2341_v21 = vld [vmem:[#allocation13 + $0x50] sm:$0xff] }
 0x7f8   :  { %4584 = vmatpush1.bf16.msra.mxu0 %v4583_v60  ;;  %4616 = vmatpush1.bf16.msra.mxu1 %v4615_v63  ;;  %v2038_v60 = vld [vmem:[#allocation12 + $0x198] sm:$0xff]  ;;  %v2343_v7 = vld [vmem:[#allocation13 + $0x60] sm:$0xff]  ;;  %v2345_v20 = vld [vmem:[#allocation13 + $0x70] sm:$0xff] }
 0x7f9   :  { %4586 = vmatprep.subr.bf16.mxu0 %v4585_v10  ;;  %4618 = vmatprep.subr.bf16.mxu1 %v4617_v13  ;;  %v2042_v63 = vld [vmem:[#allocation12 + $0x1b8] sm:$0xff]  ;;  %v2035_v10 = vld [vmem:[#allocation12 + $0x180] sm:$0xff] }
 0x7fa   :  { %v2039_v13 = vld [vmem:[#allocation12 + $0x1a0] sm:$0xff]  ;;  %v4633_v19 = vpack.c.bf16 %v2042_v63, %v2038_v60 }
 0x7fb   :  { %v4603_v44 = vpack.c.bf16 %v2039_v13, %v2035_v10  ;;  %v2347_v60 = vld [vmem:[#allocation13 + $0x80] sm:$0xff]  ;;  %v2349_v10 = vld [vmem:[#allocation13 + $0x90] sm:$0xff] }
 0x7fc   :  { %4588 = vmatpush1.bf16.msra.mxu0 %v4587_v36  ;;  %4620 = vmatpush1.bf16.msra.mxu1 %v4619_v40  ;;  %v2046_v36 = vld [vmem:[#allocation12 + $0x1d8] sm:$0xff]  ;;  %v2351_v63 = vld [vmem:[#allocation13 + $0xa0] sm:$0xff]  ;;  %v2353_v13 = vld [vmem:[#allocation13 + $0xb0] sm:$0xff] }
 0x7fd   :  { %4590 = vmatprep.subr.bf16.mxu0 %v4589_v54  ;;  %4622 = vmatprep.subr.bf16.mxu1 %v4621_v58  ;;  %v2050_v40 = vld [vmem:[#allocation12 + $0x1f8] sm:$0xff]  ;;  %v2043_v54 = vld [vmem:[#allocation12 + $0x1c0] sm:$0xff]  ;;  %v4605_v58 = vpack.c.bf16 %v2048_v32, %v2044_v29 }
 0x7fe   :  { %v4637_v62 = vpack.c.bf16 %v2050_v40, %v2046_v36  ;;  %v4607_v18 = vpack.c.bf16 %v2047_v4, %v2043_v54  ;;  %v2362_v32 = vld [vmem:[#allocation13 + $0xf8] sm:$0xff]  ;;  %v2355_v36 = vld [vmem:[#allocation13 + $0xc0] sm:$0xff]  ;;  %v2357_v54 = vld [vmem:[#allocation13 + $0xd0] sm:$0xff] }
 0x7ff   :  { %v2359_v40 = vld [vmem:[#allocation13 + $0xe0] sm:$0xff] }
 0x800   :  { %4592 = vmatpush1.bf16.msra.mxu0 %v4591_v27  ;;  %4624 = vmatpush1.bf16.msra.mxu1 %v4623_v51  ;;  %v2331_v27 = vld [vmem:[#allocation13] sm:$0xff] }
 0x801   :  { %4594 = vmatprep.subr.bf16.mxu0 %v4593_v49  ;;  %4626 = vmatprep.subr.bf16.mxu1 %v4625_v38  ;;  %v2337_v49 = vld [vmem:[#allocation13 + $0x30] sm:$0xff]  ;;  %v2340_v38 = vld [vmem:[#allocation13 + $0x48] sm:$0xff] }
 0x802   :  { %v6498_v61 = vpack.c.bf16 %v2344_v52, %v2340_v38 }
 0x804   :  { %4596 = vmatpush1.bf16.msra.mxu0 %v4595_v24  ;;  %4628 = vmatpush1.bf16.msra.mxu1 %v4627_v12  ;;  %v6500_v24 = vpack.c.bf16 %v2346_v33, %v2342_v41  ;;  %v6502_v12 = vpack.c.bf16 %v2343_v7, %v2339_v45  ;;  %v2374_v41 = vld [vmem:[#allocation13 + $0x158] sm:$0xff]  ;;  %v2371_v45 = vld [vmem:[#allocation13 + $0x140] sm:$0xff] }
 0x805   :  { %4598 = vmatprep.subr.bf16.mxu0 %v4597_v5  ;;  %4630 = vmatprep.subr.bf16.mxu1 %v4629_v28  ;;  %v6505_v5 = vpack.c.bf16 %v2345_v20, %v2341_v21  ;;  %v2348_v28 = vld [vmem:[#allocation13 + $0x88] sm:$0xff]  ;;  %v2378_v33 = vld [vmem:[#allocation13 + $0x178] sm:$0xff]  ;;  %v2375_v21 = vld [vmem:[#allocation13 + $0x160] sm:$0xff] }
 0x806   :  { %v6510_v53 = vpack.c.bf16 %v2352_v47, %v2348_v28  ;;  %v6546_v7 = vpack.c.bf16 %v2378_v33, %v2374_v41  ;;  %v2373_v20 = vld [vmem:[#allocation13 + $0x150] sm:$0xff]  ;;  %v6549_v47 = vpack.c.bf16 %v2375_v21, %v2371_v45 }
 0x807   :  { %v2377_v28 = vld [vmem:[#allocation13 + $0x170] sm:$0xff] }
 0x808   :  { %4600 = vmatpush1.bf16.msra.mxu0 %v4599_v3  ;;  %4632 = vmatpush1.bf16.msra.mxu1 %v4631_v6  ;;  %v6512_v3 = vpack.c.bf16 %v2354_v56, %v2350_v50  ;;  %v6514_v6 = vpack.c.bf16 %v2351_v63, %v2347_v60  ;;  %v2380_v50 = vld [vmem:[#allocation13 + $0x188] sm:$0xff]  ;;  %v2382_v60 = vld [vmem:[#allocation13 + $0x198] sm:$0xff]  ;;  %v6553_v63 = vpack.c.bf16 %v2377_v28, %v2373_v20 }
 0x809   :  { %4602 = vmatprep.subr.bf16.mxu0 %v4601_v16  ;;  %4634 = vmatprep.subr.bf16.mxu1 %v4633_v19  ;;  %v6517_v16 = vpack.c.bf16 %v2353_v13, %v2349_v10  ;;  %v2356_v19 = vld [vmem:[#allocation13 + $0xc8] sm:$0xff]  ;;  %v2386_v13 = vld [vmem:[#allocation13 + $0x1b8] sm:$0xff] }
 0x80a   :  { %v6522_v29 = vpack.c.bf16 %v2360_v23, %v2356_v19  ;;  %v2384_v56 = vld [vmem:[#allocation13 + $0x1a8] sm:$0xff]  ;;  %v2379_v19 = vld [vmem:[#allocation13 + $0x180] sm:$0xff] }
 0x80b   :  { %v6555_v10 = vpack.c.bf16 %v2384_v56, %v2380_v50  ;;  %v2383_v23 = vld [vmem:[#allocation13 + $0x1a0] sm:$0xff] }
 0x80c   :  { %4604 = vmatpush1.bf16.msra.mxu0 %v4603_v44  ;;  %4636 = vmatpush1.bf16.msra.mxu1 %v4635_v48  ;;  %v6524_v44 = vpack.c.bf16 %v2362_v32, %v2358_v26  ;;  %v6526_v48 = vpack.c.bf16 %v2359_v40, %v2355_v36  ;;  %v6558_v26 = vpack.c.bf16 %v2386_v13, %v2382_v60  ;;  %v2381_v32 = vld [vmem:[#allocation13 + $0x190] sm:$0xff] }
 0x80d   :  { %4606 = vmatprep.subr.bf16.mxu0 %v4605_v58  ;;  %4638 = vmatprep.subr.bf16.mxu1 %v4637_v62  ;;  %v2361_v58 = vld [vmem:[#allocation13 + $0xf0] sm:$0xff]  ;;  %v2364_v62 = vld [vmem:[#allocation13 + $0x108] sm:$0xff]  ;;  %v6561_v40 = vpack.c.bf16 %v2383_v23, %v2379_v19 }
 0x80e   :  { %v6529_v4 = vpack.c.bf16 %v2361_v58, %v2357_v54  ;;  %v2385_v36 = vld [vmem:[#allocation13 + $0x1b0] sm:$0xff]  ;;  %v2388_v58 = vld [vmem:[#allocation13 + $0x1c8] sm:$0xff] }
 0x80f   :  { %v6565_v54 = vpack.c.bf16 %v2385_v36, %v2381_v32 }
 0x810   :  { %4608 = vmatpush1.bf16.msra.mxu0 %v4607_v18  ;;  %4640 = vmatpush1.bf16.msra.mxu1 %v4639_v22  ;;  %v2370_v18 = vld [vmem:[#allocation13 + $0x138] sm:$0xff]  ;;  %v6533_v22 = vpack.c.bf16 %v2368_v9, %v2364_v62  ;;  %v2392_v62 = vld [vmem:[#allocation13 + $0x1e8] sm:$0xff] }
 0x811   :  { %v2390_v9 = vld [vmem:[#allocation13 + $0x1d8] sm:$0xff] }
 0x813   :  { %2138 = vmatmul.mubr.f32.vlgmr.msra.gmra.mrb[16].mxu0 %v6178_v46  ;;  %2251 = vmatmul.mubr.f32.vlgmr.msra.gmra.mrb[16].mxu1 %v6178_v46  ;;  %v2332_v46 = vld [vmem:[#allocation13 + $0x8] sm:$0xff] }
 0x814   :  { %2143 = vmatprep.mubr.f32.mxu0 %v5823_v0  ;;  %2256 = vmatprep.mubr.f32.mxu1 %v5823_v0 }
 0x817   :  { %2144 = vmatmul.mubr.f32.gmra.mrb[18].mxu0 %v6224_v2  ;;  %2257 = vmatmul.mubr.f32.gmra.mrb[18].mxu1 %v6224_v2  ;;  %v2336_v2 = vld [vmem:[#allocation13 + $0x28] sm:$0xff] }
 0x818   :  { %2149 = vmatprep.mubr.f32.mxu0 %v5823_v0  ;;  %2262 = vmatprep.mubr.f32.mxu1 %v5823_v0 }
 0x81b   :  { %2150 = vmatmul.mubr.f32.gmra.mrb[20].mxu0 %v6270_v15  ;;  %2263 = vmatmul.mubr.f32.gmra.mrb[20].mxu1 %v6270_v15  ;;  %v2334_v15 = vld [vmem:[#allocation13 + $0x18] sm:$0xff] }
 0x81c   :  { %2155 = vmatprep.mubr.f32.mxu0 %v5823_v0  ;;  %2268 = vmatprep.mubr.f32.mxu1 %v5823_v0 }
 0x81f   :  { %2156 = vmatmul.mubr.f32.gmra.mrb[22].mxu0 %v6316_v43  ;;  %2269 = vmatmul.mubr.f32.gmra.mrb[22].mxu1 %v6316_v43  ;;  %v6486_v43 = vpack.c.bf16 %v2336_v2, %v2332_v46  ;;  %v6535_v46 = vpack.c.bf16 %v2370_v18, %v2366_v14  ;;  %v2363_v2 = vld [vmem:[#allocation13 + $0x100] sm:$0xff]  ;;  %v6570_v14 = vpack.c.bf16 %v2392_v62, %v2388_v58  ;;  %v2394_v18 = vld [vmem:[#allocation13 + $0x1f8] sm:$0xff] }
 0x820   :  { %2161 = vmatprep.mubr.f32.mxu0 %v5823_v0  ;;  %2274 = vmatprep.mubr.f32.mxu1 %v5823_v0 }
 0x821   :  { %4642 = vmatprep.subr.bf16.mxu0 %v6486_v43 }
 0x823   :  { %2162 = vmatmul.mubr.f32.gmra.mrb[24].mxu0 %v6362_v8  ;;  %2275 = vmatmul.mubr.f32.gmra.mrb[24].mxu1 %v6362_v8  ;;  %v2338_v8 = vld [vmem:[#allocation13 + $0x38] sm:$0xff] }
 0x824   :  { %2167 = vmatprep.mubr.f32.mxu0 %v5823_v0  ;;  %2280 = vmatprep.mubr.f32.mxu1 %v5823_v0  ;;  %v6488_v51 = vpack.c.bf16 %v2338_v8, %v2334_v15  ;;  %v2367_v15 = vld [vmem:[#allocation13 + $0x120] sm:$0xff]  ;;  %v2365_v8 = vld [vmem:[#allocation13 + $0x110] sm:$0xff] }
 0x826   :  { %4674 = vmatprep.subr.bf16.mxu1 %v6488_v51 }
 0x827   :  { %2168 = vmatmul.mubr.f32.gmra.mrb[26].mxu0 %v6408_v17  ;;  %2281 = vmatmul.mubr.f32.gmra.mrb[26].mxu1 %v6408_v17  ;;  %v2335_v17 = vld [vmem:[#allocation13 + $0x20] sm:$0xff] }
 0x828   :  { %2173 = vmatprep.mubr.f32.mxu0 %v5823_v0  ;;  %2286 = vmatprep.mubr.f32.mxu1 %v5823_v0  ;;  %v6490_v39 = vpack.c.bf16 %v2335_v17, %v2331_v27  ;;  %v6538_v27 = vpack.c.bf16 %v2367_v15, %v2363_v2  ;;  %v2369_v17 = vld [vmem:[#allocation13 + $0x130] sm:$0xff]  ;;  %v2387_v2 = vld [vmem:[#allocation13 + $0x1c0] sm:$0xff] }
 0x829   :  { %v6542_v38 = vpack.c.bf16 %v2369_v17, %v2365_v8  ;;  %v2391_v15 = vld [vmem:[#allocation13 + $0x1e0] sm:$0xff]  ;;  %v6572_v8 = vpack.c.bf16 %v2394_v18, %v2390_v9 }
 0x82a   :  { %4644 = vmatpush1.bf16.msra.mxu0 %v6490_v39  ;;  %v6574_v17 = vpack.c.bf16 %v2391_v15, %v2387_v2 }
 0x82b   :  { %2174 = vmatmul.mubr.f32.gmra.mrb[28].mxu0 %v6452_v55  ;;  %2287 = vmatmul.mubr.f32.gmra.mrb[28].mxu1 %v6452_v55  ;;  %v6493_v55 = vpack.c.bf16 %v2337_v49, %v2333_v11  ;;  %v2372_v11 = vld [vmem:[#allocation13 + $0x148] sm:$0xff] }
 0x82c   :  { %2179 = vmatprep.mubr.f32.mxu0 %v5823_v0  ;;  %2292 = vmatprep.mubr.f32.mxu1 %v5823_v0  ;;  %v2376_v49 = vld [vmem:[#allocation13 + $0x168] sm:$0xff] }
 0x82d   :  { %4676 = vmatpush1.bf16.msra.mxu1 %v6493_v55  ;;  %4646 = vmatprep.subr.bf16.mxu0 %v6498_v61  ;;  %v6544_v52 = vpack.c.bf16 %v2376_v49, %v2372_v11  ;;  %v2389_v11 = vld [vmem:[#allocation13 + $0x1d0] sm:$0xff] }
 0x82e   :  { %4678 = vmatprep.subr.bf16.mxu1 %v6500_v24  ;;  %4648 = vmatpush1.bf16.msra.mxu0 %v6502_v12  ;;  %v2393_v49 = vld [vmem:[#allocation13 + $0x1f0] sm:$0xff] }
 0x82f   :  { %4650 = vmatprep.subr.bf16.mxu0 %v6510_v53  ;;  %v6577_v41 = vpack.c.bf16 %v2393_v49, %v2389_v11 }
 0x831   :  { %4680 = vmatpush1.bf16.msra.mxu1 %v6505_v5 }
 0x832   :  { %4682 = vmatprep.subr.bf16.mxu1 %v6512_v3  ;;  %4652 = vmatpush1.bf16.msra.mxu0 %v6514_v6 }
 0x833   :  { %4654 = vmatprep.subr.bf16.mxu0 %v6522_v29 }
 0x835   :  { %4684 = vmatpush1.bf16.msra.mxu1 %v6517_v16 }
 0x836   :  { %4686 = vmatprep.subr.bf16.mxu1 %v6524_v44  ;;  %4656 = vmatpush1.bf16.msra.mxu0 %v6526_v48 }
 0x837   :  { %4658 = vmatprep.subr.bf16.mxu0 %v6533_v22 }
 0x839   :  { %4688 = vmatpush1.bf16.msra.mxu1 %v6529_v4 }
 0x83a   :  { %4690 = vmatprep.subr.bf16.mxu1 %v6535_v46  ;;  %4660 = vmatpush1.bf16.msra.mxu0 %v6538_v27 }
 0x83b   :  { %4662 = vmatprep.subr.bf16.mxu0 %v6544_v52 }
 0x83d   :  { %4692 = vmatpush1.bf16.msra.mxu1 %v6542_v38 }
 0x83e   :  { %4694 = vmatprep.subr.bf16.mxu1 %v6546_v7  ;;  %4664 = vmatpush1.bf16.msra.mxu0 %v6549_v47 }
 0x83f   :  { %4666 = vmatprep.subr.bf16.mxu0 %v6555_v10 }
 0x841   :  { %4696 = vmatpush1.bf16.msra.mxu1 %v6553_v63 }
 0x842   :  { %4698 = vmatprep.subr.bf16.mxu1 %v6558_v26  ;;  %4668 = vmatpush1.bf16.msra.mxu0 %v6561_v40 }
 0x843   :  { %4670 = vmatprep.subr.bf16.mxu0 %v6570_v14 }
 0x845   :  { %4700 = vmatpush1.bf16.msra.mxu1 %v6565_v54 }
 0x846   :  { %4702 = vmatprep.subr.bf16.mxu1 %v6572_v8  ;;  %4672 = vmatpush1.bf16.msra.mxu0 %v6574_v17 }
 0x847   :  { %4706 = vmatprep.subr.bf16.mxu0 %v6486_v43 }
 0x849   :  { %4704 = vmatpush1.bf16.msra.mxu1 %v6577_v41 }
 0x84a   :  { %4738 = vmatprep.subr.bf16.mxu1 %v6488_v51 }
 0x8c6   :  { %v1873_v33 = vpop.f32.mrb[14].mxu0  ;;  %v1944_v45 = vpop.f32.mrb[14].mxu1 }
 0x8c7   :  { %v5191_v21 = vadd.f32 %v1873_v33, %v6155_v35  ;;  %v1875_v20 = vpop.f32.mrb[15].mxu0  ;;  %v1946_v28 = vpop.f32.mrb[15].mxu1  ;;  %v5207_v23 = vadd.f32 %v1944_v45, %v6172_v1 }
 0x8c8   :  { %v5192_v50 = vadd.f32 %v1875_v20, %v6159_v37  ;;  %v5208_v13 = vadd.f32 %v1946_v28, %v6166_v57 }
 0x8c9   :  { %v3921_v56 = vmul.f32 -1.442695, %v5191_v21 }
 0x8ca   :  { %v3922_v60 = vmul.f32 -1.442695, %v5192_v50  ;;  %v3923_v19 = vmul.f32 -1.442695, %v5208_v13 }
 0x8cb   :  { %5434 = vpow2.f32 %v3921_v56 }
 0x8cc   :  { %5436 = vpow2.f32 %v3922_v60 }
 0x8cd   :  { %5438 = vpow2.f32 %v3923_v19 }
 0x8ce   :  { %5440 = vtanh.f32 %v5207_v23 }
 0x8d5   :  { %v5435_v32 = vpop.eup %5434 }
 0x8d6   :  { %v5437_v36 = vpop.eup %5436  ;;  %v1956_v58 = vadd.f32 1.0, %v5435_v32 }
 0x8d7   :  { %v1962_v62 = vadd.f32 1.0, %v5437_v36  ;;  %v5439_v35 = vpop.eup %5438 }
 0x8d8   :  { %5442 = vrcp.f32 %v1956_v58  ;;  %v5441_v9 = vpop.eup %5440  ;;  %v1969_v15 = vadd.f32 1.0, %v5439_v35 }
 0x8d9   :  { %5444 = vrcp.f32 %v1962_v62 }
 0x8da   :  { %5446 = vrcp.f32 %v1969_v15 }
 0x8e2   :  { %v5443_v37 = vpop.eup %5442 }
 0x8e3   :  { %v5445_v18 = vpop.eup %5444  ;;  %v1973_v2 = vmul.f32 %v5443_v37, %v5441_v9 }
 0x8e4   :  { %v1972_v11 = vmul.f32 %v5445_v18, %v6449_v25  ;;  %v5447_v1 = vpop.eup %5446  ;;  %v2051_v25 = vld [vmem:[#allocation15] sm:$0xf] }
 0x8e5   :  { %v6629_v45 = vrot.slane %v2051_v25, %v225_v31  ;;  %v6633_v21 = vrot.slane %v2051_v25, %v229_v34  ;;  %v6639_v32 = vrot.slane %v2051_v25, %v237_v42  ;;  %v6644_v34 = vrot.slane %v2051_v25, %v233_v59 }
 0x8e6   :  { %v1974_v57 = vadd.f32 %v1973_v2, %v1972_v11 }
 0x8e8   :  { %5448 = vtanh.f32 %v1974_v57 }
 0x8f2   :  { %v5449_v49 = vpop.eup %5448 }
 0x8f3   :  { %v1976_v33 = vmul.f32 %v5449_v49, %v5447_v1 }
 0x8f5   :  { %2180 = vmatmul.mubr.f32.gmra.mrb[30].mxu0 %v1976_v33  ;;  %2293 = vmatmul.mubr.f32.gmra.mrb[30].mxu1 %v1976_v33 }
 0x8f6   :  { %2463 = vmatprep.mubr.f32.mxu0 %v5823_v0  ;;  %2534 = vmatprep.mubr.f32.mxu1 %v5823_v0 }
 0x8f9   :  { %2464 = vmatmul.mubr.f32.vlgmr.msra.gmra.mrb[16].mxu0 %v5823_v0  ;;  %2535 = vmatmul.mubr.f32.vlgmr.msra.gmra.mrb[16].mxu1 %v5823_v0 }
 0x8fa   :  { %4708 = vmatpush1.bf16.msra.mxu0 %v6490_v39  ;;  %4740 = vmatpush1.bf16.msra.mxu1 %v6493_v55 }
 0x8fb   :  { %4710 = vmatprep.subr.bf16.mxu0 %v6498_v61  ;;  %4742 = vmatprep.subr.bf16.mxu1 %v6500_v24 }
 0x8fc   :  { %2637 = vmatprep.mubr.f32.mxu0 %v5823_v0  ;;  %2708 = vmatprep.mubr.f32.mxu1 %v5823_v0 }
 0x8fe   :  { %4712 = vmatpush1.bf16.msra.mxu0 %v6502_v12  ;;  %4744 = vmatpush1.bf16.msra.mxu1 %v6505_v5 }
 0x8ff   :  { %4714 = vmatprep.subr.bf16.mxu0 %v6510_v53  ;;  %4746 = vmatprep.subr.bf16.mxu1 %v6512_v3 }
 0x902   :  { %4716 = vmatpush1.bf16.msra.mxu0 %v6514_v6  ;;  %4748 = vmatpush1.bf16.msra.mxu1 %v6517_v16 }
 0x903   :  { %4718 = vmatprep.subr.bf16.mxu0 %v6522_v29  ;;  %4750 = vmatprep.subr.bf16.mxu1 %v6524_v44 }
 0x906   :  { %4720 = vmatpush1.bf16.msra.mxu0 %v6526_v48  ;;  %4752 = vmatpush1.bf16.msra.mxu1 %v6529_v4 }
 0x907   :  { %4722 = vmatprep.subr.bf16.mxu0 %v6533_v22  ;;  %4754 = vmatprep.subr.bf16.mxu1 %v6535_v46 }
 0x90a   :  { %4724 = vmatpush1.bf16.msra.mxu0 %v6538_v27  ;;  %4756 = vmatpush1.bf16.msra.mxu1 %v6542_v38 }
 0x90b   :  { %4726 = vmatprep.subr.bf16.mxu0 %v6544_v52  ;;  %4758 = vmatprep.subr.bf16.mxu1 %v6546_v7 }
 0x90e   :  { %4728 = vmatpush1.bf16.msra.mxu0 %v6549_v47  ;;  %4760 = vmatpush1.bf16.msra.mxu1 %v6553_v63 }
 0x90f   :  { %4730 = vmatprep.subr.bf16.mxu0 %v6555_v10  ;;  %4762 = vmatprep.subr.bf16.mxu1 %v6558_v26 }
 0x912   :  { %4732 = vmatpush1.bf16.msra.mxu0 %v6561_v40  ;;  %4764 = vmatpush1.bf16.msra.mxu1 %v6565_v54 }
 0x913   :  { %4734 = vmatprep.subr.bf16.mxu0 %v6570_v14  ;;  %4766 = vmatprep.subr.bf16.mxu1 %v6572_v8 }
 0x916   :  { %4736 = vmatpush1.bf16.msra.mxu0 %v6574_v17  ;;  %4768 = vmatpush1.bf16.msra.mxu1 %v6577_v41 }
 0x917   :  { %4770 = vmatprep.subr.bf16.mxu0 %v6486_v43  ;;  %4802 = vmatprep.subr.bf16.mxu1 %v6488_v51 }
 0x9cc   :  { %v2465_v20 = vpop.f32.mrb[16].mxu0  ;;  %v2536_v28 = vpop.f32.mrb[16].mxu1 }
 0x9cd   :  { %v5209_v50 = vadd.f32 %v2465_v20, %v6629_v45  ;;  %v2467_v56 = vpop.f32.mrb[17].mxu0  ;;  %v2538_v60 = vpop.f32.mrb[17].mxu1  ;;  %v5225_v58 = vadd.f32 %v2536_v28, %v6644_v34 }
 0x9ce   :  { %v5210_v13 = vadd.f32 %v2467_v56, %v6633_v21  ;;  %v5226_v31 = vadd.f32 %v2538_v60, %v6639_v32 }
 0x9cf   :  { %v3924_v19 = vmul.f32 -1.442695, %v5209_v50 }
 0x9d0   :  { %v3925_v23 = vmul.f32 -1.442695, %v5210_v13  ;;  %v3926_v36 = vmul.f32 -1.442695, %v5226_v31 }
 0x9d1   :  { %5450 = vpow2.f32 %v3924_v19 }
 0x9d2   :  { %5452 = vpow2.f32 %v3925_v23 }
 0x9d3   :  { %5454 = vpow2.f32 %v3926_v36 }
 0x9d4   :  { %5456 = vtanh.f32 %v5225_v58 }
 0x9db   :  { %v5451_v62 = vpop.eup %5450 }
 0x9dc   :  { %v5453_v35 = vpop.eup %5452  ;;  %v2548_v9 = vadd.f32 1.0, %v5451_v62 }
 0x9dd   :  { %v2554_v37 = vadd.f32 1.0, %v5453_v35  ;;  %v5455_v42 = vpop.eup %5454 }
 0x9de   :  { %5458 = vrcp.f32 %v2548_v9  ;;  %v5457_v18 = vpop.eup %5456  ;;  %v2561_v57 = vadd.f32 1.0, %v5455_v42 }
 0x9df   :  { %5460 = vrcp.f32 %v2554_v37 }
 0x9e0   :  { %5462 = vrcp.f32 %v2561_v57 }
 0x9e8   :  { %v5459_v2 = vpop.eup %5458 }
 0x9e9   :  { %v5461_v15 = vpop.eup %5460  ;;  %v2565_v11 = vmul.f32 %v5459_v2, %v5457_v18 }
 0x9ea   :  { %v2564_v30 = vmul.f32 0.0, %v5461_v15  ;;  %v5463_v1 = vpop.eup %5462 }
 0x9ec   :  { %v6647_v59 = vadd.f32 %v2565_v11, %v2564_v30 }
 0x9ee   :  { %5464 = vtanh.f32 %v6647_v59 }
 0x9f8   :  { %v5465_v49 = vpop.eup %5464 }
 0x9f9   :  { %v2568_v33 = vmul.f32 %v5465_v49, %v5463_v1 }
 0x9fb   :  { %2638 = vmatmul.mubr.f32.vlgmr.msra.gmra.mrb[18].mxu0 %v2568_v33  ;;  %2709 = vmatmul.mubr.f32.vlgmr.msra.gmra.mrb[18].mxu1 %v2568_v33 }
 0x9fc   :  { %4772 = vmatpush1.bf16.msra.mxu0 %v6490_v39  ;;  %4804 = vmatpush1.bf16.msra.mxu1 %v6493_v55 }
 0x9fd   :  { %4774 = vmatprep.subr.bf16.mxu0 %v6498_v61  ;;  %4806 = vmatprep.subr.bf16.mxu1 %v6500_v24 }
 0x9fe   :  { %2811 = vmatprep.mubr.f32.mxu0 %v5823_v0  ;;  %2882 = vmatprep.mubr.f32.mxu1 %v5823_v0 }
 0xa00   :  { %4776 = vmatpush1.bf16.msra.mxu0 %v6502_v12  ;;  %4808 = vmatpush1.bf16.msra.mxu1 %v6505_v5 }
 0xa01   :  { %4778 = vmatprep.subr.bf16.mxu0 %v6510_v53  ;;  %4810 = vmatprep.subr.bf16.mxu1 %v6512_v3 }
 0xa04   :  { %4780 = vmatpush1.bf16.msra.mxu0 %v6514_v6  ;;  %4812 = vmatpush1.bf16.msra.mxu1 %v6517_v16 }
 0xa05   :  { %4782 = vmatprep.subr.bf16.mxu0 %v6522_v29  ;;  %4814 = vmatprep.subr.bf16.mxu1 %v6524_v44 }
 0xa08   :  { %4784 = vmatpush1.bf16.msra.mxu0 %v6526_v48  ;;  %4816 = vmatpush1.bf16.msra.mxu1 %v6529_v4 }
 0xa09   :  { %4786 = vmatprep.subr.bf16.mxu0 %v6533_v22  ;;  %4818 = vmatprep.subr.bf16.mxu1 %v6535_v46 }
 0xa0c   :  { %4788 = vmatpush1.bf16.msra.mxu0 %v6538_v27  ;;  %4820 = vmatpush1.bf16.msra.mxu1 %v6542_v38 }
 0xa0d   :  { %4790 = vmatprep.subr.bf16.mxu0 %v6544_v52  ;;  %4822 = vmatprep.subr.bf16.mxu1 %v6546_v7 }
 0xa10   :  { %4792 = vmatpush1.bf16.msra.mxu0 %v6549_v47  ;;  %4824 = vmatpush1.bf16.msra.mxu1 %v6553_v63 }
 0xa11   :  { %4794 = vmatprep.subr.bf16.mxu0 %v6555_v10  ;;  %4826 = vmatprep.subr.bf16.mxu1 %v6558_v26 }
 0xa14   :  { %4796 = vmatpush1.bf16.msra.mxu0 %v6561_v40  ;;  %4828 = vmatpush1.bf16.msra.mxu1 %v6565_v54 }
 0xa15   :  { %4798 = vmatprep.subr.bf16.mxu0 %v6570_v14  ;;  %4830 = vmatprep.subr.bf16.mxu1 %v6572_v8 }
 0xa18   :  { %4800 = vmatpush1.bf16.msra.mxu0 %v6574_v17  ;;  %4832 = vmatpush1.bf16.msra.mxu1 %v6577_v41 }
 0xa19   :  { %4834 = vmatprep.subr.bf16.mxu0 %v6486_v43  ;;  %4866 = vmatprep.subr.bf16.mxu1 %v6488_v51 }
 0xace   :  { %v2639_v25 = vpop.f32.mrb[18].mxu0  ;;  %v2710_v20 = vpop.f32.mrb[18].mxu1 }
 0xacf   :  { %v5211_v28 = vadd.f32 %v2639_v25, %v6629_v45  ;;  %v2641_v50 = vpop.f32.mrb[19].mxu0  ;;  %v2712_v56 = vpop.f32.mrb[19].mxu1  ;;  %v5227_v36 = vadd.f32 %v2710_v20, %v6644_v34 }
 0xad0   :  { %v5212_v60 = vadd.f32 %v2641_v50, %v6633_v21  ;;  %v5228_v23 = vadd.f32 %v2712_v56, %v6639_v32 }
 0xad1   :  { %v3927_v13 = vmul.f32 -1.442695, %v5211_v28 }
 0xad2   :  { %v3928_v19 = vmul.f32 -1.442695, %v5212_v60  ;;  %v3929_v31 = vmul.f32 -1.442695, %v5228_v23 }
 0xad3   :  { %5466 = vpow2.f32 %v3927_v13 }
 0xad4   :  { %5468 = vpow2.f32 %v3928_v19 }
 0xad5   :  { %5470 = vpow2.f32 %v3929_v31 }
 0xad6   :  { %5472 = vtanh.f32 %v5227_v36 }
 0xadd   :  { %v5467_v58 = vpop.eup %5466 }
 0xade   :  { %v5469_v62 = vpop.eup %5468  ;;  %v2722_v35 = vadd.f32 1.0, %v5467_v58 }
 0xadf   :  { %v2728_v9 = vadd.f32 1.0, %v5469_v62  ;;  %v5471_v37 = vpop.eup %5470 }
 0xae0   :  { %5474 = vrcp.f32 %v2722_v35  ;;  %v5473_v42 = vpop.eup %5472  ;;  %v2735_v11 = vadd.f32 1.0, %v5471_v37 }
 0xae1   :  { %5476 = vrcp.f32 %v2728_v9 }
 0xae2   :  { %5478 = vrcp.f32 %v2735_v11 }
 0xaea   :  { %v5475_v18 = vpop.eup %5474 }
 0xaeb   :  { %v5477_v2 = vpop.eup %5476  ;;  %v2739_v15 = vmul.f32 %v5475_v18, %v5473_v42 }
 0xaec   :  { %v2738_v57 = vmul.f32 %v5477_v2, %v6647_v59  ;;  %v5479_v1 = vpop.eup %5478 }
 0xaee   :  { %v6689_v30 = vadd.f32 %v2739_v15, %v2738_v57 }
 0xaf0   :  { %5480 = vtanh.f32 %v6689_v30 }
 0xafa   :  { %v5481_v49 = vpop.eup %5480 }
 0xafb   :  { %v2742_v33 = vmul.f32 %v5481_v49, %v5479_v1 }
 0xafd   :  { %2812 = vmatmul.mubr.f32.vlgmr.msra.gmra.mrb[20].mxu0 %v2742_v33  ;;  %2883 = vmatmul.mubr.f32.vlgmr.msra.gmra.mrb[20].mxu1 %v2742_v33 }
 0xafe   :  { %4836 = vmatpush1.bf16.msra.mxu0 %v6490_v39  ;;  %4868 = vmatpush1.bf16.msra.mxu1 %v6493_v55 }
 0xaff   :  { %4838 = vmatprep.subr.bf16.mxu0 %v6498_v61  ;;  %4870 = vmatprep.subr.bf16.mxu1 %v6500_v24 }
 0xb00   :  { %2985 = vmatprep.mubr.f32.mxu0 %v5823_v0  ;;  %3056 = vmatprep.mubr.f32.mxu1 %v5823_v0 }
 0xb02   :  { %4840 = vmatpush1.bf16.msra.mxu0 %v6502_v12  ;;  %4872 = vmatpush1.bf16.msra.mxu1 %v6505_v5 }
 0xb03   :  { %4842 = vmatprep.subr.bf16.mxu0 %v6510_v53  ;;  %4874 = vmatprep.subr.bf16.mxu1 %v6512_v3 }
 0xb06   :  { %4844 = vmatpush1.bf16.msra.mxu0 %v6514_v6  ;;  %4876 = vmatpush1.bf16.msra.mxu1 %v6517_v16 }
 0xb07   :  { %4846 = vmatprep.subr.bf16.mxu0 %v6522_v29  ;;  %4878 = vmatprep.subr.bf16.mxu1 %v6524_v44 }
 0xb0a   :  { %4848 = vmatpush1.bf16.msra.mxu0 %v6526_v48  ;;  %4880 = vmatpush1.bf16.msra.mxu1 %v6529_v4 }
 0xb0b   :  { %4850 = vmatprep.subr.bf16.mxu0 %v6533_v22  ;;  %4882 = vmatprep.subr.bf16.mxu1 %v6535_v46 }
 0xb0e   :  { %4852 = vmatpush1.bf16.msra.mxu0 %v6538_v27  ;;  %4884 = vmatpush1.bf16.msra.mxu1 %v6542_v38 }
 0xb0f   :  { %4854 = vmatprep.subr.bf16.mxu0 %v6544_v52  ;;  %4886 = vmatprep.subr.bf16.mxu1 %v6546_v7 }
 0xb12   :  { %4856 = vmatpush1.bf16.msra.mxu0 %v6549_v47  ;;  %4888 = vmatpush1.bf16.msra.mxu1 %v6553_v63 }
 0xb13   :  { %4858 = vmatprep.subr.bf16.mxu0 %v6555_v10  ;;  %4890 = vmatprep.subr.bf16.mxu1 %v6558_v26 }
 0xb16   :  { %4860 = vmatpush1.bf16.msra.mxu0 %v6561_v40  ;;  %4892 = vmatpush1.bf16.msra.mxu1 %v6565_v54 }
 0xb17   :  { %4862 = vmatprep.subr.bf16.mxu0 %v6570_v14  ;;  %4894 = vmatprep.subr.bf16.mxu1 %v6572_v8 }
 0xb1a   :  { %4864 = vmatpush1.bf16.msra.mxu0 %v6574_v17  ;;  %4896 = vmatpush1.bf16.msra.mxu1 %v6577_v41 }
 0xb1b   :  { %4898 = vmatprep.subr.bf16.mxu0 %v6486_v43  ;;  %4930 = vmatprep.subr.bf16.mxu1 %v6488_v51 }
 0xbd0   :  { %v2813_v59 = vpop.f32.mrb[20].mxu0  ;;  %v2884_v25 = vpop.f32.mrb[20].mxu1 }
 0xbd1   :  { %v5213_v20 = vadd.f32 %v2813_v59, %v6629_v45  ;;  %v2815_v28 = vpop.f32.mrb[21].mxu0  ;;  %v2886_v50 = vpop.f32.mrb[21].mxu1  ;;  %v5229_v31 = vadd.f32 %v2884_v25, %v6644_v34 }
 0xbd2   :  { %v5214_v56 = vadd.f32 %v2815_v28, %v6633_v21  ;;  %v5230_v19 = vadd.f32 %v2886_v50, %v6639_v32 }
 0xbd3   :  { %v3930_v60 = vmul.f32 -1.442695, %v5213_v20 }
 0xbd4   :  { %v3931_v13 = vmul.f32 -1.442695, %v5214_v56  ;;  %v3932_v23 = vmul.f32 -1.442695, %v5230_v19 }
 0xbd5   :  { %5482 = vpow2.f32 %v3930_v60 }
 0xbd6   :  { %5484 = vpow2.f32 %v3931_v13 }
 0xbd7   :  { %5486 = vpow2.f32 %v3932_v23 }
 0xbd8   :  { %5488 = vtanh.f32 %v5229_v31 }
 0xbdf   :  { %v5483_v36 = vpop.eup %5482 }
 0xbe0   :  { %v5485_v58 = vpop.eup %5484  ;;  %v2896_v62 = vadd.f32 1.0, %v5483_v36 }
 0xbe1   :  { %v2902_v35 = vadd.f32 1.0, %v5485_v58  ;;  %v5487_v9 = vpop.eup %5486 }
 0xbe2   :  { %5490 = vrcp.f32 %v2896_v62  ;;  %v5489_v37 = vpop.eup %5488  ;;  %v2909_v15 = vadd.f32 1.0, %v5487_v9 }
 0xbe3   :  { %5492 = vrcp.f32 %v2902_v35 }
 0xbe4   :  { %5494 = vrcp.f32 %v2909_v15 }
 0xbec   :  { %v5491_v42 = vpop.eup %5490 }
 0xbed   :  { %v5493_v18 = vpop.eup %5492  ;;  %v2913_v2 = vmul.f32 %v5491_v42, %v5489_v37 }
 0xbee   :  { %v2912_v11 = vmul.f32 %v5493_v18, %v6689_v30  ;;  %v5495_v1 = vpop.eup %5494 }
 0xbf0   :  { %v6731_v57 = vadd.f32 %v2913_v2, %v2912_v11 }
 0xbf2   :  { %5496 = vtanh.f32 %v6731_v57 }
 0xbfc   :  { %v5497_v49 = vpop.eup %5496 }
 0xbfd   :  { %v2916_v33 = vmul.f32 %v5497_v49, %v5495_v1 }
 0xbff   :  { %2986 = vmatmul.mubr.f32.vlgmr.msra.gmra.mrb[22].mxu0 %v2916_v33  ;;  %3057 = vmatmul.mubr.f32.vlgmr.msra.gmra.mrb[22].mxu1 %v2916_v33 }
 0xc00   :  { %4900 = vmatpush1.bf16.msra.mxu0 %v6490_v39  ;;  %4932 = vmatpush1.bf16.msra.mxu1 %v6493_v55 }
 0xc01   :  { %4902 = vmatprep.subr.bf16.mxu0 %v6498_v61  ;;  %4934 = vmatprep.subr.bf16.mxu1 %v6500_v24 }
 0xc02   :  { %3159 = vmatprep.mubr.f32.mxu0 %v5823_v0  ;;  %3230 = vmatprep.mubr.f32.mxu1 %v5823_v0 }
 0xc04   :  { %4904 = vmatpush1.bf16.msra.mxu0 %v6502_v12  ;;  %4936 = vmatpush1.bf16.msra.mxu1 %v6505_v5 }
 0xc05   :  { %4906 = vmatprep.subr.bf16.mxu0 %v6510_v53  ;;  %4938 = vmatprep.subr.bf16.mxu1 %v6512_v3 }
 0xc08   :  { %4908 = vmatpush1.bf16.msra.mxu0 %v6514_v6  ;;  %4940 = vmatpush1.bf16.msra.mxu1 %v6517_v16 }
 0xc09   :  { %4910 = vmatprep.subr.bf16.mxu0 %v6522_v29  ;;  %4942 = vmatprep.subr.bf16.mxu1 %v6524_v44 }
 0xc0c   :  { %4912 = vmatpush1.bf16.msra.mxu0 %v6526_v48  ;;  %4944 = vmatpush1.bf16.msra.mxu1 %v6529_v4 }
 0xc0d   :  { %4914 = vmatprep.subr.bf16.mxu0 %v6533_v22  ;;  %4946 = vmatprep.subr.bf16.mxu1 %v6535_v46 }
 0xc10   :  { %4916 = vmatpush1.bf16.msra.mxu0 %v6538_v27  ;;  %4948 = vmatpush1.bf16.msra.mxu1 %v6542_v38 }
 0xc11   :  { %4918 = vmatprep.subr.bf16.mxu0 %v6544_v52  ;;  %4950 = vmatprep.subr.bf16.mxu1 %v6546_v7 }
 0xc14   :  { %4920 = vmatpush1.bf16.msra.mxu0 %v6549_v47  ;;  %4952 = vmatpush1.bf16.msra.mxu1 %v6553_v63 }
 0xc15   :  { %4922 = vmatprep.subr.bf16.mxu0 %v6555_v10  ;;  %4954 = vmatprep.subr.bf16.mxu1 %v6558_v26 }
 0xc18   :  { %4924 = vmatpush1.bf16.msra.mxu0 %v6561_v40  ;;  %4956 = vmatpush1.bf16.msra.mxu1 %v6565_v54 }
 0xc19   :  { %4926 = vmatprep.subr.bf16.mxu0 %v6570_v14  ;;  %4958 = vmatprep.subr.bf16.mxu1 %v6572_v8 }
 0xc1c   :  { %4928 = vmatpush1.bf16.msra.mxu0 %v6574_v17  ;;  %4960 = vmatpush1.bf16.msra.mxu1 %v6577_v41 }
 0xc1d   :  { %4962 = vmatprep.subr.bf16.mxu0 %v6486_v43  ;;  %4994 = vmatprep.subr.bf16.mxu1 %v6488_v51 }
 0xcd2   :  { %v2987_v30 = vpop.f32.mrb[22].mxu0  ;;  %v3058_v59 = vpop.f32.mrb[22].mxu1 }
 0xcd3   :  { %v5215_v25 = vadd.f32 %v2987_v30, %v6629_v45  ;;  %v2989_v20 = vpop.f32.mrb[23].mxu0  ;;  %v3060_v28 = vpop.f32.mrb[23].mxu1  ;;  %v5231_v23 = vadd.f32 %v3058_v59, %v6644_v34 }
 0xcd4   :  { %v5216_v50 = vadd.f32 %v2989_v20, %v6633_v21  ;;  %v5232_v13 = vadd.f32 %v3060_v28, %v6639_v32 }
 0xcd5   :  { %v3933_v56 = vmul.f32 -1.442695, %v5215_v25 }
 0xcd6   :  { %v3934_v60 = vmul.f32 -1.442695, %v5216_v50  ;;  %v3935_v19 = vmul.f32 -1.442695, %v5232_v13 }
 0xcd7   :  { %5498 = vpow2.f32 %v3933_v56 }
 0xcd8   :  { %5500 = vpow2.f32 %v3934_v60 }
 0xcd9   :  { %5502 = vpow2.f32 %v3935_v19 }
 0xcda   :  { %5504 = vtanh.f32 %v5231_v23 }
 0xce1   :  { %v5499_v31 = vpop.eup %5498 }
 0xce2   :  { %v5501_v36 = vpop.eup %5500  ;;  %v3070_v58 = vadd.f32 1.0, %v5499_v31 }
 0xce3   :  { %v3076_v62 = vadd.f32 1.0, %v5501_v36  ;;  %v5503_v35 = vpop.eup %5502 }
 0xce4   :  { %5506 = vrcp.f32 %v3070_v58  ;;  %v5505_v9 = vpop.eup %5504  ;;  %v3083_v2 = vadd.f32 1.0, %v5503_v35 }
 0xce5   :  { %5508 = vrcp.f32 %v3076_v62 }
 0xce6   :  { %5510 = vrcp.f32 %v3083_v2 }
 0xcee   :  { %v5507_v37 = vpop.eup %5506 }
 0xcef   :  { %v5509_v42 = vpop.eup %5508  ;;  %v3087_v18 = vmul.f32 %v5507_v37, %v5505_v9 }
 0xcf0   :  { %v3086_v15 = vmul.f32 %v5509_v42, %v6731_v57  ;;  %v5511_v1 = vpop.eup %5510 }
 0xcf2   :  { %v6773_v11 = vadd.f32 %v3087_v18, %v3086_v15 }
 0xcf4   :  { %5512 = vtanh.f32 %v6773_v11 }
 0xcfe   :  { %v5513_v49 = vpop.eup %5512 }
 0xcff   :  { %v3090_v33 = vmul.f32 %v5513_v49, %v5511_v1 }
 0xd01   :  { %3160 = vmatmul.mubr.f32.vlgmr.msra.gmra.mrb[24].mxu0 %v3090_v33  ;;  %3231 = vmatmul.mubr.f32.vlgmr.msra.gmra.mrb[24].mxu1 %v3090_v33 }
 0xd02   :  { %4964 = vmatpush1.bf16.msra.mxu0 %v6490_v39  ;;  %4996 = vmatpush1.bf16.msra.mxu1 %v6493_v55 }
 0xd03   :  { %4966 = vmatprep.subr.bf16.mxu0 %v6498_v61  ;;  %4998 = vmatprep.subr.bf16.mxu1 %v6500_v24 }
 0xd04   :  { %3333 = vmatprep.mubr.f32.mxu0 %v5823_v0  ;;  %3404 = vmatprep.mubr.f32.mxu1 %v5823_v0 }
 0xd06   :  { %4968 = vmatpush1.bf16.msra.mxu0 %v6502_v12  ;;  %5000 = vmatpush1.bf16.msra.mxu1 %v6505_v5 }
 0xd07   :  { %4970 = vmatprep.subr.bf16.mxu0 %v6510_v53  ;;  %5002 = vmatprep.subr.bf16.mxu1 %v6512_v3 }
 0xd0a   :  { %4972 = vmatpush1.bf16.msra.mxu0 %v6514_v6  ;;  %5004 = vmatpush1.bf16.msra.mxu1 %v6517_v16 }
 0xd0b   :  { %4974 = vmatprep.subr.bf16.mxu0 %v6522_v29  ;;  %5006 = vmatprep.subr.bf16.mxu1 %v6524_v44 }
 0xd0e   :  { %4976 = vmatpush1.bf16.msra.mxu0 %v6526_v48  ;;  %5008 = vmatpush1.bf16.msra.mxu1 %v6529_v4 }
 0xd0f   :  { %4978 = vmatprep.subr.bf16.mxu0 %v6533_v22  ;;  %5010 = vmatprep.subr.bf16.mxu1 %v6535_v46 }
 0xd12   :  { %4980 = vmatpush1.bf16.msra.mxu0 %v6538_v27  ;;  %5012 = vmatpush1.bf16.msra.mxu1 %v6542_v38 }
 0xd13   :  { %4982 = vmatprep.subr.bf16.mxu0 %v6544_v52  ;;  %5014 = vmatprep.subr.bf16.mxu1 %v6546_v7 }
 0xd16   :  { %4984 = vmatpush1.bf16.msra.mxu0 %v6549_v47  ;;  %5016 = vmatpush1.bf16.msra.mxu1 %v6553_v63 }
 0xd17   :  { %4986 = vmatprep.subr.bf16.mxu0 %v6555_v10  ;;  %5018 = vmatprep.subr.bf16.mxu1 %v6558_v26 }
 0xd1a   :  { %4988 = vmatpush1.bf16.msra.mxu0 %v6561_v40  ;;  %5020 = vmatpush1.bf16.msra.mxu1 %v6565_v54 }
 0xd1b   :  { %4990 = vmatprep.subr.bf16.mxu0 %v6570_v14  ;;  %5022 = vmatprep.subr.bf16.mxu1 %v6572_v8 }
 0xd1e   :  { %4992 = vmatpush1.bf16.msra.mxu0 %v6574_v17  ;;  %5024 = vmatpush1.bf16.msra.mxu1 %v6577_v41 }
 0xd1f   :  { %5026 = vmatprep.subr.bf16.mxu0 %v6486_v43  ;;  %5058 = vmatprep.subr.bf16.mxu1 %v6488_v51 }
 0xdd4   :  { %v3161_v57 = vpop.f32.mrb[24].mxu0  ;;  %v3232_v30 = vpop.f32.mrb[24].mxu1 }
 0xdd5   :  { %v5217_v59 = vadd.f32 %v3161_v57, %v6629_v45  ;;  %v3163_v25 = vpop.f32.mrb[25].mxu0  ;;  %v3234_v20 = vpop.f32.mrb[25].mxu1  ;;  %v5233_v19 = vadd.f32 %v3232_v30, %v6644_v34 }
 0xdd6   :  { %v5218_v28 = vadd.f32 %v3163_v25, %v6633_v21  ;;  %v5234_v60 = vadd.f32 %v3234_v20, %v6639_v32 }
 0xdd7   :  { %v3936_v50 = vmul.f32 -1.442695, %v5217_v59 }
 0xdd8   :  { %v3937_v56 = vmul.f32 -1.442695, %v5218_v28  ;;  %v3938_v13 = vmul.f32 -1.442695, %v5234_v60 }
 0xdd9   :  { %5514 = vpow2.f32 %v3936_v50 }
 0xdda   :  { %5516 = vpow2.f32 %v3937_v56 }
 0xddb   :  { %5518 = vpow2.f32 %v3938_v13 }
 0xddc   :  { %5520 = vtanh.f32 %v5233_v19 }
 0xde3   :  { %v5515_v23 = vpop.eup %5514 }
 0xde4   :  { %v5517_v31 = vpop.eup %5516  ;;  %v3244_v36 = vadd.f32 1.0, %v5515_v23 }
 0xde5   :  { %v3250_v58 = vadd.f32 1.0, %v5517_v31  ;;  %v5519_v62 = vpop.eup %5518 }
 0xde6   :  { %5522 = vrcp.f32 %v3244_v36  ;;  %v5521_v35 = vpop.eup %5520  ;;  %v3257_v18 = vadd.f32 1.0, %v5519_v62 }
 0xde7   :  { %5524 = vrcp.f32 %v3250_v58 }
 0xde8   :  { %5526 = vrcp.f32 %v3257_v18 }
 0xdf0   :  { %v5523_v9 = vpop.eup %5522 }
 0xdf1   :  { %v5525_v37 = vpop.eup %5524  ;;  %v3261_v42 = vmul.f32 %v5523_v9, %v5521_v35 }
 0xdf2   :  { %v3260_v2 = vmul.f32 %v5525_v37, %v6773_v11  ;;  %v5527_v1 = vpop.eup %5526 }
 0xdf4   :  { %v6815_v15 = vadd.f32 %v3261_v42, %v3260_v2 }
 0xdf6   :  { %5528 = vtanh.f32 %v6815_v15 }
 0xe00   :  { %v5529_v49 = vpop.eup %5528 }
 0xe01   :  { %v3264_v33 = vmul.f32 %v5529_v49, %v5527_v1  ;;  %v3790_v49 = vld [vmem:[#allocation16 + $0x18] sm:$0xff] }
 0xe03   :  { %3334 = vmatmul.mubr.f32.vlgmr.msra.gmra.mrb[26].mxu0 %v3264_v33  ;;  %3405 = vmatmul.mubr.f32.vlgmr.msra.gmra.mrb[26].mxu1 %v3264_v33 }
 0xe04   :  { %5028 = vmatpush1.bf16.msra.mxu0 %v6490_v39  ;;  %5060 = vmatpush1.bf16.msra.mxu1 %v6493_v55 }
 0xe05   :  { %5030 = vmatprep.subr.bf16.mxu0 %v6498_v61  ;;  %5062 = vmatprep.subr.bf16.mxu1 %v6500_v24 }
 0xe06   :  { %3507 = vmatprep.mubr.f32.mxu0 %v5823_v0  ;;  %3578 = vmatprep.mubr.f32.mxu1 %v5823_v0 }
 0xe08   :  { %5032 = vmatpush1.bf16.msra.mxu0 %v6502_v12  ;;  %5064 = vmatpush1.bf16.msra.mxu1 %v6505_v5 }
 0xe09   :  { %5034 = vmatprep.subr.bf16.mxu0 %v6510_v53  ;;  %5066 = vmatprep.subr.bf16.mxu1 %v6512_v3 }
 0xe0c   :  { %5036 = vmatpush1.bf16.msra.mxu0 %v6514_v6  ;;  %5068 = vmatpush1.bf16.msra.mxu1 %v6517_v16 }
 0xe0d   :  { %5038 = vmatprep.subr.bf16.mxu0 %v6522_v29  ;;  %5070 = vmatprep.subr.bf16.mxu1 %v6524_v44 }
 0xe10   :  { %5040 = vmatpush1.bf16.msra.mxu0 %v6526_v48  ;;  %5072 = vmatpush1.bf16.msra.mxu1 %v6529_v4 }
 0xe11   :  { %5042 = vmatprep.subr.bf16.mxu0 %v6533_v22  ;;  %5074 = vmatprep.subr.bf16.mxu1 %v6535_v46 }
 0xe14   :  { %5044 = vmatpush1.bf16.msra.mxu0 %v6538_v27  ;;  %5076 = vmatpush1.bf16.msra.mxu1 %v6542_v38 }
 0xe15   :  { %5046 = vmatprep.subr.bf16.mxu0 %v6544_v52  ;;  %5078 = vmatprep.subr.bf16.mxu1 %v6546_v7 }
 0xe18   :  { %5048 = vmatpush1.bf16.msra.mxu0 %v6549_v47  ;;  %5080 = vmatpush1.bf16.msra.mxu1 %v6553_v63 }
 0xe19   :  { %5050 = vmatprep.subr.bf16.mxu0 %v6555_v10  ;;  %5082 = vmatprep.subr.bf16.mxu1 %v6558_v26 }
 0xe1c   :  { %5052 = vmatpush1.bf16.msra.mxu0 %v6561_v40  ;;  %5084 = vmatpush1.bf16.msra.mxu1 %v6565_v54 }
 0xe1d   :  { %5054 = vmatprep.subr.bf16.mxu0 %v6570_v14  ;;  %5086 = vmatprep.subr.bf16.mxu1 %v6572_v8 }
 0xe20   :  { %5056 = vmatpush1.bf16.msra.mxu0 %v6574_v17  ;;  %5088 = vmatpush1.bf16.msra.mxu1 %v6577_v41 }
 0xe21   :  { %5090 = vmatprep.subr.bf16.mxu0 %v6486_v43  ;;  %5122 = vmatprep.subr.bf16.mxu1 %v6488_v51 }
 0xed6   :  { %v3335_v11 = vpop.f32.mrb[26].mxu0  ;;  %v3406_v57 = vpop.f32.mrb[26].mxu1 }
 0xed7   :  { %v5219_v30 = vadd.f32 %v3335_v11, %v6629_v45  ;;  %v3337_v59 = vpop.f32.mrb[27].mxu0  ;;  %v3408_v25 = vpop.f32.mrb[27].mxu1  ;;  %v5235_v13 = vadd.f32 %v3406_v57, %v6644_v34  ;;  %v3791_v11 = vld [vmem:[#allocation16 + $0x20] sm:$0xff]  ;;  %v3792_v57 = vld [vmem:[#allocation16 + $0x28] sm:$0xff] }
 0xed8   :  { %v5220_v20 = vadd.f32 %v3337_v59, %v6633_v21  ;;  %v5236_v56 = vadd.f32 %v3408_v25, %v6639_v32  ;;  %v3793_v59 = vld [vmem:[#allocation16 + $0x30] sm:$0xff]  ;;  %v3794_v25 = vld [vmem:[#allocation16 + $0x38] sm:$0xff] }
 0xed9   :  { %v3939_v28 = vmul.f32 -1.442695, %v5219_v30  ;;  %v5160_v30 = vpack.c.bf16 %v3792_v57, %v3791_v11 }
 0xeda   :  { %v3940_v50 = vmul.f32 -1.442695, %v5220_v20  ;;  %v3941_v60 = vmul.f32 -1.442695, %v5236_v56  ;;  %v5163_v20 = vpack.c.bf16 %v3794_v25, %v3793_v59 }
 0xedb   :  { %5530 = vpow2.f32 %v3939_v28  ;;  %v3795_v28 = vld [vmem:[#allocation16 + $0x40] sm:$0xff] }
 0xedc   :  { %5532 = vpow2.f32 %v3940_v50  ;;  %v3796_v50 = vld [vmem:[#allocation16 + $0x48] sm:$0xff] }
 0xedd   :  { %5534 = vpow2.f32 %v3941_v60  ;;  %v5166_v56 = vpack.c.bf16 %v3796_v50, %v3795_v28  ;;  %v3797_v60 = vld [vmem:[#allocation16 + $0x50] sm:$0xff] }
 0xede   :  { %5536 = vtanh.f32 %v5235_v13  ;;  %v3798_v13 = vld [vmem:[#allocation16 + $0x58] sm:$0xff] }
 0xee5   :  { %v5531_v43 = vpop.eup %5530 }
 0xee6   :  { %v5533_v19 = vpop.eup %5532  ;;  %v3418_v51 = vadd.f32 1.0, %v5531_v43  ;;  %v3799_v43 = vld [vmem:[#allocation16 + $0x60] sm:$0xff] }
 0xee7   :  { %v3424_v23 = vadd.f32 1.0, %v5533_v19  ;;  %v5535_v31 = vpop.eup %5534  ;;  %v5169_v19 = vpack.c.bf16 %v3798_v13, %v3797_v60 }
 0xee8   :  { %5538 = vrcp.f32 %v3418_v51  ;;  %v5537_v36 = vpop.eup %5536  ;;  %v3431_v9 = vadd.f32 1.0, %v5535_v31  ;;  %v3800_v51 = vld [vmem:[#allocation16 + $0x68] sm:$0xff]  ;;  %v3801_v31 = vld [vmem:[#allocation16 + $0x70] sm:$0xff] }
 0xee9   :  { %5540 = vrcp.f32 %v3424_v23  ;;  %v5172_v23 = vpack.c.bf16 %v3800_v51, %v3799_v43 }
 0xeea   :  { %5542 = vrcp.f32 %v3431_v9 }
 0xef2   :  { %v5539_v58 = vpop.eup %5538 }
 0xef3   :  { %v5541_v62 = vpop.eup %5540  ;;  %v3435_v35 = vmul.f32 %v5539_v58, %v5537_v36  ;;  %v3802_v36 = vld [vmem:[#allocation16 + $0x78] sm:$0xff] }
 0xef4   :  { %v3434_v37 = vmul.f32 %v5541_v62, %v6815_v15  ;;  %v5543_v18 = vpop.eup %5542  ;;  %v3789_v15 = vld [vmem:[#allocation16 + $0x10] sm:$0xff]  ;;  %v5175_v58 = vpack.c.bf16 %v3802_v36, %v3801_v31 }
 0xef5   :  { %v5157_v33 = vpack.c.bf16 %v3790_v49, %v3789_v15 }
 0xef6   :  { %v6857_v42 = vadd.f32 %v3435_v35, %v3434_v37 }
 0xef8   :  { %5544 = vtanh.f32 %v6857_v42 }
 0xf02   :  { %v5545_v2 = vpop.eup %5544 }
 0xf03   :  { %v3438_v1 = vmul.f32 %v5545_v2, %v5543_v18 }
 0xf05   :  { %3508 = vmatmul.mubr.f32.vlgmr.msra.gmra.mrb[28].mxu0 %v3438_v1  ;;  %3579 = vmatmul.mubr.f32.vlgmr.msra.gmra.mrb[28].mxu1 %v3438_v1 }
 0xf06   :  { %5092 = vmatpush1.bf16.msra.mxu0 %v6490_v39  ;;  %5124 = vmatpush1.bf16.msra.mxu1 %v6493_v55 }
 0xf07   :  { %5094 = vmatprep.subr.bf16.mxu0 %v6498_v61  ;;  %5126 = vmatprep.subr.bf16.mxu1 %v6500_v24 }
 0xf08   :  { %3681 = vmatprep.mubr.f32.mxu0 %v5823_v0  ;;  %3752 = vmatprep.mubr.f32.mxu1 %v5823_v0 }
 0xf0a   :  { %5096 = vmatpush1.bf16.msra.mxu0 %v6502_v12  ;;  %5128 = vmatpush1.bf16.msra.mxu1 %v6505_v5 }
 0xf0b   :  { %5098 = vmatprep.subr.bf16.mxu0 %v6510_v53  ;;  %5130 = vmatprep.subr.bf16.mxu1 %v6512_v3 }
 0xf0e   :  { %5100 = vmatpush1.bf16.msra.mxu0 %v6514_v6  ;;  %5132 = vmatpush1.bf16.msra.mxu1 %v6517_v16 }
 0xf0f   :  { %5102 = vmatprep.subr.bf16.mxu0 %v6522_v29  ;;  %5134 = vmatprep.subr.bf16.mxu1 %v6524_v44 }
 0xf12   :  { %5104 = vmatpush1.bf16.msra.mxu0 %v6526_v48  ;;  %5136 = vmatpush1.bf16.msra.mxu1 %v6529_v4 }
 0xf13   :  { %5106 = vmatprep.subr.bf16.mxu0 %v6533_v22  ;;  %5138 = vmatprep.subr.bf16.mxu1 %v6535_v46 }
 0xf16   :  { %5108 = vmatpush1.bf16.msra.mxu0 %v6538_v27  ;;  %5140 = vmatpush1.bf16.msra.mxu1 %v6542_v38 }
 0xf17   :  { %5110 = vmatprep.subr.bf16.mxu0 %v6544_v52  ;;  %5142 = vmatprep.subr.bf16.mxu1 %v6546_v7 }
 0xf1a   :  { %5112 = vmatpush1.bf16.msra.mxu0 %v6549_v47  ;;  %5144 = vmatpush1.bf16.msra.mxu1 %v6553_v63 }
 0xf1b   :  { %5114 = vmatprep.subr.bf16.mxu0 %v6555_v10  ;;  %5146 = vmatprep.subr.bf16.mxu1 %v6558_v26 }
 0xf1e   :  { %5116 = vmatpush1.bf16.msra.mxu0 %v6561_v40  ;;  %5148 = vmatpush1.bf16.msra.mxu1 %v6565_v54 }
 0xf1f   :  { %5118 = vmatprep.subr.bf16.mxu0 %v6570_v14  ;;  %5150 = vmatprep.subr.bf16.mxu1 %v6572_v8  ;;  %v3787_v14 = vld [vmem:[#allocation16] sm:$0xff]  ;;  %v3788_v8 = vld [vmem:[#allocation16 + $0x8] sm:$0xff] }
 0xf22   :  { %5120 = vmatpush1.bf16.msra.mxu0 %v6574_v17  ;;  %5152 = vmatpush1.bf16.msra.mxu1 %v6577_v41  ;;  %v5154_v17 = vpack.c.bf16 %v3788_v8, %v3787_v14  ;;  %v5824_v41 = vmov 0.0|0.0  }
 0xf23   :  { %5153 = vmatprep.subr.bf16.mxu0 %v5824_v41 }
 0xfd8   :  { %v3509_v39 = vpop.f32.mrb[28].mxu0  ;;  %v3580_v55 = vpop.f32.mrb[28].mxu1 }
 0xfd9   :  { %v5221_v61 = vadd.f32 %v3509_v39, %v6629_v45  ;;  %v3511_v24 = vpop.f32.mrb[29].mxu0  ;;  %v3582_v12 = vpop.f32.mrb[29].mxu1  ;;  %v5237_v29 = vadd.f32 %v3580_v55, %v6644_v34 }
 0xfda   :  { %v5222_v5 = vadd.f32 %v3511_v24, %v6633_v21  ;;  %v5238_v6 = vadd.f32 %v3582_v12, %v6639_v32 }
 0xfdb   :  { %v3942_v53 = vmul.f32 -1.442695, %v5221_v61 }
 0xfdc   :  { %v3943_v3 = vmul.f32 -1.442695, %v5222_v5  ;;  %v3944_v16 = vmul.f32 -1.442695, %v5238_v6 }
 0xfdd   :  { %5546 = vpow2.f32 %v3942_v53 }
 0xfde   :  { %5548 = vpow2.f32 %v3943_v3 }
 0xfdf   :  { %5550 = vpow2.f32 %v3944_v16 }
 0xfe0   :  { %5552 = vtanh.f32 %v5237_v29 }
 0xfe7   :  { %v5547_v44 = vpop.eup %5546 }
 0xfe8   :  { %v5549_v48 = vpop.eup %5548  ;;  %v3592_v4 = vadd.f32 1.0, %v5547_v44 }
 0xfe9   :  { %v3598_v22 = vadd.f32 1.0, %v5549_v48  ;;  %v5551_v46 = vpop.eup %5550 }
 0xfea   :  { %5554 = vrcp.f32 %v3592_v4  ;;  %v5553_v27 = vpop.eup %5552  ;;  %v3605_v47 = vadd.f32 1.0, %v5551_v46  ;;  %v3948_v4 = vld [vmem:[#allocation18] ss:$0 sm:$0xff] }
 0xfeb   :  { %5556 = vrcp.f32 %v3598_v22 }
 0xfec   :  { %5558 = vrcp.f32 %v3605_v47 }
 0xff4   :  { %v5555_v38 = vpop.eup %5554 }
 0xff5   :  { %v5557_v52 = vpop.eup %5556  ;;  %v3609_v7 = vmul.f32 %v5555_v38, %v5553_v27 }
 0xff6   :  { %v3608_v63 = vmul.f32 %v5557_v52, %v6857_v42  ;;  %v5559_v26 = vpop.eup %5558 }
 0xff8   :  { %v6897_v10 = vadd.f32 %v3609_v7, %v3608_v63 }
 0xffa   :  { %5560 = vtanh.f32 %v6897_v10 }
0x1004   :  { %v5561_v40 = vpop.eup %5560 }
0x1005   :  { %v3612_v54 = vmul.f32 %v5561_v40, %v5559_v26 }
0x1007   :  { %3682 = vmatmul.mubr.f32.vlgmr.msra.gmra.mrb[30].mxu0 %v3612_v54  ;;  %3753 = vmatmul.mubr.f32.vlgmr.msra.gmra.mrb[30].mxu1 %v3612_v54 }
0x1008   :  { %5155 = vmatpush3.bf16.msra.mxu0 %v5154_v17  ;;  %3998 = vmatprep.mubr.msk.f32.mxu0 %vm5825_vm0, %v5823_v0 }
0x1009   :  { %5156 = vmatprep.subr.bf16.mxu0 %v5824_v41 }
0x100c   :  { %5158 = vmatpush3.bf16.msra.mxu0 %v5157_v33 }
0x100d   :  { %5159 = vmatprep.subr.bf16.mxu0 %v5824_v41 }
0x1010   :  { %5161 = vmatpush3.bf16.msra.mxu0 %v5160_v30 }
0x1011   :  { %5162 = vmatprep.subr.bf16.mxu0 %v5824_v41 }
0x1014   :  { %5164 = vmatpush3.bf16.msra.mxu0 %v5163_v20 }
0x1015   :  { %5165 = vmatprep.subr.bf16.mxu0 %v5824_v41 }
0x1018   :  { %5167 = vmatpush3.bf16.msra.mxu0 %v5166_v56 }
0x1019   :  { %5168 = vmatprep.subr.bf16.mxu0 %v5824_v41 }
0x101c   :  { %5170 = vmatpush3.bf16.msra.mxu0 %v5169_v19 }
0x101d   :  { %5171 = vmatprep.subr.bf16.mxu0 %v5824_v41 }
0x1020   :  { %5173 = vmatpush3.bf16.msra.mxu0 %v5172_v23 }
0x1021   :  { %5174 = vmatprep.subr.bf16.mxu0 %v5824_v41 }
0x1024   :  { %5176 = vmatpush3.bf16.msra.mxu0 %v5175_v58 }
0x10da   :  { %v3683_v62 = vpop.f32.mrb[30].mxu0  ;;  %v3754_v35 = vpop.f32.mrb[30].mxu1 }
0x10db   :  { %v5223_v9 = vadd.f32 %v3683_v62, %v6629_v45  ;;  %v3685_v37 = vpop.f32.mrb[31].mxu0  ;;  %v3756_v42 = vpop.f32.mrb[31].mxu1  ;;  %v5239_v55 = vadd.f32 %v3754_v35, %v6644_v34 }
0x10dc   :  { %v5224_v18 = vadd.f32 %v3685_v37, %v6633_v21  ;;  %v5240_v0 = vadd.f32 %v3756_v42, %v6639_v32 }
0x10dd   :  { %v3945_v2 = vmul.f32 -1.442695, %v5223_v9 }
0x10de   :  { %v3946_v1 = vmul.f32 -1.442695, %v5224_v18  ;;  %v3947_v39 = vmul.f32 -1.442695, %v5240_v0 }
0x10df   :  { %5562 = vpow2.f32 %v3945_v2 }
0x10e0   :  { %5564 = vpow2.f32 %v3946_v1 }
0x10e1   :  { %5566 = vpow2.f32 %v3947_v39 }
0x10e2   :  { %5568 = vtanh.f32 %v5239_v55 }
0x10e9   :  { %v5563_v61 = vpop.eup %5562 }
0x10ea   :  { %v5565_v24 = vpop.eup %5564  ;;  %v3766_v12 = vadd.f32 1.0, %v5563_v61 }
0x10eb   :  { %v3772_v5 = vadd.f32 1.0, %v5565_v24  ;;  %v5567_v45 = vpop.eup %5566 }
0x10ec   :  { %5570 = vrcp.f32 %v3766_v12  ;;  %v5569_v53 = vpop.eup %5568  ;;  %v3779_v16 = vadd.f32 1.0, %v5567_v45 }
0x10ed   :  { %5572 = vrcp.f32 %v3772_v5 }
0x10ee   :  { %5574 = vrcp.f32 %v3779_v16 }
0x10f6   :  { %v5571_v21 = vpop.eup %5570 }
0x10f7   :  { %v5573_v3 = vpop.eup %5572  ;;  %v3783_v6 = vmul.f32 %v5571_v21, %v5569_v53 }
0x10f8   :  { %v3782_v29 = vmul.f32 %v5573_v3, %v6897_v10  ;;  %v5575_v34 = vpop.eup %5574 }
0x10fa   :  { %v3784_v32 = vadd.f32 %v3783_v6, %v3782_v29 }
0x10fc   :  { %5576 = vtanh.f32 %v3784_v32 }
0x1106   :  { %v5577_v44 = vpop.eup %5576 }
0x1107   :  { %v3786_v48 = vmul.f32 %v5577_v44, %v5575_v34 }
0x1109   :  { %3999 = vmatmul.mubr.f32.vlgmr.msra.gmra.mrb[32].mxu0 %v3786_v48 }
0x11dc   :  { %v3876_v22 = vpop.f32.mrb[32].mxu0 }
0x11dd   :  { %v3877_v46 = vadd.f32 %v3948_v4, %v3876_v22  ;;  %v4000_v27 = vpop.f32.mrb[33].mxu0 }
0x11df   :  { %3880 = vst [vmem:[#allocation19] sm:$0xff] %v3877_v46 }
0x11e0   :  { %5787 = shalt.err (!%p5784_p6)
}
0x11e1   :  { %s5788_s28 = scalar_lea.hbm %s6927_s9, 128 }
0x11e2   :  { %p5789_p7 = scmp.ne.s32.totalorder %s6927_s9, %s5788_s28  ;;  %p5792_p8 = scmp.lt.u32.totalorder %s5788_s28, %s6927_s9 }
0x11e4   :  { %p5794_p9 = pnand %p5792_p8, %p5789_p7 }
0x11e6   :  { %5797 = shalt.err (!%p5794_p9)
}
0x11e7   :  { %3890 = dma.vmem_to_hbm [thread:$0]  %s3888_s27, 128, %s6927_s9, [#allocation6]  }
0x11e8   :  { %5808 = dma.done.wait [#allocation6], 128  }
0x11e9   :  { %5809 = vsyncadd [#allocation6], 4294967168 }
0x11ea   :  { %3894 = vsyncpa [#allocation5], 1 }
0x11eb   :  { %3895 = vsyncpa [#allocation8], 1 }
0x11ec   :  { %3896 = vsyncpa [#allocation11], 1 }
0x11ed   :  { %3897 = vsyncpa [#allocation14], 1 }
0x11ee   :  { %3898 = vsyncpa [#allocation17], 1 }
0x11ef   :  { %3899 = vsyncpa [#allocation6], 1 }

</bundles_post_ra>
